<compile_context>
chip_gen: v7x
topology: tpu7x:2x2x1
jax: 0.10.0
libtpu: 0.0.40
codegen_flags: <defaults>
</compile_context>

<pallas_src>
import functools

import jax
import jax.numpy as jnp
from jax.experimental import pallas as pl
from jax.experimental.pallas import tpu as pltpu

MAT_DIFF_LOSS_SCALE = 0.001
_MAX_TB = 128  # batch tile: ~4 MiB lane-padded trans block, 2x buffered -> fits
               # v5e's 16 MiB default scoped VMEM and v7x's 64 MiB physical VMEM.


def _round_up(x, m):
    return ((x + m - 1) // m) * m


def _make_loss_kernel(b_true, tb, k_dim, n_cls):
    """Kernel closure over static batch size / tile size / dims."""

    def kernel(pred_ref, target_ref, trans_ref, part_ref):
        pid = pl.program_id(0)

        pred = pred_ref[...].astype(jnp.float32)   # (TB, C) log-probs
        target = target_ref[...]                   # (TB, 1) i32
        trans = trans_ref[...]                     # (TB, K, K) native dtype

        # Valid-row mask (handles the padded / ragged last tile).
        row_ids = pid * tb + jax.lax.broadcasted_iota(jnp.int32, (tb, 1), 0)
        valid = (row_ids < b_true).astype(jnp.float32)            # (TB, 1)

        # ---- NLL partial sum: -sum_i pred[i, target[i]] (one-hot gather) ----
        # TODO(synk): F.nll_loss ignore_index / class weights not implemented
        # (unused by the module).
        col_ids = jax.lax.broadcasted_iota(jnp.int32, (tb, n_cls), 1)
        one_hot = (col_ids == target).astype(jnp.float32)          # (TB, C)
        picked = jnp.sum(pred * one_hot, axis=1, keepdims=True)    # (TB, 1)
        nll_sum = -jnp.sum(picked * valid)

        # ---- regularizer partial sum: sum_b ||T_b T_b^T - I||_F ----
        # ||G - I||_F^2 = sum(G^2) - 2*sum(T^2) + K   (G = T T^T)
        gram = jnp.einsum('bik,bjk->bij', trans, trans,
                          preferred_element_type=jnp.float32)      # (TB, K, K)
        g2 = jnp.sum(jnp.sum(gram * gram, axis=2), axis=1, keepdims=True)  # (TB,1)
        t32 = trans.astype(jnp.float32)
        t2 = jnp.sum(jnp.sum(t32 * t32, axis=2), axis=1, keepdims=True)    # (TB,1)
        sq = jnp.maximum(g2 - 2.0 * t2 + float(k_dim), 0.0)
        fro = jnp.sqrt(sq)                                                 # (TB,1)
        fro_sum = jnp.sum(fro * valid)

        # Lane-dense per-tile partial output block:
        #   sublane 0 -> nll_sum, sublane 1 -> fro_sum (broadcast across lanes).
        sub = jax.lax.broadcasted_iota(jnp.int32, (1, 8, 128), 1)
        part_ref[...] = jnp.where(sub == 0, nll_sum,
                                  jnp.where(sub == 1, fro_sum, 0.0))

    return kernel


@functools.partial(jax.jit, static_argnames=("tb",))
def point_loss_classification(pred, target, trans_feat,
                              mat_diff_loss_scale=MAT_DIFF_LOSS_SCALE,
                              tb=None):
    """pred: (B, C) log-probs; target: (B,) int; trans_feat: (B, K, K)."""
    B, C = pred.shape
    K = trans_feat.shape[1]

    tile = tb if tb is not None else min(_MAX_TB, _round_up(B, 8))
    b_pad = _round_up(B, tile)
    n_tiles = b_pad // tile

    target2d = target.reshape(B, 1).astype(jnp.int32)
    if b_pad != B:
        padn = b_pad - B
        pred = jnp.pad(pred, ((0, padn), (0, 0)))
        target2d = jnp.pad(target2d, ((0, padn), (0, 0)))
        trans_feat = jnp.pad(trans_feat, ((0, padn), (0, 0), (0, 0)))

    cost = pl.CostEstimate(
        flops=int(2 * b_pad * K * K * K + 8 * b_pad * K * K + 2 * b_pad * C),
        transcendentals=int(b_pad),
        bytes_accessed=int(b_pad * K * K * trans_feat.dtype.itemsize
                           + b_pad * C * pred.dtype.itemsize
                           + b_pad * 4
                           + n_tiles * 8 * 128 * 4),
    )

    parts = pl.pallas_call(
        _make_loss_kernel(B, tile, K, C),
        out_shape=jax.ShapeDtypeStruct((n_tiles, 8, 128), jnp.float32),
        grid_spec=pltpu.PrefetchScalarGridSpec(
            num_scalar_prefetch=0,
            grid=(n_tiles,),
            in_specs=[
                pl.BlockSpec((tile, C), lambda i: (i, 0)),       # pred
                pl.BlockSpec((tile, 1), lambda i: (i, 0)),       # target
                pl.BlockSpec((tile, K, K), lambda i: (i, 0, 0)),  # trans_feat
            ],
            out_specs=pl.BlockSpec((1, 8, 128), lambda i: (i, 0, 0)),
        ),
        compiler_params=pltpu.CompilerParams(
            dimension_semantics=("parallel",),       # independent tiles (2 TCs on v7x)
            vmem_limit_bytes=32 * 1024 * 1024,       # safe on v5e/v6e/v7x
        ),
        cost_estimate=cost,
    )(pred, target2d, trans_feat)

    # Final reduction in the wrapper: divide the accumulated sums by the true B
    # (padded rows were masked inside the kernel).
    nll = jnp.sum(parts[:, 0, 0]) / B
    reg = jnp.sum(parts[:, 1, 0]) / B
    return nll + reg * mat_diff_loss_scale


def _reference_loss(pred, target, trans_feat, scale=MAT_DIFF_LOSS_SCALE):
    # Pure-JAX reference mirroring the PyTorch module.
    B = pred.shape[0]
    K = trans_feat.shape[1]
    nll = -jnp.mean(pred[jnp.arange(B), target])
    gram = jnp.einsum('bik,bjk->bij', trans_feat, trans_feat)
    diff = gram - jnp.eye(K, dtype=jnp.float32)[None]
    fro = jnp.sqrt(jnp.sum(diff * diff, axis=(1, 2)))
    return nll + jnp.mean(fro) * scale


if __name__ == "__main__":
    key = jax.random.PRNGKey(0)
    k1, k2, k3 = jax.random.split(key, 3)

    B, C, K = 20, 16, 64
    logits = jax.random.normal(k1, (B, C), dtype=jnp.float32)
    pred = jax.nn.log_softmax(logits, axis=-1)                  # (B, C) log-probs
    target = jax.random.randint(k2, (B,), 0, C, dtype=jnp.int32)
    trans_feat = 0.1 * jax.random.normal(k3, (B, K, K), dtype=jnp.float32)

    ref = _reference_loss(pred, target, trans_feat)

    # Default tiling (single tile, TB = round_up(B, 8)).
    total = jax.block_until_ready(point_loss_classification(pred, target, trans_feat))
    assert jnp.allclose(total, ref, rtol=1e-5, atol=1e-5), (total, ref)

    # Small tile to exercise the multi-tile grid + ragged-last-tile masking path.
    total_tiled = jax.block_until_ready(
        point_loss_classification(pred, target, trans_feat, tb=8))
    assert jnp.allclose(total_tiled, ref, rtol=1e-5, atol=1e-5), (total_tiled, ref)

    print("KERNEL_OK")
</pallas_src>

<mosaic_0001>
module attributes {stable_mosaic.version = 11 : i64} {
  func.func @kernel(%arg0: i32, %arg1: memref<24x16xf32, #tpu.memory_space<vmem>>, %arg2: memref<24x1xi32, #tpu.memory_space<vmem>>, %arg3: memref<24x64x64xf32, #tpu.memory_space<vmem>>, %arg4: memref<1x8x128xf32, #tpu.memory_space<vmem>>) attributes {dimension_semantics = [#tpu.dimension_semantics<parallel>], iteration_bounds = array<i64: 1>, scalar_prefetch = 0 : i64, scratch_operands = 0 : i64, tpu.core_type = #tpu.core_type<tc>, window_params = [{transform_indices = @transform_0, window_bounds = array<i64: 24, 16>}, {transform_indices = @transform_1, window_bounds = array<i64: 24, 1>}, {transform_indices = @transform_2, window_bounds = array<i64: 24, 64, 64>}, {transform_indices = @transform_3, window_bounds = array<i64: 1, 8, 128>}]} {
    %c0 = arith.constant 0 : index
    %c0_0 = arith.constant 0 : index
    %0 = vector.load %arg1[%c0, %c0_0] : memref<24x16xf32, #tpu.memory_space<vmem>>, vector<24x16xf32>
    %c0_1 = arith.constant 0 : index
    %c0_2 = arith.constant 0 : index
    %1 = vector.load %arg2[%c0_1, %c0_2] : memref<24x1xi32, #tpu.memory_space<vmem>>, vector<24x1xi32>
    %c0_3 = arith.constant 0 : index
    %c0_4 = arith.constant 0 : index
    %c0_5 = arith.constant 0 : index
    %2 = vector.load %arg3[%c0_3, %c0_4, %c0_5] : memref<24x64x64xf32, #tpu.memory_space<vmem>>, vector<24x64x64xf32>
    %c24_i32 = arith.constant 24 : i32
    %3 = arith.muli %arg0, %c24_i32 : i32
    %4 = tpu.iota {dimensions = array<i32: 0>} : vector<24x1xi32>
    %5 = vector.broadcast %3 : i32 to vector<24x1xi32>
    %6 = arith.addi %5, %4 : vector<24x1xi32>
    %c20_i32 = arith.constant 20 : i32
    %7 = vector.broadcast %c20_i32 : i32 to vector<24x1xi32>
    %8 = arith.cmpi slt, %6, %7 : vector<24x1xi32>
    %9 = arith.extui %8 : vector<24x1xi1> to vector<24x1xi32>
    %10 = arith.sitofp %9 : vector<24x1xi32> to vector<24x1xf32>
    %11 = tpu.iota {dimensions = array<i32: 1>} : vector<24x16xi32>
    %12 = vector.broadcast %1 : vector<24x1xi32> to vector<24x16xi32>
    %13 = arith.cmpi eq, %11, %12 : vector<24x16xi32>
    %14 = arith.extui %13 : vector<24x16xi1> to vector<24x16xi32>
    %15 = arith.sitofp %14 : vector<24x16xi32> to vector<24x16xf32>
    %16 = arith.mulf %0, %15 : vector<24x16xf32>
    %cst = arith.constant dense<0.000000e+00> : vector<24xf32>
    %17 = vector.multi_reduction <add>, %16, %cst [1] : vector<24x16xf32> to vector<24xf32>
    %18 = vector.shape_cast %17 : vector<24xf32> to vector<24x1xf32>
    %19 = arith.mulf %18, %10 : vector<24x1xf32>
    %20 = vector.shape_cast %19 : vector<24x1xf32> to vector<1x24x1xf32>
    %cst_6 = arith.constant dense<0.000000e+00> : vector<1xf32>
    %21 = vector.multi_reduction <add>, %20, %cst_6 [1, 2] : vector<1x24x1xf32> to vector<1xf32>
    %22 = vector.shape_cast %21 : vector<1xf32> to vector<1x1x1xf32>
    %23 = vector.extract %22[0, 0, 0] : f32 from vector<1x1x1xf32>
    %cst_7 = arith.constant 0.000000e+00 : f32
    %24 = arith.subf %cst_7, %23 : f32
    "tpu.trace_start"() <{level = 10 : i32, message = "bik,bjk->bij"}> : () -> ()
    %cst_8 = arith.constant dense<0.000000e+00> : vector<24x64x64xf32>
    %25 = tpu.matmul %2, %2, %cst_8 {dimension_numbers = #tpu.dot_dimension_numbers<[2], [2], [1], [1], [0, 0, 0, 1, 1, 1], [0], [0]>} : vector<24x64x64xf32>, vector<24x64x64xf32>, vector<24x64x64xf32> -> vector<24x64x64xf32>
    "tpu.trace_stop"() : () -> ()
    %26 = arith.mulf %25, %25 : vector<24x64x64xf32>
    %cst_9 = arith.constant dense<0.000000e+00> : vector<24x64xf32>
    %27 = vector.multi_reduction <add>, %26, %cst_9 [2] : vector<24x64x64xf32> to vector<24x64xf32>
    %cst_10 = arith.constant dense<0.000000e+00> : vector<24xf32>
    %28 = vector.multi_reduction <add>, %27, %cst_10 [1] : vector<24x64xf32> to vector<24xf32>
    %29 = vector.shape_cast %28 : vector<24xf32> to vector<24x1xf32>
    %30 = arith.mulf %2, %2 : vector<24x64x64xf32>
    %cst_11 = arith.constant dense<0.000000e+00> : vector<24x64xf32>
    %31 = vector.multi_reduction <add>, %30, %cst_11 [2] : vector<24x64x64xf32> to vector<24x64xf32>
    %cst_12 = arith.constant dense<0.000000e+00> : vector<24xf32>
    %32 = vector.multi_reduction <add>, %31, %cst_12 [1] : vector<24x64xf32> to vector<24xf32>
    %33 = vector.shape_cast %32 : vector<24xf32> to vector<24x1xf32>
    %cst_13 = arith.constant 2.000000e+00 : f32
    %34 = vector.broadcast %cst_13 : f32 to vector<24x1xf32>
    %35 = arith.mulf %34, %33 : vector<24x1xf32>
    %36 = arith.subf %29, %35 : vector<24x1xf32>
    %cst_14 = arith.constant 6.400000e+01 : f32
    %37 = vector.broadcast %cst_14 : f32 to vector<24x1xf32>
    %38 = arith.addf %36, %37 : vector<24x1xf32>
    %cst_15 = arith.constant 0.000000e+00 : f32
    %39 = vector.broadcast %cst_15 : f32 to vector<24x1xf32>
    %40 = arith.maximumf %38, %39 : vector<24x1xf32>
    %41 = math.sqrt %40 : vector<24x1xf32>
    %42 = arith.mulf %41, %10 : vector<24x1xf32>
    %43 = vector.shape_cast %42 : vector<24x1xf32> to vector<1x24x1xf32>
    %cst_16 = arith.constant dense<0.000000e+00> : vector<1xf32>
    %44 = vector.multi_reduction <add>, %43, %cst_16 [1, 2] : vector<1x24x1xf32> to vector<1xf32>
    %45 = vector.shape_cast %44 : vector<1xf32> to vector<1x1x1xf32>
    %46 = vector.extract %45[0, 0, 0] : f32 from vector<1x1x1xf32>
    %47 = tpu.iota {dimensions = array<i32: 1>} : vector<1x8x128xi32>
    %c0_i32 = arith.constant 0 : i32
    %48 = vector.broadcast %c0_i32 : i32 to vector<1x8x128xi32>
    %49 = arith.cmpi eq, %47, %48 : vector<1x8x128xi32>
    %c1_i32 = arith.constant 1 : i32
    %50 = vector.broadcast %c1_i32 : i32 to vector<1x8x128xi32>
    %51 = arith.cmpi eq, %47, %50 : vector<1x8x128xi32>
    %cst_17 = arith.constant 0.000000e+00 : f32
    %52 = vector.broadcast %46 : f32 to vector<1x8x128xf32>
    %53 = vector.broadcast %cst_17 : f32 to vector<1x8x128xf32>
    %54 = arith.select %51, %52, %53 : vector<1x8x128xi1>, vector<1x8x128xf32>
    %55 = vector.broadcast %24 : f32 to vector<1x8x128xf32>
    %56 = arith.select %49, %55, %54 : vector<1x8x128xi1>, vector<1x8x128xf32>
    %c0_18 = arith.constant 0 : index
    %c0_19 = arith.constant 0 : index
    %c0_20 = arith.constant 0 : index
    %57 = vector.load %arg4[%c0_18, %c0_19, %c0_20] : memref<1x8x128xf32, #tpu.memory_space<vmem>>, vector<1x8x128xf32>
    tpu.vector_store %arg4[%c0_18, %c0_19, %c0_20], %56 {strides = array<i32>} : memref<1x8x128xf32, #tpu.memory_space<vmem>>, vector<1x8x128xf32>,
    return
  }
  func.func @transform_0(%arg0: i32) -> (i32, i32) {
    %c0_i32 = arith.constant 0 : i32
    %c0_i32_0 = arith.constant 0 : i32
    return %arg0, %c0_i32 : i32, i32
  }
  func.func @transform_1(%arg0: i32) -> (i32, i32) {
    %c0_i32 = arith.constant 0 : i32
    %c0_i32_0 = arith.constant 0 : i32
    return %arg0, %c0_i32 : i32, i32
  }
  func.func @transform_2(%arg0: i32) -> (i32, i32, i32) {
    %c0_i32 = arith.constant 0 : i32
    %c0_i32_0 = arith.constant 0 : i32
    %c0_i32_1 = arith.constant 0 : i32
    return %arg0, %c0_i32, %c0_i32_0 : i32, i32, i32
  }
  func.func @transform_3(%arg0: i32) -> (i32, i32, i32) {
    %c0_i32 = arith.constant 0 : i32
    %c0_i32_0 = arith.constant 0 : i32
    %c0_i32_1 = arith.constant 0 : i32
    return %arg0, %c0_i32, %c0_i32_0 : i32, i32, i32
  }
}

</mosaic_0001>

<bundles_post_ra>
// kernel: point_loss_classification.1
= control target key start
LH: loop header
LB: loop body
LE: loop exit
PB: predicated region body
PF: predicated region fallthrough
CT: control target
= control target key end

     0   :  { %vm282_vm0 = vcmask 523264   ;;  %v9472_v0 = vmov 0   ;;  %vm253_vm4 = vcmask 130048   ;;  %vm266_vm7 = vcmask 7168   ;;  %s13999_s1 = inlined_call_operand.vmem [shape: s32[24,1], index: 1, kind: input, shape index: {}]   ;;  %s14000_s2 = inlined_call_operand.vmem [shape: f32[24,64,64], index: 2, kind: input, shape index: {}]   ;;  %s14001_s0 = inlined_call_operand.vmem [shape: f32[24,16], index: 0, kind: input, shape index: {}]   ;;  %s14002_s3 = inlined_call_operand.vmem [shape: f32[1,8,128], index: 3, kind: output, shape index: {}]  }
   0x1   :  { %9346 = vset.pattern.permute.xlu1 %v9472_v0  ;;  %9345 = vset.pattern.permute.xlu0 %v9472_v0  ;;  %v19_v1 = vld [vmem:[%s13999_s1 + $0x10] sm:$0xff]  ;;  %v17_v2 = vld [vmem:[%s13999_s1] sm:$0xff]  ;;  %v21_v4 = vld [vmem:[%s14000_s2 + $0x8] sm:$0xff]  ;;  %vm4348_vm8 = vcmask 130112   ;;  %vm4355_vm9 = vcmask 195712   ;;  %vm4362_vm10 = vcmask 261312  }
   0x2   :  { %v20_v3 = vld [vmem:[%s14000_s2] sm:$0xff]  ;;  %239 = vperm.xlu1 %9346, %v19_v1   ;;  %233 = vperm.xlu0 %9345, %v17_v2   ;;  %vm9508_vm1 = vmpackc.low %vm282_vm0, %vm282_vm0  ;;  %v18_v6 = vld [vmem:[%s13999_s1 + $0x8] sm:$0xff]  ;;  %v5330_v35 = vmul.f32 %v21_v4, %v21_v4  ;;  %vm4369_vm11 = vcmask 326912   ;;  %vm4376_vm12 = vcmask 392512   ;;  %vm4383_vm13 = vcmask 458112  }
   0x3   :  { %v8763_v7 = vpack.c.bf16 %v21_v4, %v20_v3  ;;  %v9518_v8 = vld [vmem:[%s14000_s2 + $0x40] sm:$0xff]  ;;  %v9523_v9 = vld [vmem:[%s14000_s2 + $0x48] sm:$0xff]  ;;  %v9528_v10 = vld [vmem:[%s14000_s2 + $0x10] sm:$0xff]  ;;  %8107 = vmatprep.mubr.msk.f32.mxu0 %vm282_vm0, %v20_v3  ;;  %v5329_v36 = vmul.f32 %v20_v3, %v20_v3  ;;  %vm4390_vm14 = vcmask 523712   ;;  %vm5289_vm15 = vcmask 1041409  }
   0x4   :  { %v8787_v11 = vpack.c.bf16 %v9523_v9, %v9518_v8  ;;  %v9536_v12 = vld [vmem:[%s14000_s2 + $0x18] sm:$0xff]  ;;  %v9541_v13 = vld [vmem:[%s14000_s2 + $0x50] sm:$0xff]  ;;  %8135 = vmatprep.mubr.msk.f32.mxu1 %vm282_vm0, %v9518_v8  ;;  %v9567_v17 = vld [vmem:[%s14000_s2 + $0x20] sm:$0xff]  ;;  %v5524_v37 = vsel %vm282_vm0, %v5330_v35, 0.0  ;;  %v5331_v40 = vmul.f32 %v9528_v10, %v9528_v10  ;;  %v5338_v62 = vmul.f32 %v9523_v9, %v9523_v9 }
   0x5   :  { %v9546_v14 = vld [vmem:[%s14000_s2 + $0x58] sm:$0xff]  ;;  %8765 = vmatprep.subr.msk.bf16.mxu0 %vm9508_vm1, %v8763_v7  ;;  %v8769_v15 = vpack.c.bf16 %v9536_v12, %v9528_v10  ;;  %v9572_v18 = vld [vmem:[%s14000_s2 + $0x28] sm:$0xff]  ;;  %v9579_v19 = vld [vmem:[%s14000_s2 + $0x60] sm:$0xff]  ;;  %v5332_v38 = vmul.f32 %v9536_v12, %v9536_v12  ;;  %v5521_v39 = vsel %vm282_vm0, %v5329_v36, 0.0  ;;  %v5333_v49 = vmul.f32 %v9567_v17, %v9567_v17 }
   0x6   :  { %v8793_v16 = vpack.c.bf16 %v9546_v14, %v9541_v13  ;;  %8768 = vmatpush3.bf16.xpose.msk.msra.mxu0 %vm9508_vm1, %v8763_v7  ;;  %236 = vperm.xlu0 %9345, %v18_v6   ;;  %v9584_v20 = vld [vmem:[%s14000_s2 + $0x68] sm:$0xff]  ;;  %v8775_v21 = vpack.c.bf16 %v9572_v18, %v9567_v17  ;;  %v9599_v23 = vld [vmem:[%s14000_s2 + $0x30] sm:$0xff]  ;;  %v9604_v24 = vld [vmem:[%s14000_s2 + $0x38] sm:$0xff]  ;;  %v5334_v46 = vmul.f32 %v9572_v18, %v9572_v18  ;;  %v5527_v48 = vsel %vm282_vm0, %v5331_v40, 0.0 }
   0x7   :  { %8789 = vmatprep.subr.msk.bf16.mxu1 %vm9508_vm1, %v8787_v11  ;;  %8771 = vmatprep.subr.msk.bf16.mxu0 %vm9508_vm1, %v8769_v15  ;;  %v8799_v22 = vpack.c.bf16 %v9584_v20, %v9579_v19  ;;  %v9611_v25 = vld [vmem:[%s14000_s2 + $0x70] sm:$0xff]  ;;  %v9616_v26 = vld [vmem:[%s14000_s2 + $0x78] sm:$0xff]  ;;  %v8781_v27 = vpack.c.bf16 %v9604_v24, %v9599_v23  ;;  %v9631_v29 = vld [vmem:[%s14000_s2 + $0x80] sm:$0xff]  ;;  %v5530_v45 = vsel %vm282_vm0, %v5332_v38, 0.0  ;;  %v5336_v54 = vmul.f32 %v9604_v24, %v9604_v24 }
   0x8   :  { %8792 = vmatpush3.bf16.xpose.msk.msra.mxu1 %vm9508_vm1, %v8787_v11  ;;  %v8805_v28 = vpack.c.bf16 %v9616_v26, %v9611_v25  ;;  %v9636_v30 = vld [vmem:[%s14000_s2 + $0x88] sm:$0xff]  ;;  %v9643_v31 = vld [vmem:[%s14000_s2 + $0xc0] sm:$0xff]  ;;  %v9671_v41 = vld [vmem:[%s14000_s2 + $0x90] sm:$0xff]  ;;  %v5536_v53 = vsel %vm282_vm0, %v5334_v46, 0.0  ;;  %v5533_v57 = vsel %vm282_vm0, %v5333_v49, 0.0  ;;  %v5335_v58 = vmul.f32 %v9599_v23, %v9599_v23 }
   0x9   :  { %8795 = vmatprep.subr.msk.bf16.mxu1 %vm9508_vm1, %v8793_v16  ;;  %v9648_v32 = vld [vmem:[%s14000_s2 + $0xc8] sm:$0xff]  ;;  %v8811_v33 = vpack.c.bf16 %v9636_v30, %v9631_v29  ;;  %v9676_v42 = vld [vmem:[%s14000_s2 + $0x98] sm:$0xff]  ;;  %v9682_v43 = vld [vmem:[%s14000_s2 + $0xd0] sm:$0xff]  ;;  %v5542_v61 = vsel %vm282_vm0, %v5336_v54, 0.0  ;;  %v5337_v0 = vmul.f32 %v9518_v8, %v9518_v8  ;;  %v5548_v3 = vsel %vm282_vm0, %v5338_v62, 0.0 }
   0xa   :  { %v8835_v34 = vpack.c.bf16 %v9648_v32, %v9643_v31  ;;  %v9687_v44 = vld [vmem:[%s14000_s2 + $0xd8] sm:$0xff]  ;;  %v8817_v47 = vpack.c.bf16 %v9676_v42, %v9671_v41  ;;  %v9712_v51 = vld [vmem:[%s14000_s2 + $0xa0] sm:$0xff]  ;;  %v9717_v52 = vld [vmem:[%s14000_s2 + $0xa8] sm:$0xff]  ;;  %v5539_v63 = vsel %vm282_vm0, %v5335_v58, 0.0  ;;  %v5348_v36 = vmul.f32 %v9676_v42, %v9676_v42 }
   0xb   :  { %v8841_v50 = vpack.c.bf16 %v9687_v44, %v9682_v43  ;;  %v9729_v55 = vld [vmem:[%s14000_s2 + $0xe0] sm:$0xff]  ;;  %v9734_v56 = vld [vmem:[%s14000_s2 + $0xe8] sm:$0xff]  ;;  %v8823_v59 = vpack.c.bf16 %v9717_v52, %v9712_v51  ;;  %v9772_v1 = vld [vmem:[%s14000_s2 + $0xb0] sm:$0xff]  ;;  %v5545_v8 = vsel %vm282_vm0, %v5337_v0, 0.0  ;;  %v5347_v38 = vmul.f32 %v9671_v41, %v9671_v41 }
   0xc   :  { %v8847_v60 = vpack.c.bf16 %v9734_v56, %v9729_v55  ;;  %v9777_v2 = vld [vmem:[%s14000_s2 + $0xb8] sm:$0xff]  ;;  %v9789_v6 = vld [vmem:[%s14000_s2 + $0xf0] sm:$0xff]  ;;  %v5578_v46 = vsel %vm282_vm0, %v5348_v36, 0.0  ;;  %v9942_v58 = vld [vmem:[%s14000_s2 + $0x168] sm:$0xff]  ;;  %v5353_v0 = vmul.f32 %v9643_v31, %v9643_v31 }
   0xd   :  { %v9794_v7 = vld [vmem:[%s14000_s2 + $0xf8] sm:$0xff]  ;;  %v9890_v40 = vld [vmem:[%s14000_s2 + $0x150] sm:$0xff]  ;;  %v5352_v54 = vmul.f32 %v9777_v2, %v9777_v2 }
   0xe   :  { %8774 = vmatpush3.bf16.xpose.msk.msra.mxu0 %vm9508_vm1, %v8769_v15  ;;  %v8853_v11 = vpack.c.bf16 %v9794_v7, %v9789_v6  ;;  %v5341_v15 = vmul.f32 %v9579_v19, %v9579_v19  ;;  %v9877_v35 = vld [vmem:[%s14000_s2 + $0x118] sm:$0xff] }
   0xf   :  { %8777 = vmatprep.subr.msk.bf16.mxu0 %vm9508_vm1, %v8775_v21  ;;  %v5590_v62 = vsel %vm282_vm0, %v5352_v54, 0.0 }
  0x10   :  { %8798 = vmatpush3.bf16.xpose.msk.msra.mxu1 %vm9508_vm1, %v8793_v16  ;;  %v9826_v16 = vld [vmem:[%s14000_s2 + $0x100] sm:$0xff] }
  0x11   :  { %8801 = vmatprep.subr.msk.bf16.mxu1 %vm9508_vm1, %v8799_v22 }
  0x16   :  { %8780 = vmatpush3.bf16.xpose.msk.msra.mxu0 %vm9508_vm1, %v8775_v21  ;;  %v9846_v21 = vld [vmem:[%s14000_s2 + $0x148] sm:$0xff] }
  0x17   :  { %8783 = vmatprep.subr.msk.bf16.mxu0 %vm9508_vm1, %v8781_v27 }
  0x18   :  { %8804 = vmatpush3.bf16.xpose.msk.msra.mxu1 %vm9508_vm1, %v8799_v22  ;;  %v5557_v22 = vsel %vm282_vm0, %v5341_v15, 0.0  ;;  %v10049_v15 = vld [vmem:[%s14000_s2 + $0x1c0] sm:$0xff] }
  0x19   :  { %8807 = vmatprep.subr.msk.bf16.mxu1 %vm9508_vm1, %v8805_v28 }
  0x1e   :  { %8786 = vmatpush3.bf16.xpose.msk.msra.mxu0 %vm9508_vm1, %v8781_v27 }
  0x1f   :  { %8813 = vmatprep.subr.msk.bf16.mxu0 %vm9508_vm1, %v8811_v33 }
  0x20   :  { %8810 = vmatpush3.bf16.xpose.msk.msra.mxu1 %vm9508_vm1, %v8805_v28  ;;  %v5346_v28 = vmul.f32 %v9636_v30, %v9636_v30 }
  0x21   :  { %8837 = vmatprep.subr.msk.bf16.mxu1 %vm9508_vm1, %v8835_v34 }
  0x25   :  { %8108 = vmatmul.mubr.msk.f32.vlgmr.msra.gmra.mrb[0].mxu0 %vm282_vm0, %v21_v4  ;;  %5525 = vadd.xlane.f32.xlu0 %v5524_v37  ;;  %v5340_v4 = vmul.f32 %v9546_v14, %v9546_v14 }
  0x26   :  { %5522 = vadd.xlane.f32.xlu1 %v5521_v39  ;;  %8816 = vmatpush3.bf16.xpose.msk.msra.mxu0 %vm9508_vm1, %v8811_v33 }
  0x27   :  { %8136 = vmatmul.mubr.msk.f32.vlgmr.msra.gmra.mrb[0].mxu1 %vm282_vm0, %v9523_v9  ;;  %8110 = vmatprep.mubr.msk.f32.mxu0 %vm282_vm0, %v9528_v10  ;;  %v5339_v9 = vmul.f32 %v9541_v13, %v9541_v13  ;;  %v8829_v10 = vpack.c.bf16 %v9777_v2, %v9772_v1 }
  0x28   :  { %8840 = vmatpush3.bf16.xpose.msk.msra.mxu1 %vm9508_vm1, %v8835_v34  ;;  %8138 = vmatprep.mubr.msk.f32.mxu1 %vm282_vm0, %v9541_v13  ;;  %v5342_v13 = vmul.f32 %v9584_v20, %v9584_v20  ;;  %v9872_v34 = vld [vmem:[%s14000_s2 + $0x110] sm:$0xff] }
  0x29   :  { %5531 = vadd.xlane.f32.xlu0 %v5530_v45  ;;  %8111 = vmatmul.mubr.msk.f32.gmra.mrb[2].mxu0 %vm282_vm0, %v9536_v12  ;;  %v5554_v12 = vsel %vm282_vm0, %v5340_v4, 0.0  ;;  %v8865_v39 = vpack.c.bf16 %v9877_v35, %v9872_v34  ;;  %v9895_v45 = vld [vmem:[%s14000_s2 + $0x158] sm:$0xff] }
  0x2a   :  { %5528 = vadd.xlane.f32.xlu1 %v5527_v48  ;;  %8819 = vmatprep.subr.msk.bf16.mxu0 %vm9508_vm1, %v8817_v47  ;;  %v5575_v48 = vsel %vm282_vm0, %v5347_v38, 0.0  ;;  %v8889_v49 = vpack.c.bf16 %v9895_v45, %v9890_v40  ;;  %v10002_v4 = vld [vmem:[%s14000_s2 + $0x178] sm:$0xff] }
  0x2b   :  { %8139 = vmatmul.mubr.msk.f32.gmra.mrb[2].mxu1 %vm282_vm0, %v9546_v14  ;;  %8113 = vmatprep.mubr.msk.f32.mxu0 %vm282_vm0, %v9567_v17  ;;  %v5551_v14 = vsel %vm282_vm0, %v5339_v9, 0.0  ;;  %v9831_v17 = vld [vmem:[%s14000_s2 + $0x108] sm:$0xff]  ;;  %v5355_v9 = vmul.f32 %v9682_v43, %v9682_v43 }
  0x2c   :  { %8843 = vmatprep.subr.msk.bf16.mxu1 %vm9508_vm1, %v8841_v50  ;;  %8141 = vmatprep.mubr.msk.f32.mxu1 %vm282_vm0, %v9579_v19  ;;  %v5344_v19 = vmul.f32 %v9616_v26, %v9616_v26 }
  0x2d   :  { %5537 = vadd.xlane.f32.xlu0 %v5536_v53  ;;  %8114 = vmatmul.mubr.msk.f32.gmra.mrb[4].mxu0 %vm282_vm0, %v9572_v18  ;;  %v5560_v18 = vsel %vm282_vm0, %v5342_v13, 0.0  ;;  %v10034_v13 = vld [vmem:[%s14000_s2 + $0x180] sm:$0xff] }
  0x2e   :  { %5534 = vadd.xlane.f32.xlu1 %v5533_v57  ;;  %8822 = vmatpush3.bf16.xpose.msk.msra.mxu0 %vm9508_vm1, %v8817_v47  ;;  %v5566_v27 = vsel %vm282_vm0, %v5344_v19, 0.0  ;;  %v5350_v47 = vmul.f32 %v9717_v52, %v9717_v52  ;;  %v9937_v57 = vld [vmem:[%s14000_s2 + $0x160] sm:$0xff] }
  0x2f   :  { %8825 = vmatprep.subr.msk.bf16.mxu0 %vm9508_vm1, %v8823_v59  ;;  %8142 = vmatmul.mubr.msk.f32.gmra.mrb[4].mxu1 %vm282_vm0, %v9584_v20  ;;  %v9841_v20 = vld [vmem:[%s14000_s2 + $0x140] sm:$0xff] }
  0x30   :  { %8846 = vmatpush3.bf16.xpose.msk.msra.mxu1 %vm9508_vm1, %v8841_v50  ;;  %8116 = vmatprep.mubr.msk.f32.mxu0 %vm282_vm0, %v9599_v23  ;;  %v5343_v23 = vmul.f32 %v9611_v25, %v9611_v25  ;;  %v9920_v50 = vld [vmem:[%s14000_s2 + $0x120] sm:$0xff]  ;;  %v5584_v53 = vsel %vm282_vm0, %v5350_v47, 0.0  ;;  %v10114_v47 = vld [vmem:[%s14000_s2 + $0x248] sm:$0xff] }
  0x31   :  { %5543 = vadd.xlane.f32.xlu0 %v5542_v61  ;;  %8849 = vmatprep.subr.msk.bf16.mxu1 %vm9508_vm1, %v8847_v60  ;;  %v8895_v61 = vpack.c.bf16 %v9942_v58, %v9937_v57 }
  0x32   :  { %5540 = vadd.xlane.f32.xlu1 %v5539_v63  ;;  %8117 = vmatmul.mubr.msk.f32.gmra.mrb[6].mxu0 %vm282_vm0, %v9604_v24  ;;  %v8859_v24 = vpack.c.bf16 %v9831_v17, %v9826_v16  ;;  %v5563_v33 = vsel %vm282_vm0, %v5343_v23, 0.0  ;;  %v5354_v63 = vmul.f32 %v9648_v32, %v9648_v32  ;;  %v10062_v23 = vld [vmem:[%s14000_s2 + $0x200] sm:$0xff] }
  0x33   :  { %8144 = vmatprep.mubr.msk.f32.mxu1 %vm282_vm0, %v9611_v25  ;;  %8163 = vmatprep.mubr.msk.f32.mxu0 %vm282_vm0, %v9631_v29  ;;  %v5345_v25 = vmul.f32 %v9631_v29, %v9631_v29  ;;  %v5572_v29 = vsel %vm282_vm0, %v5346_v28, 0.0  ;;  %v5361_v28 = vmul.f32 %v9826_v16, %v9826_v16 }
  0x34   :  { %8145 = vmatmul.mubr.msk.f32.gmra.mrb[6].mxu1 %vm282_vm0, %v9616_v26  ;;  %v8883_v26 = vpack.c.bf16 %v9846_v21, %v9841_v20 }
  0x35   :  { %5549 = vadd.xlane.f32.xlu0 %v5548_v3  ;;  %8191 = vmatprep.mubr.msk.f32.mxu1 %vm282_vm0, %v9643_v31  ;;  %v5569_v37 = vsel %vm282_vm0, %v5345_v25, 0.0  ;;  %v9985_v31 = vld [vmem:[%s14000_s2 + $0x138] sm:$0xff]  ;;  %v9997_v3 = vld [vmem:[%s14000_s2 + $0x170] sm:$0xff]  ;;  %v10088_v25 = vld [vmem:[%s14000_s2 + $0x208] sm:$0xff]  ;;  %v5617_v38 = vsel %vm282_vm0, %v5361_v28, 0.0 }
  0x36   :  { %5546 = vadd.xlane.f32.xlu1 %v5545_v8  ;;  %8828 = vmatpush3.bf16.xpose.msk.msra.mxu0 %vm9508_vm1, %v8823_v59  ;;  %v5351_v59 = vmul.f32 %v9772_v1, %v9772_v1  ;;  %v5593_v8 = vsel %vm282_vm0, %v5353_v0, 0.0 }
  0x37   :  { %8831 = vmatprep.subr.msk.bf16.mxu0 %vm9508_vm1, %v8829_v10 }
  0x38   :  { %8852 = vmatpush3.bf16.xpose.msk.msra.mxu1 %vm9508_vm1, %v8847_v60 }
  0x39   :  { %5555 = vadd.xlane.f32.xlu0 %v5554_v12  ;;  %8855 = vmatprep.subr.msk.bf16.mxu1 %vm9508_vm1, %v8853_v11  ;;  %v5357_v12 = vmul.f32 %v9729_v55, %v9729_v55 }
  0x3a   :  { %5552 = vadd.xlane.f32.xlu1 %v5551_v14  ;;  %v5360_v14 = vmul.f32 %v9794_v7, %v9794_v7 }
  0x3b   :  { %v5605_v19 = vsel %vm282_vm0, %v5357_v12, 0.0  ;;  %v10227_v12 = vld [vmem:[%s14000_s2 + $0x1b0] sm:$0xff] }
  0x3d   :  { %5561 = vadd.xlane.f32.xlu0 %v5560_v18  ;;  %v10054_v18 = vld [vmem:[%s14000_s2 + $0x1c8] sm:$0xff] }
  0x3e   :  { %5558 = vadd.xlane.f32.xlu1 %v5557_v22  ;;  %8834 = vmatpush3.bf16.xpose.msk.msra.mxu0 %vm9508_vm1, %v8829_v10  ;;  %v5358_v10 = vmul.f32 %v9734_v56, %v9734_v56  ;;  %v5359_v22 = vmul.f32 %v9789_v6, %v9789_v6 }
  0x3f   :  { %8861 = vmatprep.subr.msk.bf16.mxu0 %vm9508_vm1, %v8859_v24 }
  0x40   :  { %8858 = vmatpush3.bf16.xpose.msk.msra.mxu1 %vm9508_vm1, %v8853_v11  ;;  %v5599_v11 = vsel %vm282_vm0, %v5355_v9, 0.0 }
  0x41   :  { %5567 = vadd.xlane.f32.xlu0 %v5566_v27  ;;  %8885 = vmatprep.subr.msk.bf16.mxu1 %vm9508_vm1, %v8883_v26  ;;  %v5611_v27 = vsel %vm282_vm0, %v5359_v22, 0.0 }
  0x42   :  { %5564 = vadd.xlane.f32.xlu1 %v5563_v33  ;;  %v10081_v33 = vld [vmem:[%s14000_s2 + $0x240] sm:$0xff] }
  0x45   :  { %5573 = vadd.xlane.f32.xlu0 %v5572_v29  ;;  %8164 = vmatmul.mubr.msk.f32.vlgmr.msra.gmra.mrb[8].mxu0 %vm282_vm0, %v9636_v30  ;;  %v5349_v30 = vmul.f32 %v9712_v51, %v9712_v51  ;;  %v10100_v29 = vld [vmem:[%s14000_s2 + $0x198] sm:$0xff] }
  0x46   :  { %5570 = vadd.xlane.f32.xlu1 %v5569_v37  ;;  %8864 = vmatpush3.bf16.xpose.msk.msra.mxu0 %vm9508_vm1, %v8859_v24  ;;  %v8931_v24 = vpack.c.bf16 %v10054_v18, %v10049_v15  ;;  %v5401_v37 = vmul.f32 %v10081_v33, %v10081_v33 }
  0x47   :  { %8192 = vmatmul.mubr.msk.f32.vlgmr.msra.gmra.mrb[8].mxu1 %vm282_vm0, %v9648_v32  ;;  %8166 = vmatprep.mubr.msk.f32.mxu0 %vm282_vm0, %v9671_v41  ;;  %v9925_v41 = vld [vmem:[%s14000_s2 + $0x128] sm:$0xff]  ;;  %v9980_v32 = vld [vmem:[%s14000_s2 + $0x130] sm:$0xff] }
  0x48   :  { %8888 = vmatpush3.bf16.xpose.msk.msra.mxu1 %vm9508_vm1, %v8883_v26  ;;  %8867 = vmatprep.subr.msk.bf16.mxu0 %vm9508_vm1, %v8865_v39  ;;  %v8871_v60 = vpack.c.bf16 %v9925_v41, %v9920_v50  ;;  %v5614_v26 = vsel %vm282_vm0, %v5360_v14, 0.0  ;;  %v10244_v14 = vld [vmem:[%s14000_s2 + $0x1f0] sm:$0xff] }
  0x49   :  { %5579 = vadd.xlane.f32.xlu0 %v5578_v46  ;;  %8167 = vmatmul.mubr.msk.f32.gmra.mrb[10].mxu0 %vm282_vm0, %v9676_v42  ;;  %v5581_v42 = vsel %vm282_vm0, %v5349_v30, 0.0  ;;  %v148_v46 = vld [vmem:[%s14000_s2 + $0x400] sm:$0xff]  ;;  %v10121_v30 = vld [vmem:[%s14000_s2 + $0x1d0] sm:$0xff] }
  0x4a   :  { %5576 = vadd.xlane.f32.xlu1 %v5575_v48  ;;  %8194 = vmatprep.mubr.msk.f32.mxu1 %vm282_vm0, %v9682_v43  ;;  %v5457_v54 = vmul.f32 %v148_v46, %v148_v46  ;;  %v8955_v46 = vpack.c.bf16 %v10088_v25, %v10062_v23 }
  0x4b   :  { %8195 = vmatmul.mubr.msk.f32.gmra.mrb[10].mxu1 %vm282_vm0, %v9687_v44  ;;  %8891 = vmatprep.subr.msk.bf16.mxu1 %vm9508_vm1, %v8889_v49 }
  0x4c   :  { %8169 = vmatprep.mubr.msk.f32.mxu0 %vm282_vm0, %v9712_v51  ;;  %8197 = vmatprep.mubr.msk.f32.mxu1 %vm282_vm0, %v9729_v55  ;;  %v5587_v51 = vsel %vm282_vm0, %v5351_v59, 0.0  ;;  %v5608_v55 = vsel %vm282_vm0, %v5358_v10, 0.0  ;;  %v5402_v59 = vmul.f32 %v10114_v47, %v10114_v47  ;;  %v5905_v0 = vsel %vm282_vm0, %v5457_v54, 0.0 }
  0x4d   :  { %5585 = vadd.xlane.f32.xlu0 %v5584_v53  ;;  %8170 = vmatmul.mubr.msk.f32.gmra.mrb[12].mxu0 %vm282_vm0, %v9717_v52  ;;  %v5596_v52 = vsel %vm282_vm0, %v5354_v63, 0.0  ;;  %v5737_v53 = vsel %vm282_vm0, %v5401_v37, 0.0  ;;  %v10155_v63 = vld [vmem:[%s14000_s2 + $0x1a0] sm:$0xff]  ;;  %v8979_v54 = vpack.c.bf16 %v10114_v47, %v10081_v33 }
  0x4e   :  { %5582 = vadd.xlane.f32.xlu1 %v5581_v42  ;;  %8870 = vmatpush3.bf16.xpose.msk.msra.mxu0 %vm9508_vm1, %v8865_v39  ;;  %v5394_v39 = vmul.f32 %v10088_v25, %v10088_v25  ;;  %v5740_v9 = vsel %vm282_vm0, %v5402_v59, 0.0 }
  0x4f   :  { %8873 = vmatprep.subr.msk.bf16.mxu0 %vm9508_vm1, %v8871_v60  ;;  %8198 = vmatmul.mubr.msk.f32.gmra.mrb[12].mxu1 %vm282_vm0, %v9734_v56  ;;  %v10039_v56 = vld [vmem:[%s14000_s2 + $0x188] sm:$0xff] }
  0x50   :  { %8894 = vmatpush3.bf16.xpose.msk.msra.mxu1 %vm9508_vm1, %v8889_v49  ;;  %8172 = vmatprep.mubr.msk.f32.mxu0 %vm282_vm0, %v9772_v1  ;;  %v5356_v1 = vmul.f32 %v9687_v44, %v9687_v44  ;;  %v8877_v44 = vpack.c.bf16 %v9985_v31, %v9980_v32  ;;  %v10126_v49 = vld [vmem:[%s14000_s2 + $0x1d8] sm:$0xff]  ;;  %v5716_v42 = vsel %vm282_vm0, %v5394_v39, 0.0 }
  0x51   :  { %5591 = vadd.xlane.f32.xlu0 %v5590_v62  ;;  %8897 = vmatprep.subr.msk.bf16.mxu1 %vm9508_vm1, %v8895_v61  ;;  %v149_v62 = vld [vmem:[%s14000_s2 + $0x408] sm:$0xff] }
  0x52   :  { %5588 = vadd.xlane.f32.xlu1 %v5587_v51  ;;  %8173 = vmatmul.mubr.msk.f32.gmra.mrb[14].mxu0 %vm282_vm0, %v9777_v2  ;;  %v8901_v2 = vpack.c.bf16 %v10002_v4, %v9997_v3  ;;  %v5602_v43 = vsel %vm282_vm0, %v5356_v1, 0.0  ;;  %v10160_v51 = vld [vmem:[%s14000_s2 + $0x1a8] sm:$0xff]  ;;  %v10170_v1 = vld [vmem:[%s14000_s2 + $0x1e0] sm:$0xff] }
  0x53   :  { %8200 = vmatprep.mubr.msk.f32.mxu1 %vm282_vm0, %v9789_v6  ;;  %8219 = vmatprep.mubr.msk.f32.mxu0 %vm282_vm0, %v9826_v16  ;;  %v5393_v6 = vmul.f32 %v10062_v23, %v10062_v23  ;;  %v10095_v16 = vld [vmem:[%s14000_s2 + $0x190] sm:$0xff] }
  0x54   :  { %8201 = vmatmul.mubr.msk.f32.gmra.mrb[14].mxu1 %vm282_vm0, %v9794_v7  ;;  %v8907_v7 = vpack.c.bf16 %v10039_v56, %v10034_v13  ;;  %v8913_v48 = vpack.c.bf16 %v10100_v29, %v10095_v16 }
  0x55   :  { %5597 = vadd.xlane.f32.xlu0 %v5596_v52  ;;  %8247 = vmatprep.mubr.msk.f32.mxu1 %vm282_vm0, %v9841_v20  ;;  %v5713_v36 = vsel %vm282_vm0, %v5393_v6, 0.0 }
  0x56   :  { %5594 = vadd.xlane.f32.xlu1 %v5593_v8  ;;  %8876 = vmatpush3.bf16.xpose.msk.msra.mxu0 %vm9508_vm1, %v8871_v60  ;;  %v156_v60 = vld [vmem:[%s14000_s2 + $0x440] sm:$0xff]  ;;  %v10175_v8 = vld [vmem:[%s14000_s2 + $0x1e8] sm:$0xff] }
  0x57   :  { %8879 = vmatprep.subr.msk.bf16.mxu0 %vm9508_vm1, %v8877_v44  ;;  %v5465_v52 = vmul.f32 %v156_v60, %v156_v60 }
  0x58   :  { %8900 = vmatpush3.bf16.xpose.msk.msra.mxu1 %vm9508_vm1, %v8895_v61  ;;  %v8937_v61 = vpack.c.bf16 %v10126_v49, %v10121_v30 }
  0x59   :  { %5603 = vadd.xlane.f32.xlu0 %v5602_v43  ;;  %8903 = vmatprep.subr.msk.bf16.mxu1 %vm9508_vm1, %v8901_v2 }
  0x5a   :  { %5600 = vadd.xlane.f32.xlu1 %v5599_v11 }
  0x5d   :  { %5609 = vadd.xlane.f32.xlu0 %v5608_v55 }
  0x5e   :  { %5606 = vadd.xlane.f32.xlu1 %v5605_v19  ;;  %8882 = vmatpush3.bf16.xpose.msk.msra.mxu0 %vm9508_vm1, %v8877_v44  ;;  %v8919_v44 = vpack.c.bf16 %v10160_v51, %v10155_v63  ;;  %v10249_v19 = vld [vmem:[%s14000_s2 + $0x1f8] sm:$0xff] }
  0x5f   :  { %8909 = vmatprep.subr.msk.bf16.mxu0 %vm9508_vm1, %v8907_v7  ;;  %v8949_v6 = vpack.c.bf16 %v10249_v19, %v10244_v14 }
  0x60   :  { %8906 = vmatpush3.bf16.xpose.msk.msra.mxu1 %vm9508_vm1, %v8901_v2  ;;  %v157_v2 = vld [vmem:[%s14000_s2 + $0x448] sm:$0xff] }
  0x61   :  { %5615 = vadd.xlane.f32.xlu0 %v5614_v26  ;;  %8933 = vmatprep.subr.msk.bf16.mxu1 %vm9508_vm1, %v8931_v24  ;;  %v5466_v11 = vmul.f32 %v157_v2, %v157_v2  ;;  %v10268_v26 = vld [vmem:[%s14000_s2 + $0x288] sm:$0xff] }
  0x62   :  { %5612 = vadd.xlane.f32.xlu1 %v5611_v27 }
  0x63   :  { %v5932_v22 = vsel %vm282_vm0, %v5466_v11, 0.0  ;;  %v15_v11 = vld [vmem:[%s14001_s0 + $0x8] sm:$0xff] }
  0x65   :  { %5714 = vadd.xlane.f32.xlu0 %v5713_v36  ;;  %8220 = vmatmul.mubr.msk.f32.vlgmr.msra.gmra.mrb[16].mxu0 %vm282_vm0, %v9831_v17  ;;  %v10294_v36 = vld [vmem:[%s14000_s2 + $0x450] sm:$0xff] }
  0x66   :  { %5618 = vadd.xlane.f32.xlu1 %v5617_v38  ;;  %8912 = vmatpush3.bf16.xpose.msk.msra.mxu0 %vm9508_vm1, %v8907_v7  ;;  %v14004_v38 = vlaneseq }
  0x67   :  { %8248 = vmatmul.mubr.msk.f32.vlgmr.msra.gmra.mrb[16].mxu1 %vm282_vm0, %v9846_v21  ;;  %8222 = vmatprep.mubr.msk.f32.mxu0 %vm282_vm0, %v9872_v34 }
  0x68   :  { %8936 = vmatpush3.bf16.xpose.msk.msra.mxu1 %vm9508_vm1, %v8931_v24  ;;  %8915 = vmatprep.subr.msk.bf16.mxu0 %vm9508_vm1, %v8913_v48  ;;  %v10257_v24 = vld [vmem:[%s14000_s2 + $0x410] sm:$0xff] }
  0x69   :  { %5738 = vadd.xlane.f32.xlu0 %v5737_v53  ;;  %8223 = vmatmul.mubr.msk.f32.gmra.mrb[18].mxu0 %vm282_vm0, %v9877_v35  ;;  %v5458_v35 = vmul.f32 %v149_v62, %v149_v62  ;;  %v5459_v27 = vmul.f32 %v10257_v24, %v10257_v24  ;;  %v5467_v53 = vmul.f32 %v10294_v36, %v10294_v36 }
  0x6a   :  { %5717 = vadd.xlane.f32.xlu1 %v5716_v42  ;;  %8250 = vmatprep.mubr.msk.f32.mxu1 %vm282_vm0, %v9890_v40  ;;  %v10185_v40 = vld [vmem:[%s14000_s2 + $0x210] sm:$0xff]  ;;  %v10309_v42 = vand.u32 127, %v14004_v38 }
  0x6b   :  { %8251 = vmatmul.mubr.msk.f32.gmra.mrb[18].mxu1 %vm282_vm0, %v9895_v45  ;;  %8939 = vmatprep.subr.msk.bf16.mxu1 %vm9508_vm1, %v8937_v61  ;;  %v8943_v45 = vpack.c.bf16 %v10175_v8, %v10170_v1  ;;  %v5395_v43 = vmul.f32 %v10185_v40, %v10185_v40  ;;  %v5908_v10 = vsel %vm282_vm0, %v5458_v35, 0.0  ;;  %v5911_v37 = vsel %vm282_vm0, %v5459_v27, 0.0 }
  0x6c   :  { %8225 = vmatprep.mubr.msk.f32.mxu0 %vm282_vm0, %v9920_v50  ;;  %8253 = vmatprep.mubr.msk.f32.mxu1 %vm282_vm0, %v9937_v57  ;;  %v5929_v50 = vsel %vm282_vm0, %v5465_v52, 0.0  ;;  %v10220_v57 = vld [vmem:[%s14000_s2 + $0x250] sm:$0xff]  ;;  %v5935_v60 = vsel %vm282_vm0, %v5467_v53, 0.0  ;;  %v14003_v35 = vmov 0.0  }
  0x6d   :  { %5906 = vadd.xlane.f32.xlu0 %v5905_v0  ;;  %8226 = vmatmul.mubr.msk.f32.gmra.mrb[20].mxu0 %vm282_vm0, %v9925_v41  ;;  %v10211_v41 = vld [vmem:[%s14000_s2 + $0x280] sm:$0xff]  ;;  %v5719_v55 = vsel %vm282_vm0, %v5395_v43, 0.0  ;;  %v5403_v7 = vmul.f32 %v10220_v57, %v10220_v57  ;;  %v10414_v53 = vld [vmem:[%s14000_s2 + $0x290] sm:$0xff] }
  0x6e   :  { %5741 = vadd.xlane.f32.xlu1 %v5740_v9  ;;  %8918 = vmatpush3.bf16.xpose.msk.msra.mxu0 %vm9508_vm1, %v8913_v48  ;;  %v14_v0 = vld [vmem:[%s14001_s0] sm:$0xff]  ;;  %v165_v9 = vld [vmem:[%s14000_s2 + $0x488] sm:$0xff] }
  0x6f   :  { %8921 = vmatprep.subr.msk.bf16.mxu0 %vm9508_vm1, %v8919_v44  ;;  %8254 = vmatmul.mubr.msk.f32.gmra.mrb[20].mxu1 %vm282_vm0, %v9942_v58  ;;  %v10232_v58 = vld [vmem:[%s14000_s2 + $0x1b8] sm:$0xff]  ;;  %v5743_v28 = vsel %vm282_vm0, %v5403_v7, 0.0 }
  0x70   :  { %8942 = vmatpush3.bf16.xpose.msk.msra.mxu1 %vm9508_vm1, %v8937_v61  ;;  %8228 = vmatprep.mubr.msk.f32.mxu0 %vm282_vm0, %v9980_v32  ;;  %v5409_v32 = vmul.f32 %v10211_v41, %v10211_v41  ;;  %v10320_v61 = vld [vmem:[%s14000_s2 + $0x218] sm:$0xff] }
  0x71   :  { %5930 = vadd.xlane.f32.xlu0 %v5929_v50  ;;  %8945 = vmatprep.subr.msk.bf16.mxu1 %vm9508_vm1, %v8943_v45  ;;  %v8961_v2 = vpack.c.bf16 %v10320_v61, %v10185_v40  ;;  %v5474_v50 = vmul.f32 %v165_v9, %v165_v9  ;;  %v10475_v9 = vld [vmem:[%s14000_s2 + $0x278] sm:$0xff] }
  0x72   :  { %5909 = vadd.xlane.f32.xlu1 %v5908_v10  ;;  %8229 = vmatmul.mubr.msk.f32.gmra.mrb[22].mxu0 %vm282_vm0, %v9985_v31  ;;  %v8925_v31 = vpack.c.bf16 %v10232_v58, %v10227_v12 }
  0x73   :  { %8256 = vmatprep.mubr.msk.f32.mxu1 %vm282_vm0, %v9997_v3  ;;  %8275 = vmatprep.mubr.msk.f32.mxu0 %vm282_vm0, %v10034_v13  ;;  %v5761_v3 = vsel %vm282_vm0, %v5409_v32, 0.0  ;;  %v10347_v32 = vld [vmem:[%s14000_s2 + $0x258] sm:$0xff] }
  0x74   :  { %8257 = vmatmul.mubr.msk.f32.gmra.mrb[22].mxu1 %vm282_vm0, %v10002_v4  ;;  %v5410_v4 = vmul.f32 %v10268_v26, %v10268_v26  ;;  %v8985_v7 = vpack.c.bf16 %v10347_v32, %v10220_v57 }
  0x75   :  { %5720 = vadd.xlane.f32.xlu0 %v5719_v55  ;;  %8303 = vmatprep.mubr.msk.f32.mxu1 %vm282_vm0, %v10049_v15  ;;  %v164_v15 = vld [vmem:[%s14000_s2 + $0x480] sm:$0xff]  ;;  %v16_v55 = vld [vmem:[%s14001_s0 + $0x10] sm:$0xff] }
  0x76   :  { %5933 = vadd.xlane.f32.xlu1 %v5932_v22  ;;  %8924 = vmatpush3.bf16.xpose.msk.msra.mxu0 %vm9508_vm1, %v8919_v44  ;;  %v5473_v39 = vmul.f32 %v164_v15, %v164_v15  ;;  %v5764_v48 = vsel %vm282_vm0, %v5410_v4, 0.0  ;;  %v10384_v4 = vld [vmem:[%s14000_s2 + $0x228] sm:$0xff] }
  0x77   :  { %8927 = vmatprep.subr.msk.bf16.mxu0 %vm9508_vm1, %v8925_v31  ;;  %v10399_v15 = vld [vmem:[%s14000_s2 + $0x268] sm:$0xff] }
  0x78   :  { %8948 = vmatpush3.bf16.xpose.msk.msra.mxu1 %vm9508_vm1, %v8943_v45  ;;  %v5953_v59 = vsel %vm282_vm0, %v5473_v39, 0.0 }
  0x79   :  { %5762 = vadd.xlane.f32.xlu0 %v5761_v3  ;;  %8951 = vmatprep.subr.msk.bf16.mxu1 %vm9508_vm1, %v8949_v6  ;;  %v5956_v3 = vsel %vm282_vm0, %v5474_v50, 0.0  ;;  %v10488_v50 = vld [vmem:[%s14000_s2 + $0x458] sm:$0xff] }
  0x7a   :  { %5744 = vadd.xlane.f32.xlu1 %v5743_v28  ;;  %v10379_v28 = vld [vmem:[%s14000_s2 + $0x220] sm:$0xff] }
  0x7d   :  { %5912 = vadd.xlane.f32.xlu0 %v5911_v37  ;;  %v5396_v37 = vmul.f32 %v10320_v61, %v10320_v61 }
  0x7e   :  { %5765 = vadd.xlane.f32.xlu1 %v5764_v48  ;;  %8930 = vmatpush3.bf16.xpose.msk.msra.mxu0 %vm9508_vm1, %v8925_v31  ;;  %v8967_v48 = vpack.c.bf16 %v10384_v4, %v10379_v28 }
  0x7f   :  { %8957 = vmatprep.subr.msk.bf16.mxu0 %vm9508_vm1, %v8955_v46 }
  0x80   :  { %8954 = vmatpush3.bf16.xpose.msk.msra.mxu1 %vm9508_vm1, %v8949_v6 }
  0x81   :  { %v234_v62 = vpop.permute.xlu0 %233  ;;  %5954 = vadd.xlane.f32.xlu0 %v5953_v59  ;;  %v240_v52 = vpop.permute.xlu1 %239  ;;  %8981 = vmatprep.subr.msk.bf16.mxu1 %vm9508_vm1, %v8979_v54  ;;  %v5722_v59 = vsel %vm282_vm0, %v5396_v37, 0.0 }
  0x82   :  { %vm241_vm2 = vcmp.eq.s32.totalorder %v10309_v42, %v234_v62  ;;  %5936 = vadd.xlane.f32.xlu1 %v5935_v60  ;;  %vm243_vm3 = vcmp.eq.s32.totalorder %v10309_v42, %v240_v52  ;;  %v166_v62 = vld [vmem:[%s14000_s2 + $0x490] sm:$0xff]  ;;  %v10461_v52 = vld [vmem:[%s14000_s2 + $0x238] sm:$0xff] }
  0x83   :  { %v7320_v44 = vsel %vm241_vm2, 1.0, %v14003_v35  ;;  %v7322_v10 = vsel %vm243_vm3, 1.0, %v14003_v35  ;;  %vm5293_vm2 = vcmask 1043459   ;;  %vm5295_vm3 = vcmask 1044484  }
  0x84   :  { %v250_v45 = vmul.f32 %v7320_v44, %v14_v0  ;;  %v252_v27 = vmul.f32 %v7322_v10, %v16_v55  ;;  %v10456_v0 = vld [vmem:[%s14000_s2 + $0x230] sm:$0xff] }
  0x85   :  { %v237_v43 = vpop.permute.xlu0 %236  ;;  %8276 = vmatmul.mubr.msk.f32.vlgmr.msra.gmra.mrb[24].mxu0 %vm282_vm0, %v10039_v56 }
  0x86   :  { %vm242_vm5 = vcmp.eq.s32.totalorder %v10309_v42, %v237_v43  ;;  %v254_v22 = vsel %vm253_vm4, %v250_v45, 0.0  ;;  %8960 = vmatpush3.bf16.xpose.msk.msra.mxu0 %vm9508_vm1, %v8955_v46  ;;  %8278 = vmatprep.mubr.msk.f32.mxu0 %vm282_vm0, %v10095_v16  ;;  %v5404_v16 = vmul.f32 %v10347_v32, %v10347_v32  ;;  %v260_v39 = vsel %vm253_vm4, %v252_v27, 0.0  ;;  %v10493_v43 = vld [vmem:[%s14000_s2 + $0x4c8] sm:$0xff] }
  0x87   :  { %v7321_v31 = vsel %vm242_vm5, 1.0, %v14003_v35  ;;  %255 = vadd.xlane.f32.xlu1 %v254_v22  ;;  %8304 = vmatmul.mubr.msk.f32.vlgmr.msra.gmra.mrb[24].mxu1 %vm282_vm0, %v10054_v18  ;;  %v10374_v18 = vld [vmem:[%s14000_s2 + $0x2c0] sm:$0xff]  ;;  %v8973_v45 = vpack.c.bf16 %v10461_v52, %v10456_v0  ;;  %v5482_v55 = vmul.f32 %v10493_v43, %v10493_v43  ;;  %v9003_v22 = vpack.c.bf16 %v10268_v26, %v10211_v41 }
  0x88   :  { %v251_v6 = vmul.f32 %v7321_v31, %v15_v11  ;;  %8984 = vmatpush3.bf16.xpose.msk.msra.mxu1 %vm9508_vm1, %v8979_v54  ;;  %8963 = vmatprep.subr.msk.bf16.mxu0 %vm9508_vm1, %v8961_v2  ;;  %v5746_v46 = vsel %vm282_vm0, %v5404_v16, 0.0  ;;  %v10421_v54 = vld [vmem:[%s14000_s2 + $0x418] sm:$0xff]  ;;  %vm5299_vm5 = vcmask 1046534  }
  0x89   :  { %8279 = vmatmul.mubr.msk.f32.gmra.mrb[26].mxu0 %vm282_vm0, %v10100_v29  ;;  %8306 = vmatprep.mubr.msk.f32.mxu1 %vm282_vm0, %v10121_v30  ;;  %v10394_v30 = vld [vmem:[%s14000_s2 + $0x260] sm:$0xff]  ;;  %v5980_v31 = vsel %vm282_vm0, %v5482_v55, 0.0  ;;  %v10533_v16 = vld [vmem:[%s14000_s2 + $0x298] sm:$0xff] }
  0x8a   :  { %v257_v29 = vsel %vm253_vm4, %v251_v6, 0.0  ;;  %8987 = vmatprep.subr.msk.bf16.mxu1 %vm9508_vm1, %v8985_v7  ;;  %8281 = vmatprep.mubr.msk.f32.mxu0 %vm282_vm0, %v10155_v63  ;;  %v5417_v63 = vmul.f32 %v10374_v18, %v10374_v18  ;;  %vm5297_vm4 = vcmask 1045509  }
  0x8b   :  { %258 = vadd.xlane.f32.xlu0 %v257_v29  ;;  %5957 = vadd.xlane.f32.xlu1 %v5956_v3  ;;  %v5397_v3 = vmul.f32 %v10379_v28, %v10379_v28 }
  0x8c   :  { %8307 = vmatmul.mubr.msk.f32.gmra.mrb[26].mxu1 %vm282_vm0, %v10126_v49  ;;  %v8991_v49 = vpack.c.bf16 %v10399_v15, %v10394_v30  ;;  %v5785_v60 = vsel %vm282_vm0, %v5417_v63, 0.0  ;;  %v10552_v63 = vld [vmem:[%s14000_s2 + $0x300] sm:$0xff] }
  0x8d   :  { %8282 = vmatmul.mubr.msk.f32.gmra.mrb[28].mxu0 %vm282_vm0, %v10160_v51  ;;  %8309 = vmatprep.mubr.msk.f32.mxu1 %vm282_vm0, %v10170_v1  ;;  %v5411_v51 = vmul.f32 %v10414_v53, %v10414_v53  ;;  %v5460_v1 = vmul.f32 %v10421_v54, %v10421_v54  ;;  %v5725_v37 = vsel %vm282_vm0, %v5397_v3, 0.0 }
  0x8e   :  { %8966 = vmatpush3.bf16.xpose.msk.msra.mxu0 %vm9508_vm1, %v8961_v2  ;;  %8284 = vmatprep.mubr.msk.f32.mxu0 %vm282_vm0, %v10227_v12  ;;  %v10444_v12 = vld [vmem:[%s14000_s2 + $0x2c8] sm:$0xff] }
  0x8f   :  { %261 = vadd.xlane.f32.xlu0 %v260_v39  ;;  %5747 = vadd.xlane.f32.xlu1 %v5746_v46  ;;  %v5767_v44 = vsel %vm282_vm0, %v5411_v51, 0.0  ;;  %v5914_v2 = vsel %vm282_vm0, %v5460_v1, 0.0  ;;  %v9027_v27 = vpack.c.bf16 %v10444_v12, %v10374_v18  ;;  %v5362_v39 = vmul.f32 %v9831_v17, %v9831_v17  ;;  %v10559_v17 = vld [vmem:[%s14000_s2 + $0x2d8] sm:$0xff]  ;;  %v10570_v1 = vld [vmem:[%s14000_s2 + $0x2d0] sm:$0xff] }
  0x90   :  { %8990 = vmatpush3.bf16.xpose.msk.msra.mxu1 %vm9508_vm1, %v8985_v7  ;;  %8969 = vmatprep.subr.msk.bf16.mxu0 %vm9508_vm1, %v8967_v48  ;;  %v5412_v46 = vmul.f32 %v10533_v16, %v10533_v16 }
  0x91   :  { %8310 = vmatmul.mubr.msk.f32.gmra.mrb[28].mxu1 %vm282_vm0, %v10175_v8  ;;  %8993 = vmatprep.subr.msk.bf16.mxu1 %vm9508_vm1, %v8991_v49  ;;  %v10470_v8 = vld [vmem:[%s14000_s2 + $0x270] sm:$0xff] }
  0x92   :  { %8285 = vmatmul.mubr.msk.f32.gmra.mrb[30].mxu0 %vm282_vm0, %v10232_v58  ;;  %8312 = vmatprep.mubr.msk.f32.mxu1 %vm282_vm0, %v10244_v14  ;;  %v5418_v58 = vmul.f32 %v10444_v12, %v10444_v12  ;;  %v5475_v14 = vmul.f32 %v166_v62, %v166_v62  ;;  %v8997_v10 = vpack.c.bf16 %v10475_v9, %v10470_v8  ;;  %v5770_v51 = vsel %vm282_vm0, %v5412_v46, 0.0  ;;  %v10577_v62 = vld [vmem:[%s14000_s2 + $0x420] sm:$0xff] }
  0x93   :  { %5723 = vadd.xlane.f32.xlu0 %v5722_v59  ;;  %5786 = vadd.xlane.f32.xlu1 %v5785_v60  ;;  %v5405_v59 = vmul.f32 %v10394_v30, %v10394_v30  ;;  %v5425_v60 = vmul.f32 %v10552_v63, %v10552_v63 }
  0x94   :  { %8331 = vmatprep.mubr.msk.f32.mxu0 %vm282_vm0, %v10062_v23  ;;  %v5788_v23 = vsel %vm282_vm0, %v5418_v58, 0.0  ;;  %v5959_v11 = vsel %vm282_vm0, %v5475_v14, 0.0  ;;  %v10598_v14 = vld [vmem:[%s14000_s2 + $0x308] sm:$0xff] }
  0x95   :  { %8313 = vmatmul.mubr.msk.f32.gmra.mrb[30].mxu1 %vm282_vm0, %v10249_v19  ;;  %v5468_v19 = vmul.f32 %v10488_v50, %v10488_v50  ;;  %v5809_v58 = vsel %vm282_vm0, %v5425_v60, 0.0 }
  0x96   :  { %8972 = vmatpush3.bf16.xpose.msk.msra.mxu0 %vm9508_vm1, %v8967_v48  ;;  %8359 = vmatprep.mubr.msk.f32.mxu1 %vm282_vm0, %v10081_v33  ;;  %v10518_v33 = vld [vmem:[%s14000_s2 + $0x4c0] sm:$0xff]  ;;  %v9009_v48 = vpack.c.bf16 %v10533_v16, %v10414_v53 }
  0x97   :  { %5768 = vadd.xlane.f32.xlu0 %v5767_v44  ;;  %5915 = vadd.xlane.f32.xlu1 %v5914_v2  ;;  %v5938_v7 = vsel %vm282_vm0, %v5468_v19, 0.0  ;;  %v5481_v6 = vmul.f32 %v10518_v33, %v10518_v33  ;;  %v9033_v44 = vpack.c.bf16 %v10559_v17, %v10570_v1  ;;  %v5419_v2 = vmul.f32 %v10570_v1, %v10570_v1 }
  0x98   :  { %8996 = vmatpush3.bf16.xpose.msk.msra.mxu1 %vm9508_vm1, %v8991_v49  ;;  %8975 = vmatprep.subr.msk.bf16.mxu0 %vm9508_vm1, %v8973_v45  ;;  %v5620_v49 = vsel %vm282_vm0, %v5362_v39, 0.0 }
  0x99   :  { %8999 = vmatprep.subr.msk.bf16.mxu1 %vm9508_vm1, %v8997_v10  ;;  %v5977_v29 = vsel %vm282_vm0, %v5481_v6, 0.0 }
  0x9b   :  { %5789 = vadd.xlane.f32.xlu0 %v5788_v23  ;;  %5960 = vadd.xlane.f32.xlu1 %v5959_v11  ;;  %v10627_v23 = vld [vmem:[%s14000_s2 + $0x2e0] sm:$0xff]  ;;  %v10632_v11 = vld [vmem:[%s14000_s2 + $0x2e8] sm:$0xff] }
  0x9e   :  { %8978 = vmatpush3.bf16.xpose.msk.msra.mxu0 %vm9508_vm1, %v8973_v45  ;;  %v10612_v45 = vld [vmem:[%s14000_s2 + $0x2a0] sm:$0xff] }
  0x9f   :  { %5939 = vadd.xlane.f32.xlu0 %v5938_v7  ;;  %5981 = vadd.xlane.f32.xlu1 %v5980_v31  ;;  %v10648_v7 = vld [vmem:[%s14000_s2 + $0x460] sm:$0xff] }
  0xa0   :  { %9002 = vmatpush3.bf16.xpose.msk.msra.mxu1 %vm9508_vm1, %v8997_v10  ;;  %9005 = vmatprep.subr.msk.bf16.mxu0 %vm9508_vm1, %v9003_v22  ;;  %v10617_v10 = vld [vmem:[%s14000_s2 + $0x2a8] sm:$0xff]  ;;  %v5469_v31 = vmul.f32 %v10648_v7, %v10648_v7 }
  0xa1   :  { %9029 = vmatprep.subr.msk.bf16.mxu1 %vm9508_vm1, %v9027_v27 }
  0xa3   :  { %5978 = vadd.xlane.f32.xlu0 %v5977_v29  ;;  %5726 = vadd.xlane.f32.xlu1 %v5725_v37  ;;  %v10683_v29 = vld [vmem:[%s14000_s2 + $0x2b0] sm:$0xff]  ;;  %v10688_v37 = vld [vmem:[%s14000_s2 + $0x2b8] sm:$0xff] }
  0xa4   :  { %v9021_v60 = vpack.c.bf16 %v10688_v37, %v10683_v29 }
  0xa5   :  { %8332 = vmatmul.mubr.msk.f32.vlgmr.msra.gmra.mrb[32].mxu0 %vm282_vm0, %v10088_v25  ;;  %v5749_v25 = vsel %vm282_vm0, %v5405_v59, 0.0  ;;  %v5363_v59 = vmul.f32 %v9872_v34, %v9872_v34 }
  0xa6   :  { %9008 = vmatpush3.bf16.xpose.msk.msra.mxu0 %vm9508_vm1, %v9003_v22  ;;  %8334 = vmatprep.mubr.msk.f32.mxu0 %vm282_vm0, %v10185_v40  ;;  %v5461_v40 = vmul.f32 %v10577_v62, %v10577_v62  ;;  %v9015_v22 = vpack.c.bf16 %v10617_v10, %v10612_v45 }
  0xa7   :  { %5621 = vadd.xlane.f32.xlu0 %v5620_v49  ;;  %5771 = vadd.xlane.f32.xlu1 %v5770_v51  ;;  %v10707_v49 = vld [vmem:[%s14000_s2 + $0x2f8] sm:$0xff] }
  0xa8   :  { %8360 = vmatmul.mubr.msk.f32.vlgmr.msra.gmra.mrb[32].mxu1 %vm282_vm0, %v10114_v47  ;;  %9011 = vmatprep.subr.msk.bf16.mxu0 %vm9508_vm1, %v9009_v48  ;;  %v10607_v47 = vld [vmem:[%s14000_s2 + $0x498] sm:$0xff]  ;;  %v5917_v19 = vsel %vm282_vm0, %v5461_v40, 0.0 }
  0xa9   :  { %9032 = vmatpush3.bf16.xpose.msk.msra.mxu1 %vm9508_vm1, %v9027_v27  ;;  %8335 = vmatmul.mubr.msk.f32.gmra.mrb[34].mxu0 %vm282_vm0, %v10320_v61  ;;  %v5791_v61 = vsel %vm282_vm0, %v5419_v2, 0.0  ;;  %v5476_v55 = vmul.f32 %v10607_v47, %v10607_v47  ;;  %v10676_v27 = vld [vmem:[%s14000_s2 + $0x4d0] sm:$0xff] }
  0xaa   :  { %8362 = vmatprep.mubr.msk.f32.mxu1 %vm282_vm0, %v10220_v57  ;;  %9035 = vmatprep.subr.msk.bf16.mxu1 %vm9508_vm1, %v9033_v44  ;;  %v5426_v57 = vmul.f32 %v10598_v14, %v10598_v14 }
  0xab   :  { %5750 = vadd.xlane.f32.xlu0 %v5749_v25  ;;  %5810 = vadd.xlane.f32.xlu1 %v5809_v58  ;;  %v5962_v3 = vsel %vm282_vm0, %v5476_v55, 0.0  ;;  %v5623_v25 = vsel %vm282_vm0, %v5363_v59, 0.0  ;;  %v5370_v58 = vmul.f32 %v9846_v21, %v9846_v21  ;;  %v10761_v21 = vld [vmem:[%s14000_s2 + $0x348] sm:$0xff] }
  0xac   :  { %8363 = vmatmul.mubr.msk.f32.gmra.mrb[34].mxu1 %vm282_vm0, %v10347_v32  ;;  %8337 = vmatprep.mubr.msk.f32.mxu0 %vm282_vm0, %v10379_v28  ;;  %v180_v32 = vld [vmem:[%s14000_s2 + $0x500] sm:$0xff]  ;;  %v9039_v28 = vpack.c.bf16 %v10632_v11, %v10627_v23  ;;  %v5812_v6 = vsel %vm282_vm0, %v5426_v57, 0.0 }
  0xad   :  { %8338 = vmatmul.mubr.msk.f32.gmra.mrb[36].mxu0 %vm282_vm0, %v10384_v4  ;;  %8365 = vmatprep.mubr.msk.f32.mxu1 %vm282_vm0, %v10394_v30  ;;  %v5489_v30 = vmul.f32 %v180_v32, %v180_v32  ;;  %v10756_v57 = vld [vmem:[%s14000_s2 + $0x340] sm:$0xff]  ;;  %v5369_v32 = vmul.f32 %v9841_v20, %v9841_v20 }
  0xae   :  { %9014 = vmatpush3.bf16.xpose.msk.msra.mxu0 %vm9508_vm1, %v9009_v48  ;;  %8340 = vmatprep.mubr.msk.f32.mxu0 %vm282_vm0, %v10456_v0  ;;  %v10702_v48 = vld [vmem:[%s14000_s2 + $0x2f0] sm:$0xff] }
  0xaf   :  { %5792 = vadd.xlane.f32.xlu0 %v5791_v61  ;;  %5918 = vadd.xlane.f32.xlu1 %v5917_v19  ;;  %v6001_v51 = vsel %vm282_vm0, %v5489_v30, 0.0  ;;  %v9045_v34 = vpack.c.bf16 %v10707_v49, %v10702_v48  ;;  %v9051_v61 = vpack.c.bf16 %v10598_v14, %v10552_v63  ;;  %v5398_v30 = vmul.f32 %v10384_v4, %v10384_v4  ;;  %v10795_v4 = vld [vmem:[%s14000_s2 + $0x318] sm:$0xff] }
  0xb0   :  { %9017 = vmatprep.subr.msk.bf16.mxu0 %vm9508_vm1, %v9015_v22  ;;  %8366 = vmatmul.mubr.msk.f32.gmra.mrb[36].mxu1 %vm282_vm0, %v10399_v15  ;;  %v5641_v20 = vsel %vm282_vm0, %v5369_v32, 0.0 }
  0xb1   :  { %9038 = vmatpush3.bf16.xpose.msk.msra.mxu1 %vm9508_vm1, %v9033_v44  ;;  %8341 = vmatmul.mubr.msk.f32.gmra.mrb[38].mxu0 %vm282_vm0, %v10461_v52  ;;  %v5941_v52 = vsel %vm282_vm0, %v5469_v31, 0.0  ;;  %v10723_v44 = vld [vmem:[%s14000_s2 + $0x508] sm:$0xff] }
  0xb2   :  { %v10690_v39 = vpop.xlane.xlu0 %5525  ;;  %9041 = vmatprep.subr.msk.bf16.mxu1 %vm9508_vm1, %v9039_v28  ;;  %8368 = vmatprep.mubr.msk.f32.mxu1 %vm282_vm0, %v10470_v8  ;;  %v5483_v8 = vmul.f32 %v10676_v27, %v10676_v27 }
  0xb3   :  { %14012 = vst [vmem:[#allocation2_spill] sm:$0xff] %v10690_v39  ;;  %v10696_v46 = vpop.xlane.xlu1 %5522  ;;  %5813 = vadd.xlane.f32.xlu0 %v5812_v6  ;;  %5963 = vadd.xlane.f32.xlu1 %v5962_v3  ;;  %v9075_v6 = vpack.c.bf16 %v10761_v21, %v10756_v57 }
  0xb4   :  { %14013 = vst [vmem:[#allocation3_spill] sm:$0xff] %v10696_v46  ;;  %8369 = vmatmul.mubr.msk.f32.gmra.mrb[38].mxu1 %vm282_vm0, %v10475_v9  ;;  %8387 = vmatprep.mubr.msk.f32.mxu0 %vm282_vm0, %v10211_v41  ;;  %v5983_v41 = vsel %vm282_vm0, %v5483_v8, 0.0 }
  0xb5   :  { %8415 = vmatprep.mubr.msk.f32.mxu1 %vm282_vm0, %v10374_v18  ;;  %v5490_v18 = vmul.f32 %v10723_v44, %v10723_v44 }
  0xb6   :  { %v10727_v2 = vpop.xlane.xlu0 %5531  ;;  %9020 = vmatpush3.bf16.xpose.msk.msra.mxu0 %vm9508_vm1, %v9015_v22  ;;  %v5644_v22 = vsel %vm282_vm0, %v5370_v58, 0.0  ;;  %v5433_v58 = vmul.f32 %v10756_v57, %v10756_v57 }
  0xb7   :  { %14014 = vst [vmem:[#allocation4_spill] sm:$0xff] %v10727_v2  ;;  %v10733_v9 = vpop.xlane.xlu1 %5528  ;;  %5942 = vadd.xlane.f32.xlu0 %v5941_v52  ;;  %6002 = vadd.xlane.f32.xlu1 %v6001_v51  ;;  %v6004_v55 = vsel %vm282_vm0, %v5490_v18, 0.0  ;;  %v10790_v51 = vld [vmem:[%s14000_s2 + $0x310] sm:$0xff]  ;;  %v5413_v18 = vmul.f32 %v10612_v45, %v10612_v45 }
  0xb8   :  { %14015 = vst [vmem:[#allocation5_spill] sm:$0xff] %v10733_v9  ;;  %9023 = vmatprep.subr.msk.bf16.mxu0 %vm9508_vm1, %v9021_v60 }
  0xb9   :  { %9044 = vmatpush3.bf16.xpose.msk.msra.mxu1 %vm9508_vm1, %v9039_v28  ;;  %v5406_v28 = vmul.f32 %v10399_v15, %v10399_v15  ;;  %v5420_v15 = vmul.f32 %v10559_v17, %v10559_v17 }
  0xba   :  { %v10745_v40 = vpop.xlane.xlu0 %5537  ;;  %9047 = vmatprep.subr.msk.bf16.mxu1 %vm9508_vm1, %v9045_v34 }
  0xbb   :  { %14016 = vst [vmem:[#allocation6_spill] sm:$0xff] %v10745_v40  ;;  %v10751_v19 = vpop.xlane.xlu1 %5534  ;;  %5984 = vadd.xlane.f32.xlu0 %v5983_v41  ;;  %5624 = vadd.xlane.f32.xlu1 %v5623_v25  ;;  %v5752_v52 = vsel %vm282_vm0, %v5406_v28, 0.0  ;;  %v10812_v41 = vld [vmem:[%s14000_s2 + $0x358] sm:$0xff]  ;;  %v5794_v25 = vsel %vm282_vm0, %v5420_v15, 0.0  ;;  %v10865_v15 = vld [vmem:[%s14000_s2 + $0x328] sm:$0xff] }
  0xbc   :  { %14017 = vst [vmem:[#allocation7_spill] sm:$0xff] %v10751_v19 }
  0xbe   :  { %v10769_v31 = vpop.xlane.xlu0 %5543  ;;  %9026 = vmatpush3.bf16.xpose.msk.msra.mxu0 %vm9508_vm1, %v9021_v60  ;;  %v5728_v60 = vsel %vm282_vm0, %v5398_v30, 0.0 }
  0xbf   :  { %14018 = vst [vmem:[#allocation8_spill] sm:$0xff] %v10769_v31  ;;  %v10775_v3 = vpop.xlane.xlu1 %5540  ;;  %6005 = vadd.xlane.f32.xlu0 %v6004_v55  ;;  %5645 = vadd.xlane.f32.xlu1 %v5644_v22  ;;  %v9057_v55 = vpack.c.bf16 %v10795_v4, %v10790_v51  ;;  %v10826_v22 = vld [vmem:[%s14000_s2 + $0x428] sm:$0xff] }
  0xc0   :  { %14019 = vst [vmem:[#allocation9_spill] sm:$0xff] %v10775_v3  ;;  %9053 = vmatprep.subr.msk.bf16.mxu0 %vm9508_vm1, %v9051_v61 }
  0xc1   :  { %9050 = vmatpush3.bf16.xpose.msk.msra.mxu1 %vm9508_vm1, %v9045_v34  ;;  %v10807_v34 = vld [vmem:[%s14000_s2 + $0x350] sm:$0xff] }
  0xc2   :  { %v10797_v8 = vpop.xlane.xlu0 %5549  ;;  %9077 = vmatprep.subr.msk.bf16.mxu1 %vm9508_vm1, %v9075_v6  ;;  %v9081_v28 = vpack.c.bf16 %v10812_v41, %v10807_v34 }
  0xc3   :  { %14020 = vst [vmem:[#allocation10_spill] sm:$0xff] %v10797_v8  ;;  %v10801_v59 = vpop.xlane.xlu1 %5546  ;;  %5642 = vadd.xlane.f32.xlu0 %v5641_v20  ;;  %5753 = vadd.xlane.f32.xlu1 %v5752_v52  ;;  %v5773_v20 = vsel %vm282_vm0, %v5413_v18, 0.0  ;;  %v10860_v52 = vld [vmem:[%s14000_s2 + $0x320] sm:$0xff]  ;;  %v10884_v18 = vld [vmem:[%s14000_s2 + $0x368] sm:$0xff] }
  0xc4   :  { %14021 = vst [vmem:[#allocation11_spill] sm:$0xff] %v10801_v59 }
  0xc5   :  { %8388 = vmatmul.mubr.msk.f32.vlgmr.msra.gmra.mrb[40].mxu0 %vm282_vm0, %v10268_v26  ;;  %v5427_v26 = vmul.f32 %v10790_v51, %v10790_v51 }
  0xc6   :  { %v10828_v32 = vpop.xlane.xlu0 %5555  ;;  %9056 = vmatpush3.bf16.xpose.msk.msra.mxu0 %vm9508_vm1, %v9051_v61  ;;  %8390 = vmatprep.mubr.msk.f32.mxu0 %vm282_vm0, %v10414_v53  ;;  %v5833_v61 = vsel %vm282_vm0, %v5433_v58, 0.0  ;;  %v5462_v53 = vmul.f32 %v10826_v22, %v10826_v22  ;;  %v5434_v58 = vmul.f32 %v10761_v21, %v10761_v21 }
  0xc7   :  { %14022 = vst [vmem:[#allocation12_spill] sm:$0xff] %v10828_v32  ;;  %v10836_v30 = vpop.xlane.xlu1 %5552  ;;  %5729 = vadd.xlane.f32.xlu0 %v5728_v60  ;;  %5795 = vadd.xlane.f32.xlu1 %v5794_v25  ;;  %v10879_v25 = vld [vmem:[%s14000_s2 + $0x360] sm:$0xff] }
  0xc8   :  { %14023 = vst [vmem:[#allocation13_spill] sm:$0xff] %v10836_v30  ;;  %8416 = vmatmul.mubr.msk.f32.vlgmr.msra.gmra.mrb[40].mxu1 %vm282_vm0, %v10444_v12  ;;  %9059 = vmatprep.subr.msk.bf16.mxu0 %vm9508_vm1, %v9057_v55  ;;  %v10855_v12 = vld [vmem:[%s14000_s2 + $0x4a0] sm:$0xff] }
  0xc9   :  { %9080 = vmatpush3.bf16.xpose.msk.msra.mxu1 %vm9508_vm1, %v9075_v6  ;;  %8391 = vmatmul.mubr.msk.f32.gmra.mrb[42].mxu0 %vm282_vm0, %v10533_v16  ;;  %v5815_v6 = vsel %vm282_vm0, %v5427_v26, 0.0  ;;  %v5477_v26 = vmul.f32 %v10855_v12, %v10855_v12 }
  0xca   :  { %v10867_v60 = vpop.xlane.xlu0 %5561  ;;  %8418 = vmatprep.mubr.msk.f32.mxu1 %vm282_vm0, %v10570_v1  ;;  %9083 = vmatprep.subr.msk.bf16.mxu1 %vm9508_vm1, %v9081_v28  ;;  %v5920_v1 = vsel %vm282_vm0, %v5462_v53, 0.0  ;;  %v9087_v53 = vpack.c.bf16 %v10884_v18, %v10879_v25 }
  0xcb   :  { %14024 = vst [vmem:[#allocation14_spill] sm:$0xff] %v10867_v60  ;;  %v10873_v16 = vpop.xlane.xlu1 %5558  ;;  %5774 = vadd.xlane.f32.xlu0 %v5773_v20  ;;  %5834 = vadd.xlane.f32.xlu1 %v5833_v61  ;;  %v9063_v20 = vpack.c.bf16 %v10865_v15, %v10860_v52  ;;  %v10900_v61 = vld [vmem:[%s14000_s2 + $0x468] sm:$0xff]  ;;  %v5965_v38 = vsel %vm282_vm0, %v5477_v26, 0.0  ;;  %v10967_v26 = vld [vmem:[%s14000_s2 + $0x370] sm:$0xff] }
  0xcc   :  { %14025 = vst [vmem:[#allocation15_spill] sm:$0xff] %v10873_v16  ;;  %8419 = vmatmul.mubr.msk.f32.gmra.mrb[42].mxu1 %vm282_vm0, %v10559_v17  ;;  %8393 = vmatprep.mubr.msk.f32.mxu0 %vm282_vm0, %v10612_v45  ;;  %v10907_v17 = vld [vmem:[%s14000_s2 + $0x510] sm:$0xff]  ;;  %v5470_v35 = vmul.f32 %v10900_v61, %v10900_v61  ;;  %v11036_v60 = vld [vmem:[%s14000_s2 + $0x3c8] sm:$0xff] }
  0xcd   :  { %8394 = vmatmul.mubr.msk.f32.gmra.mrb[44].mxu0 %vm282_vm0, %v10617_v10  ;;  %8421 = vmatprep.mubr.msk.f32.mxu1 %vm282_vm0, %v10627_v23  ;;  %v5836_v23 = vsel %vm282_vm0, %v5434_v58, 0.0 }
  0xce   :  { %v10911_v45 = vpop.xlane.xlu0 %5567  ;;  %9062 = vmatpush3.bf16.xpose.msk.msra.mxu0 %vm9508_vm1, %v9057_v55  ;;  %8396 = vmatprep.mubr.msk.f32.mxu0 %vm282_vm0, %v10683_v29  ;;  %v5491_v55 = vmul.f32 %v10907_v17, %v10907_v17  ;;  %v10934_v29 = vld [vmem:[%s14000_s2 + $0x4d8] sm:$0xff] }
  0xcf   :  { %14026 = vst [vmem:[#allocation16_spill] sm:$0xff] %v10911_v45  ;;  %v10919_v10 = vpop.xlane.xlu1 %5564  ;;  %5816 = vadd.xlane.f32.xlu0 %v5815_v6  ;;  %5921 = vadd.xlane.f32.xlu1 %v5920_v1  ;;  %v10941_v6 = vld [vmem:[%s14000_s2 + $0x548] sm:$0xff]  ;;  %v10953_v1 = vld [vmem:[%s14000_s2 + $0x338] sm:$0xff] }
  0xd0   :  { %14027 = vst [vmem:[#allocation17_spill] sm:$0xff] %v10919_v10  ;;  %9065 = vmatprep.subr.msk.bf16.mxu0 %vm9508_vm1, %v9063_v20  ;;  %8422 = vmatmul.mubr.msk.f32.gmra.mrb[44].mxu1 %vm282_vm0, %v10632_v11  ;;  %v10948_v11 = vld [vmem:[%s14000_s2 + $0x330] sm:$0xff]  ;;  %v10972_v45 = vld [vmem:[%s14000_s2 + $0x378] sm:$0xff]  ;;  %v6007_v31 = vsel %vm282_vm0, %v5491_v55, 0.0 }
  0xd1   :  { %9086 = vmatpush3.bf16.xpose.msk.msra.mxu1 %vm9508_vm1, %v9081_v28  ;;  %8397 = vmatmul.mubr.msk.f32.gmra.mrb[46].mxu0 %vm282_vm0, %v10688_v37  ;;  %v5944_v37 = vsel %vm282_vm0, %v5470_v35, 0.0  ;;  %v9069_v35 = vpack.c.bf16 %v10953_v1, %v10948_v11  ;;  %v9093_v3 = vpack.c.bf16 %v10972_v45, %v10967_v26 }
  0xd2   :  { %v10955_v58 = vpop.xlane.xlu0 %5573  ;;  %9089 = vmatprep.subr.msk.bf16.mxu1 %vm9508_vm1, %v9087_v53  ;;  %8424 = vmatprep.mubr.msk.f32.mxu1 %vm282_vm0, %v10702_v48  ;;  %v5484_v48 = vmul.f32 %v10934_v29, %v10934_v29 }
  0xd3   :  { %14028 = vst [vmem:[#allocation18_spill] sm:$0xff] %v10955_v58  ;;  %v10961_v28 = vpop.xlane.xlu1 %5570  ;;  %5837 = vadd.xlane.f32.xlu0 %v5836_v23  ;;  %5966 = vadd.xlane.f32.xlu1 %v5965_v38  ;;  %v5498_v38 = vmul.f32 %v10941_v6, %v10941_v6  ;;  %v10984_v23 = vld [vmem:[%s14000_s2 + $0x540] sm:$0xff] }
  0xd4   :  { %14029 = vst [vmem:[#allocation19_spill] sm:$0xff] %v10961_v28  ;;  %8425 = vmatmul.mubr.msk.f32.gmra.mrb[46].mxu1 %vm282_vm0, %v10707_v49  ;;  %8443 = vmatprep.mubr.msk.f32.mxu0 %vm282_vm0, %v10552_v63  ;;  %v5497_v49 = vmul.f32 %v10984_v23, %v10984_v23  ;;  %v5986_v63 = vsel %vm282_vm0, %v5484_v48, 0.0 }
  0xd5   :  { %8471 = vmatprep.mubr.msk.f32.mxu1 %vm282_vm0, %v10756_v57  ;;  %v6028_v40 = vsel %vm282_vm0, %v5498_v38, 0.0  ;;  %v9353_v57 = vld [vmem:[%s14000_s2 + $0x150] sm:$0xff] }
  0xd6   :  { %v10992_v55 = vpop.xlane.xlu0 %5579  ;;  %9068 = vmatpush3.bf16.xpose.msk.msra.mxu0 %vm9508_vm1, %v9063_v20  ;;  %v5371_v20 = vmul.f32 %v9353_v57, %v9353_v57  ;;  %v11031_v57 = vld [vmem:[%s14000_s2 + $0x3c0] sm:$0xff] }
  0xd7   :  { %14030 = vst [vmem:[#allocation20_spill] sm:$0xff] %v10992_v55  ;;  %v10998_v10 = vpop.xlane.xlu1 %5576  ;;  %5945 = vadd.xlane.f32.xlu0 %v5944_v37  ;;  %6008 = vadd.xlane.f32.xlu1 %v6007_v31  ;;  %v11014_v31 = vld [vmem:[%s14000_s2 + $0x380] sm:$0xff]  ;;  %v11019_v37 = vld [vmem:[%s14000_s2 + $0x388] sm:$0xff]  ;;  %v9123_v16 = vpack.c.bf16 %v11036_v60, %v11031_v57  ;;  %v5399_v55 = vmul.f32 %v10456_v0, %v10456_v0 }
  0xd8   :  { %14031 = vst [vmem:[#allocation21_spill] sm:$0xff] %v10998_v10  ;;  %9071 = vmatprep.subr.msk.bf16.mxu0 %vm9508_vm1, %v9069_v35 }
  0xd9   :  { %9092 = vmatpush3.bf16.xpose.msk.msra.mxu1 %vm9508_vm1, %v9087_v53  ;;  %v6025_v53 = vsel %vm282_vm0, %v5497_v49, 0.0  ;;  %v5378_v49 = vmul.f32 %v10039_v56, %v10039_v56  ;;  %v5377_v56 = vmul.f32 %v10034_v13, %v10034_v13  ;;  %v5731_v0 = vsel %vm282_vm0, %v5399_v55, 0.0 }
  0xda   :  { %v11021_v48 = vpop.xlane.xlu0 %5585  ;;  %9095 = vmatprep.subr.msk.bf16.mxu1 %vm9508_vm1, %v9093_v3 }
  0xdb   :  { %14032 = vst [vmem:[#allocation22_spill] sm:$0xff] %v11021_v48  ;;  %v11025_v38 = vpop.xlane.xlu1 %5582  ;;  %5987 = vadd.xlane.f32.xlu0 %v5986_v63  ;;  %6029 = vadd.xlane.f32.xlu1 %v6028_v40  ;;  %v5647_v48 = vsel %vm282_vm0, %v5371_v20, 0.0  ;;  %v9099_v40 = vpack.c.bf16 %v11019_v37, %v11014_v31 }
  0xdc   :  { %14033 = vst [vmem:[#allocation23_spill] sm:$0xff] %v11025_v38  ;;  %v9354_v38 = vld [vmem:[%s14000_s2 + $0x118] sm:$0xff] }
  0xdd   :  { %v5364_v63 = vmul.f32 %v9354_v38, %v9354_v38 }
  0xde   :  { %v11046_v19 = vpop.xlane.xlu0 %5591  ;;  %9074 = vmatpush3.bf16.xpose.msk.msra.mxu0 %vm9508_vm1, %v9069_v35  ;;  %v11067_v35 = vld [vmem:[%s14000_s2 + $0x398] sm:$0xff] }
  0xdf   :  { %14034 = vst [vmem:[#allocation24_spill] sm:$0xff] %v11046_v19  ;;  %v11052_v20 = vpop.xlane.xlu1 %5588  ;;  %6026 = vadd.xlane.f32.xlu0 %v6025_v53  ;;  %5648 = vadd.xlane.f32.xlu1 %v5647_v48  ;;  %v5626_v38 = vsel %vm282_vm0, %v5364_v63, 0.0  ;;  %v11062_v19 = vld [vmem:[%s14000_s2 + $0x390] sm:$0xff]  ;;  %v5668_v48 = vsel %vm282_vm0, %v5378_v49, 0.0  ;;  %v5665_v49 = vsel %vm282_vm0, %v5377_v56, 0.0 }
  0xe0   :  { %14035 = vst [vmem:[#allocation25_spill] sm:$0xff] %v11052_v20  ;;  %9101 = vmatprep.subr.msk.bf16.mxu0 %vm9508_vm1, %v9099_v40  ;;  %v9105_v63 = vpack.c.bf16 %v11067_v35, %v11062_v19  ;;  %v11083_v20 = vld [vmem:[%s14000_s2 + $0x3d0] sm:$0xff] }
  0xe1   :  { %9098 = vmatpush3.bf16.xpose.msk.msra.mxu1 %vm9508_vm1, %v9093_v3  ;;  %v11088_v3 = vld [vmem:[%s14000_s2 + $0x3d8] sm:$0xff] }
  0xe2   :  { %v11072_v53 = vpop.xlane.xlu0 %5597  ;;  %9125 = vmatprep.subr.msk.bf16.mxu1 %vm9508_vm1, %v9123_v16  ;;  %v9129_v2 = vpack.c.bf16 %v11088_v3, %v11083_v20 }
  0xe3   :  { %14036 = vst [vmem:[#allocation26_spill] sm:$0xff] %v11072_v53  ;;  %v11076_v13 = vpop.xlane.xlu1 %5594  ;;  %5627 = vadd.xlane.f32.xlu0 %v5626_v38  ;;  %5669 = vadd.xlane.f32.xlu1 %v5668_v48  ;;  %v11242_v53 = vld [vmem:[%s14000_s2 + $0x440] sm:$0xff] }
  0xe4   :  { %14037 = vst [vmem:[#allocation27_spill] sm:$0xff] %v11076_v13 }
  0xe5   :  { %8444 = vmatmul.mubr.msk.f32.vlgmr.msra.gmra.mrb[48].mxu0 %vm282_vm0, %v10598_v14  ;;  %v11113_v14 = vld [vmem:[%s14000_s2 + $0x3a0] sm:$0xff] }
  0xe6   :  { %v11095_v38 = vpop.xlane.xlu0 %5603  ;;  %9104 = vmatpush3.bf16.xpose.msk.msra.mxu0 %vm9508_vm1, %v9099_v40  ;;  %8446 = vmatprep.mubr.msk.f32.mxu0 %vm282_vm0, %v10790_v51  ;;  %v11118_v51 = vld [vmem:[%s14000_s2 + $0x3a8] sm:$0xff] }
  0xe7   :  { %14038 = vst [vmem:[#allocation28_spill] sm:$0xff] %v11095_v38  ;;  %v11103_v48 = vpop.xlane.xlu1 %5600  ;;  %5666 = vadd.xlane.f32.xlu0 %v5665_v49  ;;  %9107 = vmatprep.subr.msk.bf16.mxu0 %vm9508_vm1, %v9105_v63 }
  0xe8   :  { %14039 = vst [vmem:[#allocation29_spill] sm:$0xff] %v11103_v48  ;;  %8472 = vmatmul.mubr.msk.f32.vlgmr.msra.gmra.mrb[48].mxu1 %vm282_vm0, %v10761_v21 }
  0xe9   :  { %9128 = vmatpush3.bf16.xpose.msk.msra.mxu1 %vm9508_vm1, %v9123_v16  ;;  %8447 = vmatmul.mubr.msk.f32.gmra.mrb[50].mxu0 %vm282_vm0, %v10795_v4  ;;  %v9111_v16 = vpack.c.bf16 %v11118_v51, %v11113_v14  ;;  %v11139_v4 = vld [vmem:[%s14000_s2 + $0x3e0] sm:$0xff] }
  0xea   :  { %v11124_v40 = vpop.xlane.xlu0 %5609  ;;  %8474 = vmatprep.mubr.msk.f32.mxu1 %vm282_vm0, %v10807_v34  ;;  %9131 = vmatprep.subr.msk.bf16.mxu1 %vm9508_vm1, %v9129_v2  ;;  %v11144_v34 = vld [vmem:[%s14000_s2 + $0x3e8] sm:$0xff] }
  0xeb   :  { %14040 = vst [vmem:[#allocation30_spill] sm:$0xff] %v11124_v40  ;;  %v11130_v21 = vpop.xlane.xlu1 %5606  ;;  %5732 = vadd.xlane.f32.xlu0 %v5731_v0  ;;  %8449 = vmatprep.mubr.msk.f32.mxu0 %vm282_vm0, %v10860_v52  ;;  %v9135_v55 = vpack.c.bf16 %v11144_v34, %v11139_v4 }
  0xec   :  { %14041 = vst [vmem:[#allocation31_spill] sm:$0xff] %v11130_v21  ;;  %8475 = vmatmul.mubr.msk.f32.gmra.mrb[50].mxu1 %vm282_vm0, %v10812_v41  ;;  %v11169_v41 = vld [vmem:[%s14000_s2 + $0x3b0] sm:$0xff] }
  0xed   :  { %8450 = vmatmul.mubr.msk.f32.gmra.mrb[52].mxu0 %vm282_vm0, %v10865_v15  ;;  %8477 = vmatprep.mubr.msk.f32.mxu1 %vm282_vm0, %v10879_v25  ;;  %v11174_v15 = vld [vmem:[%s14000_s2 + $0x3b8] sm:$0xff] }
  0xee   :  { %v11152_v52 = vpop.xlane.xlu0 %5615  ;;  %9110 = vmatpush3.bf16.xpose.msk.msra.mxu0 %vm9508_vm1, %v9105_v63  ;;  %8452 = vmatprep.mubr.msk.f32.mxu0 %vm282_vm0, %v10948_v11  ;;  %v9117_v11 = vpack.c.bf16 %v11174_v15, %v11169_v41 }
  0xef   :  { %14042 = vst [vmem:[#allocation32_spill] sm:$0xff] %v11152_v52  ;;  %v11160_v56 = vpop.xlane.xlu1 %5612  ;;  %9113 = vmatprep.subr.msk.bf16.mxu0 %vm9508_vm1, %v9111_v16 }
  0xf0   :  { %14043 = vst [vmem:[#allocation33_spill] sm:$0xff] %v11160_v56  ;;  %8478 = vmatmul.mubr.msk.f32.gmra.mrb[52].mxu1 %vm282_vm0, %v10884_v18 }
  0xf1   :  { %9134 = vmatpush3.bf16.xpose.msk.msra.mxu1 %vm9508_vm1, %v9129_v2  ;;  %8453 = vmatmul.mubr.msk.f32.gmra.mrb[54].mxu0 %vm282_vm0, %v10953_v1  ;;  %v11193_v2 = vld [vmem:[%s14000_s2 + $0x3f0] sm:$0xff]  ;;  %v11198_v1 = vld [vmem:[%s14000_s2 + $0x3f8] sm:$0xff] }
  0xf2   :  { %v11180_v25 = vpop.xlane.xlu0 %5714  ;;  %9137 = vmatprep.subr.msk.bf16.mxu1 %vm9508_vm1, %v9135_v55  ;;  %8480 = vmatprep.mubr.msk.f32.mxu1 %vm282_vm0, %v10967_v26  ;;  %v9141_v63 = vpack.c.bf16 %v11198_v1, %v11193_v2 }
  0xf3   :  { %v11186_v18 = vpop.xlane.xlu1 %5618  ;;  %8499 = vmatprep.mubr.msk.f32.mxu0 %vm282_vm0, %v11014_v31 }
  0xf4   :  { %14044 = vst [vmem:[#allocation34_spill] sm:$0xff] %v11186_v18  ;;  %8481 = vmatmul.mubr.msk.f32.gmra.mrb[54].mxu1 %vm282_vm0, %v10972_v45 }
  0xf5   :  { %8527 = vmatprep.mubr.msk.f32.mxu1 %vm282_vm0, %v11031_v57 }
  0xf6   :  { %v11206_v26 = vpop.xlane.xlu0 %5738  ;;  %9116 = vmatpush3.bf16.xpose.msk.msra.mxu0 %vm9508_vm1, %v9111_v16  ;;  %v11225_v16 = vld [vmem:[%s14000_s2 + $0x400] sm:$0xff] }
  0xf7   :  { %v11212_v49 = vpop.xlane.xlu1 %5717  ;;  %9119 = vmatprep.subr.msk.bf16.mxu0 %vm9508_vm1, %v9117_v11 }
  0xf8   :  { %v8109_v31 = vpop.f32.mrb[0].mxu0 }
  0xf9   :  { %v3380_v0 = vmul.f32 %v8109_v31, %v8109_v31  ;;  %v373_v52 = vpop.f32.mrb[1].mxu0  ;;  %9140 = vmatpush3.bf16.xpose.msk.msra.mxu1 %vm9508_vm1, %v9135_v55  ;;  %v11230_v31 = vld [vmem:[%s14000_s2 + $0x408] sm:$0xff] }
  0xfa   :  { %v3379_v45 = vmul.f32 %v373_v52, %v373_v52  ;;  %v11218_v57 = vpop.xlane.xlu0 %5906  ;;  %v8137_v56 = vpop.f32.mrb[0].mxu1  ;;  %9143 = vmatprep.subr.msk.bf16.mxu1 %vm9508_vm1, %v9141_v63  ;;  %v9147_v55 = vpack.c.bf16 %v11230_v31, %v11225_v16 }
  0xfb   :  { %14045 = vst [vmem:[#allocation35_spill] sm:$0xff] %v11218_v57  ;;  %v3388_v52 = vmul.f32 %v8137_v56, %v8137_v56  ;;  %v11234_v40 = vpop.xlane.xlu1 %5741  ;;  %v502_v21 = vpop.f32.mrb[1].mxu1  ;;  %v3574_v38 = vsel %vm282_vm0, %v3380_v0, 0.0  ;;  %v11247_v56 = vld [vmem:[%s14000_s2 + $0x448] sm:$0xff] }
  0xfc   :  { %v3387_v32 = vmul.f32 %v502_v21, %v502_v21  ;;  %v3571_v48 = vsel %vm282_vm0, %v3379_v45, 0.0  ;;  %3575 = vadd.xlane.f32.xlu1 %v3574_v38  ;;  %v8112_v10 = vpop.f32.mrb[2].mxu0  ;;  %v9171_v21 = vpack.c.bf16 %v11247_v56, %v11242_v53 }
  0xfd   :  { %3572 = vadd.xlane.f32.xlu0 %v3571_v48  ;;  %v3382_v9 = vmul.f32 %v8112_v10, %v8112_v10  ;;  %v383_v30 = vpop.f32.mrb[3].mxu0  ;;  %v3598_v13 = vsel %vm282_vm0, %v3388_v52, 0.0 }
  0xfe   :  { %v11251_v38 = vpop.xlane.xlu0 %5930  ;;  %v3381_v48 = vmul.f32 %v383_v30, %v383_v30  ;;  %9122 = vmatpush3.bf16.xpose.msk.msra.mxu0 %vm9508_vm1, %v9117_v11  ;;  %v3595_v10 = vsel %vm282_vm0, %v3387_v32, 0.0  ;;  %v8140_v0 = vpop.f32.mrb[2].mxu1 }
  0xff   :  { %14046 = vst [vmem:[#allocation36_spill] sm:$0xff] %v11251_v38  ;;  %v11256_v45 = vpop.xlane.xlu1 %5909  ;;  %v512_v52 = vpop.f32.mrb[3].mxu1  ;;  %9149 = vmatprep.subr.msk.bf16.mxu0 %vm9508_vm1, %v9147_v55  ;;  %v3390_v58 = vmul.f32 %v8140_v0, %v8140_v0  ;;  %v3580_v30 = vsel %vm282_vm0, %v3382_v9, 0.0 }
 0x100   :  { %14047 = vst [vmem:[#allocation37_spill] sm:$0xff] %v11256_v45  ;;  %3599 = vadd.xlane.f32.xlu1 %v3598_v13  ;;  %v8115_v28 = vpop.f32.mrb[4].mxu0  ;;  %v3389_v32 = vmul.f32 %v512_v52, %v512_v52  ;;  %v3577_v59 = vsel %vm282_vm0, %v3381_v48, 0.0  ;;  %v9153_v13 = vpack.c.bf16 %v10421_v54, %v10257_v24  ;;  %v9177_v24 = vpack.c.bf16 %v10488_v50, %v10294_v36 }
 0x101   :  { %3596 = vadd.xlane.f32.xlu0 %v3595_v10  ;;  %9146 = vmatpush3.bf16.xpose.msk.msra.mxu1 %vm9508_vm1, %v9141_v63  ;;  %v393_v46 = vpop.f32.mrb[5].mxu0  ;;  %v3384_v63 = vmul.f32 %v8115_v28, %v8115_v28  ;;  %v3604_v9 = vsel %vm282_vm0, %v3390_v58, 0.0 }
 0x102   :  { %v11263_v11 = vpop.xlane.xlu0 %5720  ;;  %v8143_v8 = vpop.f32.mrb[4].mxu1  ;;  %9173 = vmatprep.subr.msk.bf16.mxu1 %vm9508_vm1, %v9171_v21  ;;  %v3383_v48 = vmul.f32 %v393_v46, %v393_v46  ;;  %v3601_v39 = vsel %vm282_vm0, %v3389_v32, 0.0 }
 0x103   :  { %v11270_v10 = vpop.xlane.xlu1 %5933  ;;  %v522_v0 = vpop.f32.mrb[5].mxu1  ;;  %v3586_v28 = vsel %vm282_vm0, %v3384_v63, 0.0 }
 0x104   :  { %14048 = vst [vmem:[#allocation38_spill] sm:$0xff] %v11270_v10  ;;  %3581 = vadd.xlane.f32.xlu1 %v3580_v30  ;;  %v3391_v36 = vmul.f32 %v522_v0, %v522_v0  ;;  %v3583_v50 = vsel %vm282_vm0, %v3383_v48, 0.0 }
 0x105   :  { %3578 = vadd.xlane.f32.xlu0 %v3577_v59  ;;  %8500 = vmatmul.mubr.msk.f32.vlgmr.msra.gmra.mrb[56].mxu0 %vm282_vm0, %v11019_v37  ;;  %v8118_v52 = vpop.f32.mrb[6].mxu0 }
 0x106   :  { %8502 = vmatprep.mubr.msk.f32.mxu0 %vm282_vm0, %v11062_v19  ;;  %v403_v18 = vpop.f32.mrb[7].mxu0  ;;  %9152 = vmatpush3.bf16.xpose.msk.msra.mxu0 %vm9508_vm1, %v9147_v55  ;;  %v11286_v58 = vpop.xlane.xlu0 %5762  ;;  %v3392_v19 = vmul.f32 %v8143_v8, %v8143_v8  ;;  %v3607_v55 = vsel %vm282_vm0, %v3391_v36, 0.0  ;;  %v11390_v36 = vld [vmem:[%s14000_s2 + $0x480] sm:$0xff] }
 0x107   :  { %v11282_v54 = vpop.xlane.xlu1 %5744  ;;  %v8146_v59 = vpop.f32.mrb[6].mxu1  ;;  %9155 = vmatprep.subr.msk.bf16.mxu0 %vm9508_vm1, %v9153_v13 }
 0x108   :  { %3605 = vadd.xlane.f32.xlu1 %v3604_v9  ;;  %8528 = vmatmul.mubr.msk.f32.vlgmr.msra.gmra.mrb[56].mxu1 %vm282_vm0, %v11036_v60  ;;  %v532_v46 = vpop.f32.mrb[7].mxu1  ;;  %v9159_v60 = vpack.c.bf16 %v10826_v22, %v10577_v62  ;;  %v3610_v8 = vsel %vm282_vm0, %v3392_v19, 0.0  ;;  %v11368_v9 = vld [vmem:[%s14000_s2 + $0x478] sm:$0xff] }
 0x109   :  { %3602 = vadd.xlane.f32.xlu0 %v3601_v39  ;;  %8503 = vmatmul.mubr.msk.f32.gmra.mrb[58].mxu0 %vm282_vm0, %v11067_v35  ;;  %v3386_v39 = vmul.f32 %v8118_v52, %v8118_v52  ;;  %v3385_v35 = vmul.f32 %v403_v18, %v403_v18  ;;  %v14051_v18 = vlaneseq }
 0x10a   :  { %8530 = vmatprep.mubr.msk.f32.mxu1 %vm282_vm0, %v11083_v20  ;;  %9176 = vmatpush3.bf16.xpose.msk.msra.mxu1 %vm9508_vm1, %v9171_v21  ;;  %v11311_v20 = vpop.xlane.xlu0 %5912 }
 0x10b   :  { %v11300_v37 = vpop.xlane.xlu1 %5765  ;;  %8505 = vmatprep.mubr.msk.f32.mxu0 %vm282_vm0, %v11113_v14  ;;  %9179 = vmatprep.subr.msk.bf16.mxu1 %vm9508_vm1, %v9177_v24  ;;  %14049 = vst [vmem:[#allocation39_spill] sm:$0xff] %v11311_v20  ;;  %v11339_v21 = vshrl.u32 %v14051_v18, 7  ;;  %v3592_v30 = vsel %vm282_vm0, %v3386_v39, 0.0 }
 0x10c   :  { %3587 = vadd.xlane.f32.xlu1 %v3586_v28  ;;  %8531 = vmatmul.mubr.msk.f32.gmra.mrb[58].mxu1 %vm282_vm0, %v11088_v3  ;;  %v9183_v3 = vpack.c.bf16 %v10900_v61, %v10648_v7 }
 0x10d   :  { %3584 = vadd.xlane.f32.xlu0 %v3583_v50  ;;  %8506 = vmatmul.mubr.msk.f32.gmra.mrb[60].mxu0 %vm282_vm0, %v11118_v51  ;;  %v11331_v51 = vld [vmem:[%s14000_s2 + $0x430] sm:$0xff]  ;;  %14052 = vst [vmem:[#allocation41_spill] sm:$0xff] %v11339_v21  ;;  %v216_v0 = vadd.s32 16, %v11339_v21  ;;  %v11395_v50 = vld [vmem:[%s14000_s2 + $0x488] sm:$0xff] }
 0x10e   :  { %9158 = vmatpush3.bf16.xpose.msk.msra.mxu0 %vm9508_vm1, %v9153_v13  ;;  %8533 = vmatprep.mubr.msk.f32.mxu1 %vm282_vm0, %v11139_v4  ;;  %v11336_v4 = vld [vmem:[%s14000_s2 + $0x438] sm:$0xff]  ;;  %v11344_v32 = vpop.xlane.xlu0 %5954  ;;  %v3589_v13 = vsel %vm282_vm0, %v3385_v35, 0.0 }
 0x10f   :  { %v11320_v14 = vpop.xlane.xlu1 %5936  ;;  %8508 = vmatprep.mubr.msk.f32.mxu0 %vm282_vm0, %v11169_v41  ;;  %9161 = vmatprep.subr.msk.bf16.mxu0 %vm9508_vm1, %v9159_v60  ;;  %v3394_v41 = vmul.f32 %v8146_v59, %v8146_v59  ;;  %14053 = vst [vmem:[#allocation42_spill] sm:$0xff] %v11344_v32  ;;  %v9165_v63 = vpack.c.bf16 %v11336_v4, %v11331_v51  ;;  %vm223_vm6 = vcmp.lt.s32.totalorder %v216_v0, 20 }
 0x110   :  { %14050 = vst [vmem:[#allocation40_spill] sm:$0xff] %v11320_v14  ;;  %3611 = vadd.xlane.f32.xlu1 %v3610_v8  ;;  %8534 = vmatmul.mubr.msk.f32.gmra.mrb[60].mxu1 %vm282_vm0, %v11144_v34  ;;  %v3393_v34 = vmul.f32 %v532_v46, %v532_v46  ;;  %v14055_v46 = vmov 0.0   ;;  %v9373_v14 = vld [vmem:[%s14000_s2 + $0x548] sm:$0xff] }
 0x111   :  { %3608 = vadd.xlane.f32.xlu0 %v3607_v55  ;;  %8509 = vmatmul.mubr.msk.f32.gmra.mrb[62].mxu0 %vm282_vm0, %v11174_v15  ;;  %v3616_v52 = vsel %vm282_vm0, %v3394_v41, 0.0  ;;  %v11383_v19 = vsel %vm223_vm6, 1.0, %v14055_v46  ;;  %vm5301_vm6 = vcmask 1047559  }
 0x112   :  { %9182 = vmatpush3.bf16.xpose.msk.msra.mxu1 %vm9508_vm1, %v9177_v24  ;;  %8536 = vmatprep.mubr.msk.f32.mxu1 %vm282_vm0, %v11193_v2  ;;  %v11363_v2 = vld [vmem:[%s14000_s2 + $0x470] sm:$0xff]  ;;  %14056 = vst [vmem:[#allocation44_spill] sm:$0xff] %v11383_v19 }
 0x113   :  { %9185 = vmatprep.subr.msk.bf16.mxu1 %vm9508_vm1, %v9183_v3  ;;  %8555 = vmatprep.mubr.msk.f32.mxu0 %vm282_vm0, %v11225_v16  ;;  %v3613_v16 = vsel %vm282_vm0, %v3393_v34, 0.0 }
 0x114   :  { %v256_v15 = vpop.xlane.xlu1 %255  ;;  %3593 = vadd.xlane.f32.xlu1 %v3592_v30  ;;  %8537 = vmatmul.mubr.msk.f32.gmra.mrb[62].mxu1 %vm282_vm0, %v11198_v1  ;;  %v9189_v1 = vpack.c.bf16 %v11368_v9, %v11363_v2 }
 0x115   :  { %3590 = vadd.xlane.f32.xlu0 %v3589_v13  ;;  %8583 = vmatprep.mubr.msk.f32.mxu1 %vm282_vm0, %v11242_v53  ;;  %v267_v41 = vsel %vm266_vm7, %v256_v15, 0.0  ;;  %v9219_v15 = vpack.c.bf16 %v10493_v43, %v10518_v33  ;;  %v11429_v33 = vld [vmem:[%s14000_s2 + $0x490] sm:$0xff] }
 0x116   :  { %9164 = vmatpush3.bf16.xpose.msk.msra.mxu0 %vm9508_vm1, %v9159_v60  ;;  %v9195_v60 = vpack.c.bf16 %v11395_v50, %v11390_v36 }
 0x117   :  { %9167 = vmatprep.subr.msk.bf16.mxu0 %vm9508_vm1, %v9165_v63 }
 0x118   :  { %v259_v48 = vpop.xlane.xlu0 %258  ;;  %v11380_v24 = vpop.xlane.xlu1 %5957  ;;  %3617 = vadd.xlane.f32.xlu1 %v3616_v52 }
 0x119   :  { %14054 = vst [vmem:[#allocation43_spill] sm:$0xff] %v11380_v24  ;;  %3614 = vadd.xlane.f32.xlu0 %v3613_v16  ;;  %v8165_v59 = vpop.f32.mrb[8].mxu0  ;;  %v268_v39 = vsel %vm266_vm7, %v259_v48, 0.0 }
 0x11a   :  { %v631_v53 = vpop.f32.mrb[9].mxu0  ;;  %v8193_v28 = vpop.f32.mrb[8].mxu1  ;;  %9188 = vmatpush3.bf16.xpose.msk.msra.mxu1 %vm9508_vm1, %v9183_v3  ;;  %v269_v0 = vadd.f32 %v268_v39, %v267_v41  ;;  %v3396_v41 = vmul.f32 %v8165_v59, %v8165_v59  ;;  %v9201_v59 = vpack.c.bf16 %v10607_v47, %v11429_v33 }
 0x11b   :  { %v3395_v8 = vmul.f32 %v631_v53, %v631_v53  ;;  %v760_v35 = vpop.f32.mrb[9].mxu1  ;;  %9191 = vmatprep.subr.msk.bf16.mxu1 %vm9508_vm1, %v9189_v1 }
 0x11c   :  { %v262_v55 = vpop.xlane.xlu0 %261  ;;  %v11402_v3 = vpop.xlane.xlu1 %5747  ;;  %v3403_v18 = vmul.f32 %v760_v35, %v760_v35 }
 0x11d   :  { %v265_v30 = vmul.f32 %v11383_v19, %v262_v55  ;;  %v3619_v34 = vsel %vm282_vm0, %v3395_v8, 0.0  ;;  %v8168_v13 = vpop.f32.mrb[10].mxu0 }
 0x11e   :  { %3620 = vadd.xlane.f32.xlu0 %v3619_v34  ;;  %v641_v52 = vpop.f32.mrb[11].mxu0  ;;  %v8196_v16 = vpop.f32.mrb[10].mxu1  ;;  %9170 = vmatpush3.bf16.xpose.msk.msra.mxu0 %vm9508_vm1, %v9165_v63  ;;  %v3643_v46 = vsel %vm282_vm0, %v3403_v18, 0.0 }
 0x11f   :  { %v270_v48 = vsel %vm266_vm7, %v265_v30, 0.0  ;;  %v3397_v53 = vmul.f32 %v641_v52, %v641_v52  ;;  %v770_v35 = vpop.f32.mrb[11].mxu1  ;;  %9197 = vmatprep.subr.msk.bf16.mxu0 %vm9508_vm1, %v9195_v60 }
 0x120   :  { %v11415_v8 = vpop.xlane.xlu0 %5723  ;;  %v11417_v39 = vpop.xlane.xlu1 %5786  ;;  %v271_v55 = vadd.f32 %v270_v48, %v269_v0  ;;  %v3405_v18 = vmul.f32 %v770_v35, %v770_v35 }
 0x121   :  { %14057 = vst [vmem:[#allocation45_spill] sm:$0xff] %v11417_v39  ;;  %v11419_v34 = vpop.f32.mrb[12].mxu0  ;;  %v3625_v52 = vsel %vm282_vm0, %v3397_v53, 0.0  ;;  %v3404_v53 = vmul.f32 %v8193_v28, %v8193_v28  ;;  %v9362_v28 = vld [vmem:[%s14000_s2 + $0x410] sm:$0xff] }
 0x122   :  { %272 = vadd.xlane.f32.xlu1 %v271_v55  ;;  %3644 = vadd.xlane.f32.xlu0 %v3643_v46  ;;  %v651_v63 = vpop.f32.mrb[13].mxu0  ;;  %v11421_v30 = vpop.f32.mrb[12].mxu1  ;;  %v3622_v46 = vsel %vm282_vm0, %v3396_v41, 0.0  ;;  %v3649_v47 = vsel %vm282_vm0, %v3405_v18, 0.0  ;;  %v3398_v18 = vmul.f32 %v8168_v13, %v8168_v13 }
 0x123   :  { %9194 = vmatpush3.bf16.xpose.msk.msra.mxu1 %vm9508_vm1, %v9189_v1  ;;  %v780_v43 = vpop.f32.mrb[13].mxu1  ;;  %v3399_v55 = vmul.f32 %v651_v63, %v651_v63  ;;  %v11462_v63 = vld [vmem:[%s14000_s2 + $0x4a8] sm:$0xff] }
 0x124   :  { %v11433_v0 = vpop.xlane.xlu0 %5768  ;;  %v11435_v48 = vpop.xlane.xlu1 %5915  ;;  %9221 = vmatprep.subr.msk.bf16.mxu1 %vm9508_vm1, %v9219_v15 }
 0x125   :  { %14058 = vst [vmem:[#allocation46_spill] sm:$0xff] %v11435_v48  ;;  %8556 = vmatmul.mubr.msk.f32.vlgmr.msra.gmra.mrb[64].mxu0 %vm282_vm0, %v11230_v31  ;;  %v11442_v1 = vpop.f32.mrb[14].mxu0  ;;  %v3631_v39 = vsel %vm282_vm0, %v3399_v55, 0.0  ;;  %v3628_v55 = vsel %vm282_vm0, %v3398_v18, 0.0 }
 0x126   :  { %3623 = vadd.xlane.f32.xlu1 %v3622_v46  ;;  %3626 = vadd.xlane.f32.xlu0 %v3625_v52  ;;  %v661_v35 = vpop.f32.mrb[15].mxu0  ;;  %v3646_v52 = vsel %vm282_vm0, %v3404_v53, 0.0 }
 0x127   :  { %9200 = vmatpush3.bf16.xpose.msk.msra.mxu0 %vm9508_vm1, %v9195_v60  ;;  %v11447_v19 = vpop.f32.mrb[14].mxu1  ;;  %8558 = vmatprep.mubr.msk.f32.mxu0 %vm282_vm0, %v9362_v28  ;;  %v9225_v60 = vpack.c.bf16 %v10934_v29, %v10676_v27  ;;  %v9363_v28 = vld [vmem:[%s14000_s2 + $0x418] sm:$0xff]  ;;  %v9207_v27 = vpack.c.bf16 %v11462_v63, %v10855_v12 }
 0x128   :  { %v11453_v31 = vpop.xlane.xlu0 %5789  ;;  %v11455_v41 = vpop.xlane.xlu1 %5960  ;;  %9203 = vmatprep.subr.msk.bf16.mxu0 %vm9508_vm1, %v9201_v59 }
 0x129   :  { %14059 = vst [vmem:[#allocation47_spill] sm:$0xff] %v11453_v31  ;;  %14060 = vst [vmem:[#allocation48_spill] sm:$0xff] %v11455_v41  ;;  %v790_v46 = vpop.f32.mrb[15].mxu1  ;;  %8559 = vmatmul.mubr.msk.f32.gmra.mrb[66].mxu0 %vm282_vm0, %v9363_v28  ;;  %v3407_v31 = vmul.f32 %v780_v43, %v780_v43  ;;  %v9364_v43 = vld [vmem:[%s14000_s2 + $0x450] sm:$0xff] }
 0x12a   :  { %3647 = vadd.xlane.f32.xlu1 %v3646_v52  ;;  %3650 = vadd.xlane.f32.xlu0 %v3649_v47  ;;  %v11528_v52 = vld [vmem:[%s14000_s2 + $0x4b0] sm:$0xff] }
 0x12b   :  { %8584 = vmatmul.mubr.msk.f32.vlgmr.msra.gmra.mrb[64].mxu1 %vm282_vm0, %v11247_v56  ;;  %8561 = vmatprep.mubr.msk.f32.mxu0 %vm282_vm0, %v10577_v62  ;;  %v3406_v56 = vmul.f32 %v8196_v16, %v8196_v16  ;;  %v11496_v62 = vld [vmem:[%s14000_s2 + $0x4e0] sm:$0xff]  ;;  %v3401_v16 = vmul.f32 %v661_v35, %v661_v35  ;;  %v3655_v47 = vsel %vm282_vm0, %v3407_v31, 0.0  ;;  %v3400_v35 = vmul.f32 %v11419_v34, %v11419_v34 }
 0x12c   :  { %v11478_v13 = vpop.xlane.xlu0 %5939  ;;  %v11480_v53 = vpop.xlane.xlu1 %5981  ;;  %9224 = vmatpush3.bf16.xpose.msk.msra.mxu1 %vm9508_vm1, %v9219_v15  ;;  %8586 = vmatprep.mubr.msk.f32.mxu1 %vm282_vm0, %v9364_v43  ;;  %v11501_v15 = vld [vmem:[%s14000_s2 + $0x4e8] sm:$0xff]  ;;  %v3409_v34 = vmul.f32 %v790_v46, %v790_v46  ;;  %v3408_v46 = vmul.f32 %v11421_v30, %v11421_v30 }
 0x12d   :  { %14061 = vst [vmem:[#allocation49_spill] sm:$0xff] %v11478_v13  ;;  %14062 = vst [vmem:[#allocation50_spill] sm:$0xff] %v11480_v53  ;;  %9227 = vmatprep.subr.msk.bf16.mxu1 %vm9508_vm1, %v9225_v60  ;;  %8562 = vmatmul.mubr.msk.f32.gmra.mrb[68].mxu0 %vm282_vm0, %v10826_v22  ;;  %v9365_v22 = vld [vmem:[%s14000_s2 + $0x458] sm:$0xff]  ;;  %v9231_v31 = vpack.c.bf16 %v11501_v15, %v11496_v62  ;;  %v3637_v28 = vsel %vm282_vm0, %v3401_v16, 0.0  ;;  %v3402_v16 = vmul.f32 %v11442_v1, %v11442_v1 }
 0x12e   :  { %3629 = vadd.xlane.f32.xlu1 %v3628_v55  ;;  %3632 = vadd.xlane.f32.xlu0 %v3631_v39  ;;  %v3661_v30 = vsel %vm282_vm0, %v3409_v34, 0.0  ;;  %v9366_v55 = vld [vmem:[%s14000_s2 + $0x4c0] sm:$0xff] }
 0x12f   :  { %9206 = vmatpush3.bf16.xpose.msk.msra.mxu0 %vm9508_vm1, %v9201_v59  ;;  %8587 = vmatmul.mubr.msk.f32.gmra.mrb[66].mxu1 %vm282_vm0, %v9365_v22  ;;  %v3652_v59 = vsel %vm282_vm0, %v3406_v56, 0.0 }
 0x130   :  { %v11510_v39 = vpop.xlane.xlu0 %5978  ;;  %v11512_v18 = vpop.xlane.xlu1 %5726  ;;  %9209 = vmatprep.subr.msk.bf16.mxu0 %vm9508_vm1, %v9207_v27  ;;  %8589 = vmatprep.mubr.msk.f32.mxu1 %vm282_vm0, %v10648_v7  ;;  %v11533_v7 = vld [vmem:[%s14000_s2 + $0x4b8] sm:$0xff] }
 0x131   :  { %14063 = vst [vmem:[#allocation51_spill] sm:$0xff] %v11510_v39  ;;  %14064 = vst [vmem:[#allocation52_spill] sm:$0xff] %v11512_v18  ;;  %8564 = vmatprep.mubr.msk.f32.mxu0 %vm282_vm0, %v11331_v51  ;;  %v9213_v56 = vpack.c.bf16 %v11533_v7, %v11528_v52 }
 0x132   :  { %3653 = vadd.xlane.f32.xlu1 %v3652_v59  ;;  %3656 = vadd.xlane.f32.xlu0 %v3655_v47  ;;  %v3658_v47 = vsel %vm282_vm0, %v3408_v46, 0.0 }
 0x133   :  { %8590 = vmatmul.mubr.msk.f32.gmra.mrb[68].mxu1 %vm282_vm0, %v10900_v61  ;;  %8565 = vmatmul.mubr.msk.f32.gmra.mrb[70].mxu0 %vm282_vm0, %v11336_v4  ;;  %v3634_v61 = vsel %vm282_vm0, %v3400_v35, 0.0  ;;  %v11560_v4 = vld [vmem:[%s14000_s2 + $0x4f0] sm:$0xff] }
 0x134   :  { %v11540_v51 = vpop.xlane.xlu0 %5621  ;;  %v11542_v43 = vpop.xlane.xlu1 %5771  ;;  %9230 = vmatpush3.bf16.xpose.msk.msra.mxu1 %vm9508_vm1, %v9225_v60  ;;  %8592 = vmatprep.mubr.msk.f32.mxu1 %vm282_vm0, %v11363_v2  ;;  %v11565_v2 = vld [vmem:[%s14000_s2 + $0x4f8] sm:$0xff] }
 0x135   :  { %14065 = vst [vmem:[#allocation53_spill] sm:$0xff] %v11540_v51  ;;  %14066 = vst [vmem:[#allocation54_spill] sm:$0xff] %v11542_v43  ;;  %9233 = vmatprep.subr.msk.bf16.mxu1 %vm9508_vm1, %v9231_v31  ;;  %8611 = vmatprep.mubr.msk.f32.mxu0 %vm282_vm0, %v11390_v36 }
 0x136   :  { %3635 = vadd.xlane.f32.xlu1 %v3634_v61  ;;  %3638 = vadd.xlane.f32.xlu0 %v3637_v28  ;;  %v11590_v28 = vld [vmem:[%s14000_s2 + $0x500] sm:$0xff] }
 0x137   :  { %9212 = vmatpush3.bf16.xpose.msk.msra.mxu0 %vm9508_vm1, %v9207_v27  ;;  %8593 = vmatmul.mubr.msk.f32.gmra.mrb[70].mxu1 %vm282_vm0, %v11368_v9  ;;  %v9237_v9 = vpack.c.bf16 %v11565_v2, %v11560_v4  ;;  %v9243_v1 = vpack.c.bf16 %v10723_v44, %v11590_v28 }
 0x138   :  { %v11572_v36 = vpop.xlane.xlu0 %5750  ;;  %v11574_v60 = vpop.xlane.xlu1 %5810  ;;  %9215 = vmatprep.subr.msk.bf16.mxu0 %vm9508_vm1, %v9213_v56  ;;  %8639 = vmatprep.mubr.msk.f32.mxu1 %vm282_vm0, %v9366_v55 }
 0x139   :  { %14067 = vst [vmem:[#allocation55_spill] sm:$0xff] %v11572_v36  ;;  %14068 = vst [vmem:[#allocation56_spill] sm:$0xff] %v11574_v60  ;;  %v8221_v27 = vpop.f32.mrb[16].mxu0 }
 0x13a   :  { %3659 = vadd.xlane.f32.xlu1 %v3658_v47  ;;  %v889_v22 = vpop.f32.mrb[17].mxu0  ;;  %3662 = vadd.xlane.f32.xlu0 %v3661_v30  ;;  %v8249_v35 = vpop.f32.mrb[16].mxu1  ;;  %v3410_v30 = vmul.f32 %v11447_v19, %v11447_v19  ;;  %v3640_v47 = vsel %vm282_vm0, %v3402_v16, 0.0  ;;  %v9267_v16 = vpack.c.bf16 %v10941_v6, %v10984_v23 }
 0x13b   :  { %v3411_v59 = vmul.f32 %v889_v22, %v889_v22  ;;  %v1018_v34 = vpop.f32.mrb[17].mxu1  ;;  %v3420_v39 = vmul.f32 %v8249_v35, %v8249_v35 }
 0x13c   :  { %v11594_v61 = vpop.xlane.xlu0 %5792  ;;  %v11596_v46 = vpop.xlane.xlu1 %5918  ;;  %v3419_v55 = vmul.f32 %v1018_v34, %v1018_v34  ;;  %9236 = vmatpush3.bf16.xpose.msk.msra.mxu1 %vm9508_vm1, %v9231_v31 }
 0x13d   :  { %14069 = vst [vmem:[#allocation57_spill] sm:$0xff] %v11594_v61  ;;  %14070 = vst [vmem:[#allocation58_spill] sm:$0xff] %v11596_v46  ;;  %v3667_v22 = vsel %vm282_vm0, %v3411_v59, 0.0  ;;  %v8224_v60 = vpop.f32.mrb[18].mxu0  ;;  %9239 = vmatprep.subr.msk.bf16.mxu1 %vm9508_vm1, %v9237_v9  ;;  %v3412_v59 = vmul.f32 %v8221_v27, %v8221_v27 }
 0x13e   :  { %3641 = vadd.xlane.f32.xlu1 %v3640_v47  ;;  %3668 = vadd.xlane.f32.xlu0 %v3667_v22  ;;  %v899_v44 = vpop.f32.mrb[19].mxu0  ;;  %v8252_v61 = vpop.f32.mrb[18].mxu1  ;;  %v3691_v34 = vsel %vm282_vm0, %v3419_v55, 0.0  ;;  %v3664_v47 = vsel %vm282_vm0, %v3410_v30, 0.0  ;;  %v11623_v55 = vld [vmem:[%s14000_s2 + $0x518] sm:$0xff] }
 0x13f   :  { %v3413_v51 = vmul.f32 %v899_v44, %v899_v44  ;;  %v1028_v41 = vpop.f32.mrb[19].mxu1  ;;  %9218 = vmatpush3.bf16.xpose.msk.msra.mxu0 %vm9508_vm1, %v9213_v56  ;;  %v9249_v30 = vpack.c.bf16 %v11623_v55, %v10907_v17  ;;  %v11649_v17 = vld [vmem:[%s14000_s2 + $0x558] sm:$0xff] }
 0x140   :  { %v11609_v19 = vpop.xlane.xlu0 %5813  ;;  %v11611_v31 = vpop.xlane.xlu1 %5963  ;;  %9245 = vmatprep.subr.msk.bf16.mxu0 %vm9508_vm1, %v9243_v1 }
 0x141   :  { %14071 = vst [vmem:[#allocation59_spill] sm:$0xff] %v11609_v19  ;;  %14072 = vst [vmem:[#allocation60_spill] sm:$0xff] %v11611_v31  ;;  %v11618_v22 = vpop.f32.mrb[20].mxu0  ;;  %v3421_v19 = vmul.f32 %v1028_v41, %v1028_v41  ;;  %v3673_v31 = vsel %vm282_vm0, %v3413_v51, 0.0  ;;  %v11644_v51 = vld [vmem:[%s14000_s2 + $0x550] sm:$0xff] }
 0x142   :  { %3665 = vadd.xlane.f32.xlu1 %v3664_v47  ;;  %3692 = vadd.xlane.f32.xlu0 %v3691_v34  ;;  %v909_v56 = vpop.f32.mrb[21].mxu0  ;;  %v11625_v44 = vpop.f32.mrb[20].mxu1  ;;  %v3670_v34 = vsel %vm282_vm0, %v3412_v59, 0.0 }
 0x143   :  { %v1038_v46 = vpop.f32.mrb[21].mxu1  ;;  %v3697_v35 = vsel %vm282_vm0, %v3421_v19, 0.0  ;;  %v11672_v19 = vld [vmem:[%s14000_s2 + $0x520] sm:$0xff] }
 0x144   :  { %v11628_v6 = vpop.xlane.xlu0 %5942  ;;  %v11630_v27 = vpop.xlane.xlu1 %6002  ;;  %9242 = vmatpush3.bf16.xpose.msk.msra.mxu1 %vm9508_vm1, %v9237_v9  ;;  %v3415_v9 = vmul.f32 %v909_v56, %v909_v56  ;;  %v3694_v56 = vsel %vm282_vm0, %v3420_v39, 0.0  ;;  %v3423_v39 = vmul.f32 %v1038_v46, %v1038_v46  ;;  %v9370_v46 = vld [vmem:[%s14000_s2 + $0x4d0] sm:$0xff] }
 0x145   :  { %14073 = vst [vmem:[#allocation61_spill] sm:$0xff] %v11628_v6  ;;  %14074 = vst [vmem:[#allocation62_spill] sm:$0xff] %v11630_v27  ;;  %v11637_v47 = vpop.f32.mrb[22].mxu0  ;;  %9269 = vmatprep.subr.msk.bf16.mxu1 %vm9508_vm1, %v9267_v16  ;;  %v3414_v27 = vmul.f32 %v8224_v60, %v8224_v60 }
 0x146   :  { %3671 = vadd.xlane.f32.xlu1 %v3670_v34  ;;  %3674 = vadd.xlane.f32.xlu0 %v3673_v31  ;;  %v919_v41 = vpop.f32.mrb[23].mxu0  ;;  %v3679_v60 = vsel %vm282_vm0, %v3415_v9, 0.0  ;;  %v3422_v9 = vmul.f32 %v8252_v61, %v8252_v61  ;;  %v11713_v61 = vld [vmem:[%s14000_s2 + $0x568] sm:$0xff] }
 0x147   :  { %8612 = vmatmul.mubr.msk.f32.vlgmr.msra.gmra.mrb[72].mxu0 %vm282_vm0, %v11395_v50  ;;  %v11654_v59 = vpop.f32.mrb[22].mxu1  ;;  %v9273_v50 = vpack.c.bf16 %v11649_v17, %v11644_v51 }
 0x148   :  { %v11656_v31 = vpop.xlane.xlu0 %5984  ;;  %v11658_v34 = vpop.xlane.xlu1 %5624  ;;  %9248 = vmatpush3.bf16.xpose.msk.msra.mxu0 %vm9508_vm1, %v9243_v1  ;;  %8614 = vmatprep.mubr.msk.f32.mxu0 %vm282_vm0, %v11429_v33  ;;  %v11677_v33 = vld [vmem:[%s14000_s2 + $0x528] sm:$0xff] }
 0x149   :  { %14075 = vst [vmem:[#allocation63_spill] sm:$0xff] %v11656_v31  ;;  %14076 = vst [vmem:[#allocation64_spill] sm:$0xff] %v11658_v34  ;;  %v1048_v6 = vpop.f32.mrb[23].mxu1  ;;  %9251 = vmatprep.subr.msk.bf16.mxu0 %vm9508_vm1, %v9249_v30  ;;  %v9368_v1 = vld [vmem:[%s14000_s2 + $0x4c8] sm:$0xff] }
 0x14a   :  { %3695 = vadd.xlane.f32.xlu1 %v3694_v56  ;;  %3698 = vadd.xlane.f32.xlu0 %v3697_v35  ;;  %v9369_v35 = vld [vmem:[%s14000_s2 + $0x498] sm:$0xff] }
 0x14b   :  { %8640 = vmatmul.mubr.msk.f32.vlgmr.msra.gmra.mrb[72].mxu1 %vm282_vm0, %v9368_v1  ;;  %8615 = vmatmul.mubr.msk.f32.gmra.mrb[74].mxu0 %vm282_vm0, %v9369_v35  ;;  %v3676_v1 = vsel %vm282_vm0, %v3414_v27, 0.0  ;;  %v9255_v35 = vpack.c.bf16 %v11677_v33, %v11672_v19  ;;  %v3417_v27 = vmul.f32 %v919_v41, %v919_v41  ;;  %v3700_v41 = vsel %vm282_vm0, %v3422_v9, 0.0 }
 0x14c   :  { %v11688_v56 = vpop.xlane.xlu0 %6005  ;;  %v11690_v34 = vpop.xlane.xlu1 %5645  ;;  %9272 = vmatpush3.bf16.xpose.msk.msra.mxu1 %vm9508_vm1, %v9267_v16  ;;  %8642 = vmatprep.mubr.msk.f32.mxu1 %vm282_vm0, %v9370_v46  ;;  %v11708_v16 = vld [vmem:[%s14000_s2 + $0x560] sm:$0xff]  ;;  %v3703_v46 = vsel %vm282_vm0, %v3423_v39, 0.0  ;;  %v3424_v9 = vmul.f32 %v11625_v44, %v11625_v44 }
 0x14d   :  { %14077 = vst [vmem:[#allocation65_spill] sm:$0xff] %v11688_v56  ;;  %14078 = vst [vmem:[#allocation66_spill] sm:$0xff] %v11690_v34  ;;  %9275 = vmatprep.subr.msk.bf16.mxu1 %vm9508_vm1, %v9273_v50  ;;  %8617 = vmatprep.mubr.msk.f32.mxu0 %vm282_vm0, %v10855_v12  ;;  %v3685_v39 = vsel %vm282_vm0, %v3417_v27, 0.0 }
 0x14e   :  { %3677 = vadd.xlane.f32.xlu1 %v3676_v1  ;;  %3680 = vadd.xlane.f32.xlu0 %v3679_v60  ;;  %v3416_v60 = vmul.f32 %v11618_v22, %v11618_v22  ;;  %v11745_v22 = vld [vmem:[%s14000_s2 + $0x538] sm:$0xff]  ;;  %v3418_v1 = vmul.f32 %v11637_v47, %v11637_v47  ;;  %v11803_v47 = vld [vmem:[%s14000_s2 + $0x588] sm:$0xff] }
 0x14f   :  { %8643 = vmatmul.mubr.msk.f32.gmra.mrb[74].mxu1 %vm282_vm0, %v10934_v29  ;;  %8618 = vmatmul.mubr.msk.f32.gmra.mrb[76].mxu0 %vm282_vm0, %v11462_v63  ;;  %v9279_v29 = vpack.c.bf16 %v11713_v61, %v11708_v16 }
 0x150   :  { %v11720_v12 = vpop.xlane.xlu0 %5642  ;;  %9254 = vmatpush3.bf16.xpose.msk.msra.mxu0 %vm9508_vm1, %v9249_v30  ;;  %8645 = vmatprep.mubr.msk.f32.mxu1 %vm282_vm0, %v11496_v62  ;;  %v11735_v63 = vpop.xlane.xlu1 %5753  ;;  %v11740_v62 = vld [vmem:[%s14000_s2 + $0x530] sm:$0xff]  ;;  %v3425_v30 = vmul.f32 %v1048_v6, %v1048_v6  ;;  %v3682_v6 = vsel %vm282_vm0, %v3416_v60, 0.0 }
 0x151   :  { %14079 = vst [vmem:[#allocation67_spill] sm:$0xff] %v11720_v12  ;;  %9257 = vmatprep.subr.msk.bf16.mxu0 %vm9508_vm1, %v9255_v35  ;;  %8620 = vmatprep.mubr.msk.f32.mxu0 %vm282_vm0, %v11528_v52  ;;  %14080 = vst [vmem:[#allocation68_spill] sm:$0xff] %v11735_v63 }
 0x152   :  { %3701 = vadd.xlane.f32.xlu1 %v3700_v41  ;;  %3704 = vadd.xlane.f32.xlu0 %v3703_v46  ;;  %v3709_v44 = vsel %vm282_vm0, %v3425_v30, 0.0  ;;  %v3706_v46 = vsel %vm282_vm0, %v3424_v9, 0.0 }
 0x153   :  { %8646 = vmatmul.mubr.msk.f32.gmra.mrb[76].mxu1 %vm282_vm0, %v11501_v15  ;;  %8621 = vmatmul.mubr.msk.f32.gmra.mrb[78].mxu0 %vm282_vm0, %v11533_v7  ;;  %v9261_v15 = vpack.c.bf16 %v11745_v22, %v11740_v62  ;;  %v11770_v7 = vld [vmem:[%s14000_s2 + $0x570] sm:$0xff] }
 0x154   :  { %v11752_v52 = vpop.xlane.xlu0 %5729  ;;  %9278 = vmatpush3.bf16.xpose.msk.msra.mxu1 %vm9508_vm1, %v9273_v50  ;;  %8648 = vmatprep.mubr.msk.f32.mxu1 %vm282_vm0, %v11560_v4  ;;  %v11775_v4 = vld [vmem:[%s14000_s2 + $0x578] sm:$0xff]  ;;  %v11780_v50 = vpop.xlane.xlu1 %5795 }
 0x155   :  { %14081 = vst [vmem:[#allocation69_spill] sm:$0xff] %v11752_v52  ;;  %9281 = vmatprep.subr.msk.bf16.mxu1 %vm9508_vm1, %v9279_v29  ;;  %8667 = vmatprep.mubr.msk.f32.mxu0 %vm282_vm0, %v11590_v28  ;;  %14082 = vst [vmem:[#allocation70_spill] sm:$0xff] %v11780_v50 }
 0x156   :  { %3683 = vadd.xlane.f32.xlu1 %v3682_v6  ;;  %3686 = vadd.xlane.f32.xlu0 %v3685_v39  ;;  %v3426_v6 = vmul.f32 %v11654_v59, %v11654_v59  ;;  %v11822_v59 = vld [vmem:[%s14000_s2 + $0x5c0] sm:$0xff] }
 0x157   :  { %8649 = vmatmul.mubr.msk.f32.gmra.mrb[78].mxu1 %vm282_vm0, %v11565_v2  ;;  %v9285_v2 = vpack.c.bf16 %v11775_v4, %v11770_v7 }
 0x158   :  { %v11782_v28 = vpop.xlane.xlu0 %5774  ;;  %9260 = vmatpush3.bf16.xpose.msk.msra.mxu0 %vm9508_vm1, %v9255_v35  ;;  %8695 = vmatprep.mubr.msk.f32.mxu1 %vm282_vm0, %v10984_v23  ;;  %v8277_v27 = vpop.f32.mrb[24].mxu0  ;;  %v11798_v23 = vld [vmem:[%s14000_s2 + $0x580] sm:$0xff] }
 0x159   :  { %14083 = vst [vmem:[#allocation71_spill] sm:$0xff] %v11782_v28  ;;  %9263 = vmatprep.subr.msk.bf16.mxu0 %vm9508_vm1, %v9261_v15  ;;  %v1147_v60 = vpop.f32.mrb[25].mxu0  ;;  %v11817_v12 = vpop.xlane.xlu1 %5834 }
 0x15a   :  { %3707 = vadd.xlane.f32.xlu1 %v3706_v46  ;;  %3710 = vadd.xlane.f32.xlu0 %v3709_v44  ;;  %v8305_v41 = vpop.f32.mrb[24].mxu1  ;;  %v3427_v35 = vmul.f32 %v1147_v60, %v1147_v60  ;;  %v3688_v44 = vsel %vm282_vm0, %v3418_v1, 0.0  ;;  %v9291_v60 = vpack.c.bf16 %v11803_v47, %v11798_v23  ;;  %14085 = vst [vmem:[#allocation73_spill] sm:$0xff] %v11817_v12 }
 0x15b   :  { %v1276_v30 = vpop.f32.mrb[25].mxu1 }
 0x15c   :  { %v11805_v39 = vpop.xlane.xlu0 %5816  ;;  %v3435_v9 = vmul.f32 %v1276_v30, %v1276_v30  ;;  %9284 = vmatpush3.bf16.xpose.msk.msra.mxu1 %vm9508_vm1, %v9279_v29  ;;  %v3715_v46 = vsel %vm282_vm0, %v3427_v35, 0.0  ;;  %v8280_v50 = vpop.f32.mrb[26].mxu0  ;;  %v11827_v29 = vld [vmem:[%s14000_s2 + $0x5c8] sm:$0xff] }
 0x15d   :  { %14084 = vst [vmem:[#allocation72_spill] sm:$0xff] %v11805_v39  ;;  %9287 = vmatprep.subr.msk.bf16.mxu1 %vm9508_vm1, %v9285_v2  ;;  %v1157_v30 = vpop.f32.mrb[27].mxu0  ;;  %v11852_v31 = vpop.xlane.xlu1 %5921  ;;  %v3430_v24 = vmul.f32 %v8280_v50, %v8280_v50  ;;  %v11903_v50 = vld [vmem:[%s14000_s2 + $0x5a8] sm:$0xff] }
 0x15e   :  { %3689 = vadd.xlane.f32.xlu1 %v3688_v44  ;;  %3716 = vadd.xlane.f32.xlu0 %v3715_v46  ;;  %v3429_v1 = vmul.f32 %v1157_v30, %v1157_v30  ;;  %v3739_v35 = vsel %vm282_vm0, %v3435_v9, 0.0  ;;  %v3428_v44 = vmul.f32 %v8277_v27, %v8277_v27  ;;  %v3712_v46 = vsel %vm282_vm0, %v3426_v6, 0.0  ;;  %14087 = vst [vmem:[#allocation75_spill] sm:$0xff] %v11852_v31 }
 0x15f   :  { %v8308_v39 = vpop.f32.mrb[26].mxu1  ;;  %v9315_v30 = vpack.c.bf16 %v11827_v29, %v11822_v59 }
 0x160   :  { %v11830_v34 = vpop.xlane.xlu0 %5837  ;;  %9266 = vmatpush3.bf16.xpose.msk.msra.mxu0 %vm9508_vm1, %v9261_v15  ;;  %v1286_v12 = vpop.f32.mrb[27].mxu1  ;;  %v11849_v15 = vld [vmem:[%s14000_s2 + $0x598] sm:$0xff]  ;;  %v3721_v6 = vsel %vm282_vm0, %v3429_v1, 0.0 }
 0x161   :  { %14086 = vst [vmem:[#allocation74_spill] sm:$0xff] %v11830_v34  ;;  %v11835_v56 = vpop.f32.mrb[28].mxu0  ;;  %9293 = vmatprep.subr.msk.bf16.mxu0 %vm9508_vm1, %v9291_v60  ;;  %v11844_v34 = vld [vmem:[%s14000_s2 + $0x590] sm:$0xff]  ;;  %v3437_v27 = vmul.f32 %v1286_v12, %v1286_v12 }
 0x162   :  { %3713 = vadd.xlane.f32.xlu1 %v3712_v46  ;;  %3740 = vadd.xlane.f32.xlu0 %v3739_v35  ;;  %v1167_v9 = vpop.f32.mrb[29].mxu0  ;;  %v3436_v35 = vmul.f32 %v8305_v41, %v8305_v41  ;;  %v3718_v46 = vsel %vm282_vm0, %v3428_v44, 0.0  ;;  %v9297_v12 = vpack.c.bf16 %v11849_v15, %v11844_v34  ;;  %v11873_v41 = vld [vmem:[%s14000_s2 + $0x5d8] sm:$0xff] }
 0x163   :  { %v3431_v48 = vmul.f32 %v1167_v9, %v1167_v9  ;;  %v3745_v32 = vsel %vm282_vm0, %v3437_v27, 0.0 }
 0x164   :  { %9290 = vmatpush3.bf16.xpose.msk.msra.mxu1 %vm9508_vm1, %v9285_v2  ;;  %v11857_v53 = vpop.f32.mrb[28].mxu1  ;;  %v11868_v2 = vld [vmem:[%s14000_s2 + $0x5d0] sm:$0xff]  ;;  %v11875_v44 = vpop.xlane.xlu0 %5945  ;;  %v3742_v9 = vsel %vm282_vm0, %v3436_v35, 0.0 }
 0x165   :  { %v11859_v13 = vpop.f32.mrb[30].mxu0  ;;  %9317 = vmatprep.subr.msk.bf16.mxu1 %vm9508_vm1, %v9315_v30  ;;  %v1296_v1 = vpop.f32.mrb[29].mxu1  ;;  %14088 = vst [vmem:[#allocation76_spill] sm:$0xff] %v11875_v44  ;;  %v9321_v27 = vpack.c.bf16 %v11873_v41, %v11868_v2 }
 0x166   :  { %3719 = vadd.xlane.f32.xlu1 %v3718_v46  ;;  %3722 = vadd.xlane.f32.xlu0 %v3721_v6  ;;  %v1177_v31 = vpop.f32.mrb[31].mxu0  ;;  %v9371_v6 = vld [vmem:[%s14000_s2 + $0x508] sm:$0xff]  ;;  %v9372_v46 = vld [vmem:[%s14000_s2 + $0x510] sm:$0xff]  ;;  %v3439_v35 = vmul.f32 %v1296_v1, %v1296_v1  ;;  %v3438_v1 = vmul.f32 %v8308_v39, %v8308_v39 }
 0x167   :  { %8668 = vmatmul.mubr.msk.f32.vlgmr.msra.gmra.mrb[80].mxu0 %vm282_vm0, %v9371_v6  ;;  %v11898_v6 = vld [vmem:[%s14000_s2 + $0x5a0] sm:$0xff] }
 0x168   :  { %9296 = vmatpush3.bf16.xpose.msk.msra.mxu0 %vm9508_vm1, %v9291_v60  ;;  %8670 = vmatprep.mubr.msk.f32.mxu0 %vm282_vm0, %v9372_v46  ;;  %v11889_v44 = vpop.f32.mrb[30].mxu1  ;;  %v3727_v46 = vsel %vm282_vm0, %v3431_v48, 0.0  ;;  %v3724_v48 = vsel %vm282_vm0, %v3430_v24, 0.0  ;;  %v11935_v24 = vld [vmem:[%s14000_s2 + $0x5e8] sm:$0xff]  ;;  %v3751_v39 = vsel %vm282_vm0, %v3439_v35, 0.0 }
 0x169   :  { %9299 = vmatprep.subr.msk.bf16.mxu0 %vm9508_vm1, %v9297_v12  ;;  %v1306_v60 = vpop.f32.mrb[31].mxu1 }
 0x16a   :  { %3743 = vadd.xlane.f32.xlu1 %v3742_v9  ;;  %3746 = vadd.xlane.f32.xlu0 %v3745_v32  ;;  %v11912_v32 = vpop.xlane.xlu1 %5966  ;;  %v11918_v9 = vpop.xlane.xlu0 %5987 }
 0x16b   :  { %8696 = vmatmul.mubr.msk.f32.vlgmr.msra.gmra.mrb[80].mxu1 %vm282_vm0, %v9373_v14  ;;  %8671 = vmatmul.mubr.msk.f32.gmra.mrb[82].mxu0 %vm282_vm0, %v11623_v55  ;;  %14089 = vst [vmem:[#allocation77_spill] sm:$0xff] %v11912_v32  ;;  %14090 = vst [vmem:[#allocation78_spill] sm:$0xff] %v11918_v9  ;;  %v9303_v14 = vpack.c.bf16 %v11903_v50, %v11898_v6  ;;  %v11930_v55 = vld [vmem:[%s14000_s2 + $0x5e0] sm:$0xff] }
 0x16c   :  { %9320 = vmatpush3.bf16.xpose.msk.msra.mxu1 %vm9508_vm1, %v9315_v30  ;;  %8698 = vmatprep.mubr.msk.f32.mxu1 %vm282_vm0, %v11644_v51  ;;  %v3433_v51 = vmul.f32 %v1177_v31, %v1177_v31  ;;  %v3748_v30 = vsel %vm282_vm0, %v3438_v1, 0.0  ;;  %v3434_v1 = vmul.f32 %v11859_v13, %v11859_v13  ;;  %v3442_v13 = vmul.f32 %v11889_v44, %v11889_v44 }
 0x16d   :  { %9323 = vmatprep.subr.msk.bf16.mxu1 %vm9508_vm1, %v9321_v27  ;;  %8673 = vmatprep.mubr.msk.f32.mxu0 %vm282_vm0, %v11672_v19  ;;  %v3432_v19 = vmul.f32 %v11835_v56, %v11835_v56  ;;  %v11965_v56 = vld [vmem:[%s14000_s2 + $0x5b8] sm:$0xff] }
 0x16e   :  { %3725 = vadd.xlane.f32.xlu1 %v3724_v48  ;;  %3728 = vadd.xlane.f32.xlu0 %v3727_v46  ;;  %v11955_v31 = vpop.xlane.xlu1 %6008  ;;  %v3733_v35 = vsel %vm282_vm0, %v3433_v51, 0.0 }
 0x16f   :  { %8699 = vmatmul.mubr.msk.f32.gmra.mrb[82].mxu1 %vm282_vm0, %v11649_v17  ;;  %8674 = vmatmul.mubr.msk.f32.gmra.mrb[84].mxu0 %vm282_vm0, %v11677_v33  ;;  %v9327_v17 = vpack.c.bf16 %v11935_v24, %v11930_v55  ;;  %14091 = vst [vmem:[#allocation79_spill] sm:$0xff] %v11955_v31  ;;  %v11960_v33 = vld [vmem:[%s14000_s2 + $0x5b0] sm:$0xff]  ;;  %v3730_v46 = vsel %vm282_vm0, %v3432_v19, 0.0 }
 0x170   :  { %9302 = vmatpush3.bf16.xpose.msk.msra.mxu0 %vm9508_vm1, %v9297_v12  ;;  %8701 = vmatprep.mubr.msk.f32.mxu1 %vm282_vm0, %v11708_v16  ;;  %v11967_v16 = vpop.xlane.xlu0 %6026  ;;  %v3441_v12 = vmul.f32 %v1306_v60, %v1306_v60 }
 0x171   :  { %9305 = vmatprep.subr.msk.bf16.mxu0 %vm9508_vm1, %v9303_v14  ;;  %8676 = vmatprep.mubr.msk.f32.mxu0 %vm282_vm0, %v11740_v62  ;;  %14092 = vst [vmem:[#allocation80_spill] sm:$0xff] %v11967_v16  ;;  %v3440_v62 = vmul.f32 %v11857_v53, %v11857_v53  ;;  %v11995_v53 = vld [vmem:[%s14000_s2 + $0x5f8] sm:$0xff] }
 0x172   :  { %3749 = vadd.xlane.f32.xlu1 %v3748_v30  ;;  %3752 = vadd.xlane.f32.xlu0 %v3751_v39 }
 0x173   :  { %8702 = vmatmul.mubr.msk.f32.gmra.mrb[84].mxu1 %vm282_vm0, %v11713_v61  ;;  %8677 = vmatmul.mubr.msk.f32.gmra.mrb[86].mxu0 %vm282_vm0, %v11745_v22  ;;  %v9309_v61 = vpack.c.bf16 %v11965_v56, %v11960_v33  ;;  %v11990_v22 = vld [vmem:[%s14000_s2 + $0x5f0] sm:$0xff]  ;;  %v3754_v48 = vsel %vm282_vm0, %v3440_v62, 0.0 }
 0x174   :  { %9326 = vmatpush3.bf16.xpose.msk.msra.mxu1 %vm9508_vm1, %v9321_v27  ;;  %8704 = vmatprep.mubr.msk.f32.mxu1 %vm282_vm0, %v11770_v7  ;;  %v3757_v7 = vsel %vm282_vm0, %v3441_v12, 0.0  ;;  %v12000_v27 = vpop.xlane.xlu1 %6029  ;;  %v12006_v60 = vpop.xlane.xlu0 %5627  ;;  %v3736_v12 = vsel %vm282_vm0, %v3434_v1, 0.0  ;;  %v3760_v1 = vsel %vm282_vm0, %v3442_v13, 0.0 }
 0x175   :  { %9329 = vmatprep.subr.msk.bf16.mxu1 %vm9508_vm1, %v9327_v17  ;;  %8723 = vmatprep.mubr.msk.f32.mxu0 %vm282_vm0, %v11798_v23  ;;  %14093 = vst [vmem:[#allocation81_spill] sm:$0xff] %v12000_v27  ;;  %14094 = vst [vmem:[#allocation82_spill] sm:$0xff] %v12006_v60 }
 0x176   :  { %3731 = vadd.xlane.f32.xlu1 %v3730_v46  ;;  %3734 = vadd.xlane.f32.xlu0 %v3733_v35 }
 0x177   :  { %8705 = vmatmul.mubr.msk.f32.gmra.mrb[86].mxu1 %vm282_vm0, %v11775_v4  ;;  %v9333_v4 = vpack.c.bf16 %v11995_v53, %v11990_v22 }
 0x178   :  { %v8333_v23 = vpop.f32.mrb[32].mxu0  ;;  %9308 = vmatpush3.bf16.xpose.msk.msra.mxu0 %vm9508_vm1, %v9303_v14  ;;  %8751 = vmatprep.mubr.msk.f32.mxu1 %vm282_vm0, %v11822_v59  ;;  %v12023_v46 = vpop.xlane.xlu1 %5648 }
 0x179   :  { %v1405_v51 = vpop.f32.mrb[33].mxu0  ;;  %9311 = vmatprep.subr.msk.bf16.mxu0 %vm9508_vm1, %v9309_v61  ;;  %14095 = vst [vmem:[#allocation83_spill] sm:$0xff] %v12023_v46 }
 0x17a   :  { %3755 = vadd.xlane.f32.xlu1 %v3754_v48  ;;  %v3443_v39 = vmul.f32 %v1405_v51, %v1405_v51  ;;  %3758 = vadd.xlane.f32.xlu0 %v3757_v7  ;;  %v12025_v7 = vpop.xlane.xlu0 %5666  ;;  %v3444_v48 = vmul.f32 %v8333_v23, %v8333_v23 }
 0x17b   :  { %v8361_v14 = vpop.f32.mrb[32].mxu1  ;;  %14096 = vst [vmem:[#allocation84_spill] sm:$0xff] %v12025_v7  ;;  %v4343_v7 = vadd.s32 4294967288, %v10309_v42 }
 0x17c   :  { %v1534_v19 = vpop.f32.mrb[33].mxu1  ;;  %v3763_v59 = vsel %vm282_vm0, %v3443_v39, 0.0  ;;  %v8336_v30 = vpop.f32.mrb[34].mxu0  ;;  %9332 = vmatpush3.bf16.xpose.msk.msra.mxu1 %vm9508_vm1, %v9327_v17  ;;  %v3452_v46 = vmul.f32 %v8361_v14, %v8361_v14 }
 0x17d   :  { %v3451_v35 = vmul.f32 %v1534_v19, %v1534_v19  ;;  %v1415_v62 = vpop.f32.mrb[35].mxu0  ;;  %9335 = vmatprep.subr.msk.bf16.mxu1 %vm9508_vm1, %v9333_v4  ;;  %v3446_v14 = vmul.f32 %v8336_v30, %v8336_v30  ;;  %v12049_v5 = vsub.s32 %v4343_v7, %v11339_v21  ;;  %v12055_v30 = vsub.s32 %v10309_v42, %v11339_v21 }
 0x17e   :  { %3737 = vadd.xlane.f32.xlu1 %v3736_v12  ;;  %3764 = vadd.xlane.f32.xlu0 %v3763_v59  ;;  %v3445_v51 = vmul.f32 %v1415_v62, %v1415_v62  ;;  %v3766_v59 = vsel %vm282_vm0, %v3444_v48, 0.0  ;;  %v12032_v12 = vpop.xlane.xlu1 %5669  ;;  %v3790_v48 = vsel %vm282_vm0, %v3452_v46, 0.0 }
 0x17f   :  { %v3787_v17 = vsel %vm282_vm0, %v3451_v35, 0.0  ;;  %v8364_v39 = vpop.f32.mrb[34].mxu1  ;;  %14097 = vst [vmem:[#allocation85_spill] sm:$0xff] %v12032_v12 }
 0x180   :  { %v1544_v60 = vpop.f32.mrb[35].mxu1  ;;  %9314 = vmatpush3.bf16.xpose.msk.msra.mxu0 %vm9508_vm1, %v9309_v61  ;;  %v8339_v44 = vpop.f32.mrb[36].mxu0  ;;  %v3769_v62 = vsel %vm282_vm0, %v3445_v51, 0.0 }
 0x181   :  { %v1425_v19 = vpop.f32.mrb[37].mxu0  ;;  %v3453_v23 = vmul.f32 %v1544_v60, %v1544_v60 }
 0x182   :  { %3761 = vadd.xlane.f32.xlu1 %v3760_v1  ;;  %3788 = vadd.xlane.f32.xlu0 %v3787_v17  ;;  %v12040_v1 = vpop.xlane.xlu0 %5732  ;;  %v3447_v60 = vmul.f32 %v1425_v19, %v1425_v19 }
 0x183   :  { %v8367_v35 = vpop.f32.mrb[36].mxu1  ;;  %14098 = vst [vmem:[#allocation86_spill] sm:$0xff] %v12040_v1  ;;  %v3793_v51 = vsel %vm282_vm0, %v3453_v23, 0.0  ;;  %v3454_v23 = vmul.f32 %v8364_v39, %v8364_v39  ;;  %v4350_v39 = vadd.s32 4294967280, %v10309_v42 }
 0x184   :  { %9338 = vmatpush3.bf16.xpose.msk.msra.mxu1 %vm9508_vm1, %v9333_v4  ;;  %v1554_v61 = vpop.f32.mrb[37].mxu1  ;;  %v12038_v31 = vpop.f32.mrb[38].mxu0  ;;  %v3775_v12 = vsel %vm282_vm0, %v3447_v60, 0.0  ;;  %vm5291_vm1 = vcmask 1042434  }
 0x185   :  { %v1435_v13 = vpop.f32.mrb[39].mxu0 }
 0x186   :  { %3767 = vadd.xlane.f32.xlu1 %v3766_v59  ;;  %3770 = vadd.xlane.f32.xlu0 %v3769_v62  ;;  %v3455_v62 = vmul.f32 %v1554_v61, %v1554_v61 }
 0x187   :  { %8724 = vmatmul.mubr.msk.f32.vlgmr.msra.gmra.mrb[88].mxu0 %vm282_vm0, %v11803_v47  ;;  %v12046_v17 = vpop.f32.mrb[38].mxu1  ;;  %v3772_v47 = vsel %vm282_vm0, %v3446_v14, 0.0 }
 0x188   :  { %8726 = vmatprep.mubr.msk.f32.mxu0 %vm282_vm0, %v11844_v34  ;;  %v1564_v4 = vpop.f32.mrb[39].mxu1  ;;  %v4357_v34 = vadd.s32 4294967272, %v10309_v42 }
 0x189   :  { %v3576_v46 = vpop.xlane.xlu1 %3575 }
 0x18a   :  { %v3573_v19 = vpop.xlane.xlu0 %3572  ;;  %3791 = vadd.xlane.f32.xlu1 %v3790_v48  ;;  %v4347_v59 = vrot.slane %v3576_v46, %v12049_v5  ;;  %3794 = vadd.xlane.f32.xlu0 %v3793_v51  ;;  %v3448_v48 = vmul.f32 %v8339_v44, %v8339_v44  ;;  %v3796_v51 = vsel %vm282_vm0, %v3454_v23, 0.0  ;;  %v3449_v46 = vmul.f32 %v1435_v13, %v1435_v13 }
 0x18b   :  { %v4342_v7 = vrot.slane %v3573_v19, %v12055_v30  ;;  %8752 = vmatmul.mubr.msk.f32.vlgmr.msra.gmra.mrb[88].mxu1 %vm282_vm0, %v11827_v29  ;;  %8727 = vmatmul.mubr.msk.f32.gmra.mrb[90].mxu0 %vm282_vm0, %v11849_v15  ;;  %v12088_v44 = vsub.s32 %v4350_v39, %v11339_v21 }
 0x18c   :  { %8754 = vmatprep.mubr.msk.f32.mxu1 %vm282_vm0, %v11868_v2  ;;  %8729 = vmatprep.mubr.msk.f32.mxu0 %vm282_vm0, %v11898_v6  ;;  %v3799_v2 = vsel %vm282_vm0, %v3455_v62, 0.0  ;;  %v12081_v6 = vsub.s32 %v4357_v34, %v11339_v21  ;;  %v3781_v23 = vsel %vm282_vm0, %v3449_v46, 0.0 }
 0x18d   :  { %v4349_v61 = vsel %vm4348_vm8, %v4347_v59, %v4342_v7  ;;  %v3600_v14 = vpop.xlane.xlu1 %3599  ;;  %v3456_v59 = vmul.f32 %v8367_v35, %v8367_v35  ;;  %v4364_v7 = vadd.s32 4294967264, %v10309_v42 }
 0x18e   :  { %v3597_v60 = vpop.xlane.xlu0 %3596  ;;  %3773 = vadd.xlane.f32.xlu1 %v3772_v47  ;;  %v4399_v29 = vrot.slane %v3600_v14, %v12049_v5  ;;  %3776 = vadd.xlane.f32.xlu0 %v3775_v12 }
 0x18f   :  { %v4395_v15 = vrot.slane %v3597_v60, %v12055_v30  ;;  %8755 = vmatmul.mubr.msk.f32.gmra.mrb[90].mxu1 %vm282_vm0, %v11873_v41  ;;  %8730 = vmatmul.mubr.msk.f32.gmra.mrb[92].mxu0 %vm282_vm0, %v11903_v50  ;;  %v3778_v50 = vsel %vm282_vm0, %v3448_v48, 0.0  ;;  %v12117_v60 = vsub.s32 %v4364_v7, %v11339_v21 }
 0x190   :  { %8757 = vmatprep.mubr.msk.f32.mxu1 %vm282_vm0, %v11930_v55  ;;  %8732 = vmatprep.mubr.msk.f32.mxu0 %vm282_vm0, %v11960_v33  ;;  %v3457_v55 = vmul.f32 %v1564_v4, %v1564_v4  ;;  %v4371_v33 = vadd.s32 4294967256, %v10309_v42 }
 0x191   :  { %v4400_v12 = vsel %vm4348_vm8, %v4399_v29, %v4395_v15  ;;  %v3582_v13 = vpop.xlane.xlu1 %3581 }
 0x192   :  { %v3579_v19 = vpop.xlane.xlu0 %3578  ;;  %3797 = vadd.xlane.f32.xlu1 %v3796_v51  ;;  %v4361_v41 = vrot.slane %v3582_v13, %v12081_v6  ;;  %3800 = vadd.xlane.f32.xlu0 %v3799_v2  ;;  %v3805_v14 = vsel %vm282_vm0, %v3457_v55, 0.0 }
 0x193   :  { %v4354_v47 = vrot.slane %v3579_v19, %v12088_v44  ;;  %8758 = vmatmul.mubr.msk.f32.gmra.mrb[92].mxu1 %vm282_vm0, %v11935_v24  ;;  %8733 = vmatmul.mubr.msk.f32.gmra.mrb[94].mxu0 %vm282_vm0, %v11965_v56  ;;  %v3450_v56 = vmul.f32 %v12038_v31, %v12038_v31 }
 0x194   :  { %8760 = vmatprep.mubr.msk.f32.mxu1 %vm282_vm0, %v11990_v22  ;;  %v3802_v22 = vsel %vm282_vm0, %v3456_v59, 0.0 }
 0x195   :  { %v4356_v35 = vsel %vm4355_vm9, %v4354_v47, %v4349_v61  ;;  %v3606_v4 = vpop.xlane.xlu1 %3605  ;;  %v12114_v61 = vsub.s32 %v4371_v33, %v11339_v21 }
 0x196   :  { %v4363_v62 = vsel %vm4362_vm10, %v4361_v41, %v4356_v35  ;;  %v3603_v34 = vpop.xlane.xlu0 %3602  ;;  %3779 = vadd.xlane.f32.xlu1 %v3778_v50  ;;  %v4409_v24 = vrot.slane %v3606_v4, %v12081_v6  ;;  %3782 = vadd.xlane.f32.xlu0 %v3781_v23  ;;  %v3784_v50 = vsel %vm282_vm0, %v3450_v56, 0.0  ;;  %v4378_v23 = vadd.s32 4294967248, %v10309_v42 }
 0x197   :  { %v4404_v39 = vrot.slane %v3603_v34, %v12088_v44  ;;  %8761 = vmatmul.mubr.msk.f32.gmra.mrb[94].mxu1 %vm282_vm0, %v11995_v53  ;;  %v3458_v53 = vmul.f32 %v12046_v17, %v12046_v17 }
 0x198   :  { %v8389_v48 = vpop.f32.mrb[40].mxu0 }
 0x199   :  { %v4405_v29 = vsel %vm4355_vm9, %v4404_v39, %v4400_v12  ;;  %v3588_v15 = vpop.xlane.xlu1 %3587  ;;  %v1663_v31 = vpop.f32.mrb[41].mxu0  ;;  %v4385_v12 = vadd.s32 4294967240, %v10309_v42  ;;  %v3460_v4 = vmul.f32 %v8389_v48, %v8389_v48 }
 0x19a   :  { %v4410_v51 = vsel %vm4362_vm10, %v4409_v24, %v4405_v29  ;;  %v3585_v46 = vpop.xlane.xlu0 %3584  ;;  %3803 = vadd.xlane.f32.xlu1 %v3802_v22  ;;  %v4375_v2 = vrot.slane %v3588_v15, %v12114_v61  ;;  %v3459_v13 = vmul.f32 %v1663_v31, %v1663_v31  ;;  %3806 = vadd.xlane.f32.xlu0 %v3805_v14  ;;  %v3808_v22 = vsel %vm282_vm0, %v3458_v53, 0.0 }
 0x19b   :  { %v4368_v19 = vrot.slane %v3585_v46, %v12117_v60  ;;  %v8417_v41 = vpop.f32.mrb[40].mxu1  ;;  %v12139_v31 = vsub.s32 %v4378_v23, %v11339_v21 }
 0x19c   :  { %v1792_v59 = vpop.f32.mrb[41].mxu1  ;;  %v3811_v47 = vsel %vm282_vm0, %v3459_v13, 0.0  ;;  %v8392_v55 = vpop.f32.mrb[42].mxu0 }
 0x19d   :  { %v4370_v33 = vsel %vm4369_vm11, %v4368_v19, %v4363_v62  ;;  %v3612_v7 = vpop.xlane.xlu1 %3611  ;;  %v3467_v35 = vmul.f32 %v1792_v59, %v1792_v59  ;;  %v1673_v17 = vpop.f32.mrb[43].mxu0  ;;  %v12136_v62 = vsub.s32 %v4385_v12, %v11339_v21  ;;  %v3814_v59 = vsel %vm282_vm0, %v3460_v4, 0.0 }
 0x19e   :  { %v4377_v34 = vsel %vm4376_vm12, %v4375_v2, %v4370_v33  ;;  %v3609_v24 = vpop.xlane.xlu0 %3608  ;;  %3785 = vadd.xlane.f32.xlu1 %v3784_v50  ;;  %v4419_v56 = vrot.slane %v3612_v7, %v12114_v61  ;;  %3812 = vadd.xlane.f32.xlu0 %v3811_v47  ;;  %v3461_v14 = vmul.f32 %v1673_v17, %v1673_v17 }
 0x19f   :  { %v4414_v39 = vrot.slane %v3609_v24, %v12117_v60  ;;  %v3835_v42 = vsel %vm282_vm0, %v3467_v35, 0.0  ;;  %v8420_v29 = vpop.f32.mrb[42].mxu1  ;;  %v3468_v12 = vmul.f32 %v8417_v41, %v8417_v41 }
 0x1a0   :  { %v1802_v15 = vpop.f32.mrb[43].mxu1  ;;  %v8395_v48 = vpop.f32.mrb[44].mxu0  ;;  %v3817_v23 = vsel %vm282_vm0, %v3461_v14, 0.0 }
 0x1a1   :  { %v4415_v46 = vsel %vm4369_vm11, %v4414_v39, %v4410_v51  ;;  %v3594_v2 = vpop.xlane.xlu1 %3593  ;;  %v1683_v13 = vpop.f32.mrb[45].mxu0  ;;  %v3469_v33 = vmul.f32 %v1802_v15, %v1802_v15  ;;  %v3462_v39 = vmul.f32 %v8392_v55, %v8392_v55  ;;  %v3838_v14 = vsel %vm282_vm0, %v3468_v12, 0.0 }
 0x1a2   :  { %v4420_v19 = vsel %vm4376_vm12, %v4419_v56, %v4415_v46  ;;  %v3591_v50 = vpop.xlane.xlu0 %3590  ;;  %3809 = vadd.xlane.f32.xlu1 %v3808_v22  ;;  %v4389_v53 = vrot.slane %v3594_v2, %v12136_v62  ;;  %3836 = vadd.xlane.f32.xlu0 %v3835_v42  ;;  %v3463_v15 = vmul.f32 %v1683_v13, %v1683_v13 }
 0x1a3   :  { %v4382_v47 = vrot.slane %v3591_v50, %v12139_v31  ;;  %v8423_v7 = vpop.f32.mrb[44].mxu1  ;;  %v3841_v46 = vsel %vm282_vm0, %v3469_v33, 0.0  ;;  %v3464_v33 = vmul.f32 %v8395_v48, %v8395_v48 }
 0x1a4   :  { %v1812_v51 = vpop.f32.mrb[45].mxu1  ;;  %v8398_v35 = vpop.f32.mrb[46].mxu0  ;;  %v3823_v13 = vsel %vm282_vm0, %v3463_v15, 0.0 }
 0x1a5   :  { %v4384_v17 = vsel %vm4383_vm13, %v4382_v47, %v4377_v34  ;;  %v3618_v24 = vpop.xlane.xlu1 %3617  ;;  %v1693_v56 = vpop.f32.mrb[47].mxu0  ;;  %v3471_v12 = vmul.f32 %v1812_v51, %v1812_v51  ;;  %v3826_v51 = vsel %vm282_vm0, %v3464_v33, 0.0 }
 0x1a6   :  { %v4391_v22 = vsel %vm4390_vm14, %v4389_v53, %v4384_v17  ;;  %v3615_v42 = vpop.xlane.xlu0 %3614  ;;  %3815 = vadd.xlane.f32.xlu1 %v3814_v59  ;;  %v4429_v41 = vrot.slane %v3618_v24, %v12136_v62  ;;  %3818 = vadd.xlane.f32.xlu0 %v3817_v23  ;;  %v3820_v53 = vsel %vm282_vm0, %v3462_v39, 0.0  ;;  %v3470_v59 = vmul.f32 %v8420_v29, %v8420_v29 }
 0x1a7   :  { %v4424_v4 = vrot.slane %v3615_v42, %v12139_v31  ;;  %v8426_v2 = vpop.f32.mrb[46].mxu1  ;;  %v3465_v42 = vmul.f32 %v1693_v56, %v1693_v56  ;;  %v3472_v29 = vmul.f32 %v8423_v7, %v8423_v7  ;;  %v3466_v7 = vmul.f32 %v8398_v35, %v8398_v35 }
 0x1a8   :  { %v1822_v50 = vpop.f32.mrb[47].mxu1  ;;  %v3844_v24 = vsel %vm282_vm0, %v3470_v59, 0.0 }
 0x1a9   :  { %v4425_v34 = vsel %vm4383_vm13, %v4424_v4, %v4420_v19  ;;  %v3473_v15 = vmul.f32 %v1822_v50, %v1822_v50  ;;  %v3850_v50 = vsel %vm282_vm0, %v3472_v29, 0.0 }
 0x1aa   :  { %v4430_v55 = vsel %vm4390_vm14, %v4429_v41, %v4425_v34  ;;  %3839 = vadd.xlane.f32.xlu1 %v3838_v14  ;;  %3842 = vadd.xlane.f32.xlu0 %v3841_v46  ;;  %v3847_v41 = vsel %vm282_vm0, %v3471_v12, 0.0  ;;  %v3829_v46 = vsel %vm282_vm0, %v3465_v42, 0.0 }
 0x1ab   :  { %v12157_v47 = vsel %vm5289_vm15, %v4430_v55, %v4391_v22  ;;  %v3621_v23 = vpop.xlane.xlu0 %3620 }
 0x1ac   :  { %v4434_v48 = vrot.slane %v3621_v23, %v12055_v30 }
 0x1ae   :  { %3821 = vadd.xlane.f32.xlu1 %v3820_v53  ;;  %3824 = vadd.xlane.f32.xlu0 %v3823_v13 }
 0x1af   :  { %v273_v17 = vpop.xlane.xlu1 %272  ;;  %v3645_v19 = vpop.xlane.xlu0 %3644 }
 0x1b0   :  { %v274_v4 = vrot.slane %v273_v17, 4  ;;  %v4473_v23 = vrot.slane %v3645_v19, %v12055_v30  ;;  %v3832_v19 = vsel %vm282_vm0, %v3466_v7, 0.0 }
 0x1b2   :  { %v275_v39 = vadd.f32 %v274_v4, %v273_v17  ;;  %3845 = vadd.xlane.f32.xlu1 %v3844_v24  ;;  %3848 = vadd.xlane.f32.xlu0 %v3847_v41  ;;  %v3853_v17 = vsel %vm282_vm0, %v3473_v15, 0.0 }
 0x1b3   :  { %v3624_v22 = vpop.xlane.xlu1 %3623  ;;  %v3627_v14 = vpop.xlane.xlu0 %3626 }
 0x1b4   :  { %v4438_v34 = vrot.slane %v3624_v22, %v12049_v5  ;;  %v4443_v56 = vrot.slane %v3627_v14, %v12088_v44  ;;  %v276_v55 = vrot.slane %v275_v39, 2 }
 0x1b6   :  { %v4439_v53 = vsel %vm4348_vm8, %v4438_v34, %v4434_v48  ;;  %3827 = vadd.xlane.f32.xlu1 %v3826_v51  ;;  %3830 = vadd.xlane.f32.xlu0 %v3829_v46  ;;  %v277_v59 = vadd.f32 %v276_v55, %v275_v39  ;;  %v3474_v51 = vmul.f32 %v8426_v2, %v8426_v2 }
 0x1b7   :  { %v4444_v12 = vsel %vm4355_vm9, %v4443_v56, %v4439_v53  ;;  %v3648_v13 = vpop.xlane.xlu1 %3647  ;;  %v3651_v33 = vpop.xlane.xlu0 %3650 }
 0x1b8   :  { %v4477_v24 = vrot.slane %v3648_v13, %v12049_v5  ;;  %v4482_v42 = vrot.slane %v3651_v33, %v12088_v44  ;;  %v8445_v41 = vpop.f32.mrb[48].mxu0  ;;  %v278_v4 = vrot.slane %v277_v59, 1 }
 0x1b9   :  { %v1921_v22 = vpop.f32.mrb[49].mxu0 }
 0x1ba   :  { %v4478_v39 = vsel %vm4348_vm8, %v4477_v24, %v4473_v23  ;;  %3851 = vadd.xlane.f32.xlu1 %v3850_v50  ;;  %v3475_v35 = vmul.f32 %v1921_v22, %v1921_v22  ;;  %3854 = vadd.xlane.f32.xlu0 %v3853_v17  ;;  %v279_v14 = vadd.f32 %v278_v4, %v277_v59  ;;  %v3856_v24 = vsel %vm282_vm0, %v3474_v51, 0.0 }
 0x1bb   :  { %v4483_v29 = vsel %vm4355_vm9, %v4482_v42, %v4478_v39  ;;  %v3630_v46 = vpop.xlane.xlu1 %3629  ;;  %v3633_v15 = vpop.xlane.xlu0 %3632  ;;  %v3476_v50 = vmul.f32 %v8445_v41, %v8445_v41 }
 0x1bc   :  { %v4448_v48 = vrot.slane %v3630_v46, %v12081_v6  ;;  %v4453_v34 = vrot.slane %v3633_v15, %v12117_v60  ;;  %9339 = vpush %v279_v14  ;;  %v8473_v56 = vpop.f32.mrb[48].mxu1  ;;  %v3859_v55 = vsel %vm282_vm0, %v3475_v35, 0.0  ;;  %v8448_v53 = vpop.f32.mrb[50].mxu0 }
 0x1bd   :  { %v2050_v13 = vpop.f32.mrb[49].mxu1  ;;  %v1931_v33 = vpop.f32.mrb[51].mxu0  ;;  %v3862_v15 = vsel %vm282_vm0, %v3476_v50, 0.0 }
 0x1be   :  { %v4449_v2 = vsel %vm4362_vm10, %v4448_v48, %v4444_v12  ;;  %3833 = vadd.xlane.f32.xlu1 %v3832_v19  ;;  %v3483_v59 = vmul.f32 %v2050_v13, %v2050_v13  ;;  %3860 = vadd.xlane.f32.xlu0 %v3859_v55  ;;  %v3477_v42 = vmul.f32 %v1931_v33, %v1931_v33 }
 0x1bf   :  { %v4454_v17 = vsel %vm4369_vm11, %v4453_v34, %v4449_v2  ;;  %v3654_v7 = vpop.xlane.xlu1 %3653  ;;  %v3657_v23 = vpop.xlane.xlu0 %3656  ;;  %v3484_v19 = vmul.f32 %v8473_v56, %v8473_v56 }
 0x1c0   :  { %v4487_v4 = vrot.slane %v3654_v7, %v12081_v6  ;;  %v4492_v22 = vrot.slane %v3657_v23, %v12117_v60  ;;  %v3883_v39 = vsel %vm282_vm0, %v3483_v59, 0.0  ;;  %v8476_v35 = vpop.f32.mrb[50].mxu1  ;;  %v8451_v41 = vpop.f32.mrb[52].mxu0  ;;  %v3865_v13 = vsel %vm282_vm0, %v3477_v42, 0.0 }
 0x1c1   :  { %v2060_v14 = vpop.f32.mrb[51].mxu1  ;;  %v1941_v12 = vpop.f32.mrb[53].mxu0 }
 0x1c2   :  { %v4488_v46 = vsel %vm4362_vm10, %v4487_v4, %v4483_v29  ;;  %3857 = vadd.xlane.f32.xlu1 %v3856_v24  ;;  %3884 = vadd.xlane.f32.xlu0 %v3883_v39  ;;  %v3485_v55 = vmul.f32 %v2060_v14, %v2060_v14  ;;  %v3478_v24 = vmul.f32 %v8448_v53, %v8448_v53  ;;  %v3886_v4 = vsel %vm282_vm0, %v3484_v19, 0.0 }
 0x1c3   :  { %v4493_v51 = vsel %vm4369_vm11, %v4492_v22, %v4488_v46  ;;  %v3636_v48 = vpop.xlane.xlu1 %3635  ;;  %v3639_v34 = vpop.xlane.xlu0 %3638  ;;  %v3479_v22 = vmul.f32 %v1941_v12, %v1941_v12 }
 0x1c4   :  { %v4458_v33 = vrot.slane %v3636_v48, %v12114_v61  ;;  %v8479_v2 = vpop.f32.mrb[52].mxu1  ;;  %v8454_v59 = vpop.f32.mrb[54].mxu0  ;;  %v3889_v39 = vsel %vm282_vm0, %v3485_v55, 0.0  ;;  %v4463_v46 = vrot.slane %v3639_v34, %v12139_v31 }
 0x1c5   :  { %v2070_v7 = vpop.f32.mrb[53].mxu1  ;;  %v1951_v23 = vpop.f32.mrb[55].mxu0  ;;  %v3871_v12 = vsel %vm282_vm0, %v3479_v22, 0.0 }
 0x1c6   :  { %v4459_v29 = vsel %vm4376_vm12, %v4458_v33, %v4454_v17  ;;  %3863 = vadd.xlane.f32.xlu1 %v3862_v15  ;;  %3866 = vadd.xlane.f32.xlu0 %v3865_v13  ;;  %v3486_v17 = vmul.f32 %v8476_v35, %v8476_v35  ;;  %v3868_v13 = vsel %vm282_vm0, %v3478_v24, 0.0  ;;  %v3487_v19 = vmul.f32 %v2070_v7, %v2070_v7 }
 0x1c7   :  { %v3660_v50 = vpop.xlane.xlu1 %3659  ;;  %v3663_v56 = vpop.xlane.xlu0 %3662  ;;  %v4464_v33 = vsel %vm4383_vm13, %v4463_v46, %v4459_v29  ;;  %v3481_v22 = vmul.f32 %v1951_v23, %v1951_v23 }
 0x1c8   :  { %v4497_v42 = vrot.slane %v3660_v50, %v12114_v61  ;;  %v8482_v14 = vpop.f32.mrb[54].mxu1  ;;  %v4502_v34 = vrot.slane %v3663_v56, %v12139_v31  ;;  %v3480_v50 = vmul.f32 %v8451_v41, %v8451_v41  ;;  %v3892_v7 = vsel %vm282_vm0, %v3486_v17, 0.0 }
 0x1c9   :  { %v2080_v48 = vpop.f32.mrb[55].mxu1 }
 0x1ca   :  { %v4498_v21 = vsel %vm4376_vm12, %v4497_v42, %v4493_v51  ;;  %3887 = vadd.xlane.f32.xlu1 %v3886_v4  ;;  %3890 = vadd.xlane.f32.xlu0 %v3889_v39  ;;  %v3895_v39 = vsel %vm282_vm0, %v3487_v19, 0.0  ;;  %v3874_v42 = vsel %vm282_vm0, %v3480_v50, 0.0  ;;  %v3489_v17 = vmul.f32 %v2080_v48, %v2080_v48 }
 0x1cb   :  { %v3642_v15 = vpop.xlane.xlu1 %3641  ;;  %v12197_v53 = vpop.xlane.xlu0 %3668  ;;  %v4503_v56 = vsel %vm4383_vm13, %v4502_v34, %v4498_v21  ;;  %v3482_v21 = vmul.f32 %v8454_v59, %v8454_v59 }
 0x1cc   :  { %v4468_v55 = vrot.slane %v3642_v15, %v12136_v62 }
 0x1cd   :  { %v3880_v59 = vsel %vm282_vm0, %v3482_v21, 0.0 }
 0x1ce   :  { %v4469_v51 = vsel %vm4390_vm14, %v4468_v55, %v4464_v33  ;;  %3869 = vadd.xlane.f32.xlu1 %v3868_v13  ;;  %3872 = vadd.xlane.f32.xlu0 %v3871_v12  ;;  %v3877_v13 = vsel %vm282_vm0, %v3481_v22, 0.0 }
 0x1cf   :  { %v5292_v35 = vsel %vm5291_vm1, %v4469_v51, %v12157_v47  ;;  %v3666_v4 = vpop.xlane.xlu1 %3665  ;;  %v12207_v24 = vpop.xlane.xlu0 %3692  ;;  %v3488_v47 = vmul.f32 %v8479_v2, %v8479_v2  ;;  %v3901_v2 = vsel %vm282_vm0, %v3489_v17, 0.0  ;;  %v3490_v51 = vmul.f32 %v8482_v14, %v8482_v14 }
 0x1d0   :  { %v4507_v29 = vrot.slane %v3666_v4, %v12136_v62 }
 0x1d1   :  { %v3898_v55 = vsel %vm282_vm0, %v3488_v47, 0.0  ;;  %v3904_v14 = vsel %vm282_vm0, %v3490_v51, 0.0 }
 0x1d2   :  { %v4508_v41 = vsel %vm4390_vm14, %v4507_v29, %v4503_v56  ;;  %3893 = vadd.xlane.f32.xlu1 %v3892_v7  ;;  %3896 = vadd.xlane.f32.xlu0 %v3895_v39 }
 0x1d3   :  { %v12216_v46 = vsel %vm5293_vm2, %v4508_v41, %v5292_v35  ;;  %v12218_v15 = vpop.xlane.xlu1 %3671  ;;  %v12220_v23 = vpop.xlane.xlu0 %3674 }
 0x1d6   :  { %3875 = vadd.xlane.f32.xlu1 %v3874_v42  ;;  %3878 = vadd.xlane.f32.xlu0 %v3877_v13 }
 0x1d7   :  { %v12223_v19 = vpop.xlane.xlu1 %3695  ;;  %v12225_v12 = vpop.xlane.xlu0 %3698 }
 0x1d8   :  { %v8501_v33 = vpop.f32.mrb[56].mxu0 }
 0x1d9   :  { %v2179_v34 = vpop.f32.mrb[57].mxu0  ;;  %v3492_v41 = vmul.f32 %v8501_v33, %v8501_v33 }
 0x1da   :  { %3899 = vadd.xlane.f32.xlu1 %v3898_v55  ;;  %v3491_v50 = vmul.f32 %v2179_v34, %v2179_v34  ;;  %3902 = vadd.xlane.f32.xlu0 %v3901_v2 }
 0x1db   :  { %v12229_v48 = vpop.xlane.xlu1 %3677  ;;  %v12231_v35 = vpop.xlane.xlu0 %3680  ;;  %v3910_v33 = vsel %vm282_vm0, %v3492_v41, 0.0 }
 0x1dc   :  { %v8529_v4 = vpop.f32.mrb[56].mxu1  ;;  %v3907_v7 = vsel %vm282_vm0, %v3491_v50, 0.0  ;;  %v8504_v22 = vpop.f32.mrb[58].mxu0 }
 0x1dd   :  { %v2308_v39 = vpop.f32.mrb[57].mxu1  ;;  %v2189_v29 = vpop.f32.mrb[59].mxu0  ;;  %v3500_v50 = vmul.f32 %v8529_v4, %v8529_v4  ;;  %v3494_v32 = vmul.f32 %v8504_v22, %v8504_v22 }
 0x1de   :  { %3881 = vadd.xlane.f32.xlu1 %v3880_v59  ;;  %v3499_v56 = vmul.f32 %v2308_v39, %v2308_v39  ;;  %3908 = vadd.xlane.f32.xlu0 %v3907_v7  ;;  %v3493_v17 = vmul.f32 %v2189_v29, %v2189_v29 }
 0x1df   :  { %v12235_v42 = vpop.xlane.xlu1 %3701  ;;  %v12237_v47 = vpop.xlane.xlu0 %3704  ;;  %v3934_v4 = vsel %vm282_vm0, %v3500_v50, 0.0 }
 0x1e0   :  { %v3931_v13 = vsel %vm282_vm0, %v3499_v56, 0.0  ;;  %v8532_v21 = vpop.f32.mrb[58].mxu1  ;;  %v8507_v55 = vpop.f32.mrb[60].mxu0  ;;  %v3913_v16 = vsel %vm282_vm0, %v3493_v17, 0.0 }
 0x1e1   :  { %v2318_v2 = vpop.f32.mrb[59].mxu1  ;;  %v2199_v34 = vpop.f32.mrb[61].mxu0  ;;  %v3502_v17 = vmul.f32 %v8532_v21, %v8532_v21  ;;  %v3496_v50 = vmul.f32 %v8507_v55, %v8507_v55 }
 0x1e2   :  { %3905 = vadd.xlane.f32.xlu1 %v3904_v14  ;;  %3932 = vadd.xlane.f32.xlu0 %v3931_v13  ;;  %v3501_v39 = vmul.f32 %v2318_v2, %v2318_v2  ;;  %v3495_v13 = vmul.f32 %v2199_v34, %v2199_v34 }
 0x1e3   :  { %v12241_v59 = vpop.xlane.xlu1 %3683  ;;  %v12243_v7 = vpop.xlane.xlu0 %3686 }
 0x1e4   :  { %v8535_v51 = vpop.f32.mrb[60].mxu1  ;;  %v8510_v29 = vpop.f32.mrb[62].mxu0  ;;  %v3937_v20 = vsel %vm282_vm0, %v3501_v39, 0.0 }
 0x1e5   :  { %v2328_v27 = vpop.f32.mrb[61].mxu1  ;;  %v2209_v56 = vpop.f32.mrb[63].mxu0  ;;  %v3504_v1 = vmul.f32 %v8535_v51, %v8535_v51 }
 0x1e6   :  { %3911 = vadd.xlane.f32.xlu1 %v3910_v33  ;;  %3914 = vadd.xlane.f32.xlu0 %v3913_v16  ;;  %v3916_v16 = vsel %vm282_vm0, %v3494_v32, 0.0  ;;  %v3503_v22 = vmul.f32 %v2328_v27, %v2328_v27  ;;  %v3919_v33 = vsel %vm282_vm0, %v3495_v13, 0.0  ;;  %v3922_v27 = vsel %vm282_vm0, %v3496_v50, 0.0 }
 0x1e7   :  { %v12247_v9 = vpop.xlane.xlu1 %3707  ;;  %v12249_v14 = vpop.xlane.xlu0 %3710 }
 0x1e8   :  { %v8538_v41 = vpop.f32.mrb[62].mxu1  ;;  %v3943_v21 = vsel %vm282_vm0, %v3503_v22, 0.0 }
 0x1e9   :  { %v2338_v2 = vpop.f32.mrb[63].mxu1 }
 0x1ea   :  { %3935 = vadd.xlane.f32.xlu1 %v3934_v4  ;;  %3938 = vadd.xlane.f32.xlu0 %v3937_v20  ;;  %v3940_v4 = vsel %vm282_vm0, %v3502_v17, 0.0  ;;  %v3497_v20 = vmul.f32 %v2209_v56, %v2209_v56  ;;  %v3505_v13 = vmul.f32 %v2338_v2, %v2338_v2  ;;  %v3946_v56 = vsel %vm282_vm0, %v3504_v1, 0.0 }
 0x1eb   :  { %v12253_v10 = vpop.xlane.xlu1 %3689  ;;  %v12255_v45 = vpop.xlane.xlu0 %3716  ;;  %v4555_v2 = vrot.slane %v12223_v19, %v12049_v5  ;;  %v3506_v1 = vmul.f32 %v8538_v41, %v8538_v41  ;;  %v4560_v19 = vrot.slane %v12225_v12, %v12088_v44 }
 0x1ec   :  { %v3925_v55 = vsel %vm282_vm0, %v3497_v20, 0.0  ;;  %v3949_v22 = vsel %vm282_vm0, %v3505_v13, 0.0 }
 0x1ee   :  { %3917 = vadd.xlane.f32.xlu1 %v3916_v16  ;;  %3920 = vadd.xlane.f32.xlu0 %v3919_v33  ;;  %v3498_v16 = vmul.f32 %v8510_v29, %v8510_v29  ;;  %v4512_v29 = vrot.slane %v12197_v53, %v12055_v30 }
 0x1ef   :  { %v12259_v34 = vpop.xlane.xlu1 %3713  ;;  %v12261_v39 = vpop.xlane.xlu0 %3740 }
 0x1f2   :  { %3941 = vadd.xlane.f32.xlu1 %v3940_v4  ;;  %3944 = vadd.xlane.f32.xlu0 %v3943_v21  ;;  %v4516_v4 = vrot.slane %v12218_v15, %v12049_v5  ;;  %v4551_v21 = vrot.slane %v12207_v24, %v12055_v30  ;;  %v4521_v15 = vrot.slane %v12220_v23, %v12088_v44 }
 0x1f3   :  { %v3720_v52 = vpop.xlane.xlu1 %3719  ;;  %v12265_v32 = vpop.xlane.xlu0 %3722  ;;  %v4526_v24 = vrot.slane %v12229_v48, %v12081_v6 }
 0x1f4   :  { %v4517_v53 = vsel %vm4348_vm8, %v4516_v4, %v4512_v29  ;;  %v4594_v23 = vrot.slane %v3720_v52, %v12049_v5  ;;  %v3952_v4 = vsel %vm282_vm0, %v3506_v1, 0.0  ;;  %v4590_v29 = vrot.slane %v12255_v45, %v12055_v30 }
 0x1f5   :  { %v4599_v45 = vrot.slane %v12265_v32, %v12088_v44  ;;  %v4575_v32 = vrot.slane %v12247_v9, %v12114_v61 }
 0x1f6   :  { %3923 = vadd.xlane.f32.xlu1 %v3922_v27  ;;  %3926 = vadd.xlane.f32.xlu0 %v3925_v55  ;;  %v3928_v55 = vsel %vm282_vm0, %v3498_v16, 0.0  ;;  %v4565_v16 = vrot.slane %v12235_v42, %v12081_v6 }
 0x1f7   :  { %v12269_v33 = vpop.xlane.xlu1 %3743  ;;  %v12271_v17 = vpop.xlane.xlu0 %3746 }
 0x1f8   :  { %v8557_v51 = vpop.f32.mrb[64].mxu0 }
 0x1f9   :  { %v2437_v50 = vpop.f32.mrb[65].mxu0 }
 0x1fa   :  { %3947 = vadd.xlane.f32.xlu1 %v3946_v56  ;;  %3950 = vadd.xlane.f32.xlu0 %v3949_v22  ;;  %v3507_v20 = vmul.f32 %v2437_v50, %v2437_v50  ;;  %v4556_v50 = vsel %vm4348_vm8, %v4555_v2, %v4551_v21  ;;  %v4522_v2 = vsel %vm4355_vm9, %v4521_v15, %v4517_v53 }
 0x1fb   :  { %v3726_v27 = vpop.xlane.xlu1 %3725  ;;  %v12283_v13 = vpop.xlane.xlu0 %3728  ;;  %v4561_v48 = vsel %vm4355_vm9, %v4560_v19, %v4556_v50  ;;  %v4527_v52 = vsel %vm4362_vm10, %v4526_v24, %v4522_v2  ;;  %v4595_v19 = vsel %vm4348_vm8, %v4594_v23, %v4590_v29  ;;  %v4633_v53 = vrot.slane %v12269_v33, %v12049_v5 }
 0x1fc   :  { %v8560_v56 = vpop.f32.mrb[66].mxu0  ;;  %v3955_v22 = vsel %vm282_vm0, %v3507_v20, 0.0  ;;  %v3508_v20 = vmul.f32 %v8557_v51, %v8557_v51  ;;  %v4570_v51 = vrot.slane %v12237_v47, %v12117_v60  ;;  %v4566_v15 = vsel %vm4362_vm10, %v4565_v16, %v4561_v48 }
 0x1fd   :  { %v12295_v41 = vpop.f32.mrb[67].mxu0  ;;  %v4536_v16 = vrot.slane %v12241_v59, %v12114_v61  ;;  %v4629_v33 = vrot.slane %v12261_v39, %v12055_v30  ;;  %v4609_v9 = vrot.slane %v12283_v13, %v12117_v60  ;;  %v4541_v13 = vrot.slane %v12243_v7, %v12139_v31 }
 0x1fe   :  { %3929 = vadd.xlane.f32.xlu1 %v3928_v55  ;;  %v8585_v63 = vpop.f32.mrb[64].mxu1  ;;  %3956 = vadd.xlane.f32.xlu0 %v3955_v22  ;;  %v4531_v55 = vrot.slane %v12231_v35, %v12117_v60  ;;  %v4604_v35 = vrot.slane %v3726_v27, %v12081_v6 }
 0x1ff   :  { %v3750_v12 = vpop.xlane.xlu1 %3749  ;;  %v12300_v36 = vpop.xlane.xlu0 %3752  ;;  %v3516_v47 = vmul.f32 %v8585_v63, %v8585_v63  ;;  %v4571_v63 = vsel %vm4369_vm11, %v4570_v51, %v4566_v15  ;;  %v4634_v59 = vsel %vm4348_vm8, %v4633_v53, %v4629_v33 }
 0x200   :  { %v2566_v21 = vpop.f32.mrb[65].mxu1  ;;  %v12307_v42 = vpop.f32.mrb[68].mxu0  ;;  %v4532_v27 = vsel %vm4369_vm11, %v4531_v55, %v4527_v52  ;;  %v4643_v48 = vrot.slane %v3750_v12, %v12081_v6  ;;  %v4576_v12 = vsel %vm4376_vm12, %v4575_v32, %v4571_v63  ;;  %v4648_v7 = vrot.slane %v12300_v36, %v12117_v60 }
 0x201   :  { %v3515_v22 = vmul.f32 %v2566_v21, %v2566_v21  ;;  %v12314_v1 = vpop.f32.mrb[69].mxu0  ;;  %v3958_v21 = vsel %vm282_vm0, %v3508_v20, 0.0  ;;  %v4638_v20 = vrot.slane %v12271_v17, %v12088_v44  ;;  %v3510_v17 = vmul.f32 %v8560_v56, %v8560_v56 }
 0x202   :  { %3953 = vadd.xlane.f32.xlu1 %v3952_v4  ;;  %v8588_v50 = vpop.f32.mrb[66].mxu1  ;;  %v4600_v4 = vsel %vm4355_vm9, %v4599_v45, %v4595_v19  ;;  %v4537_v15 = vsel %vm4376_vm12, %v4536_v16, %v4532_v27  ;;  %v4580_v19 = vrot.slane %v12249_v14, %v12139_v31  ;;  %v4585_v56 = vrot.slane %v12259_v34, %v12136_v62 }
 0x203   :  { %v3732_v24 = vpop.xlane.xlu1 %3731  ;;  %v3735_v2 = vpop.xlane.xlu0 %3734  ;;  %v3979_v18 = vsel %vm282_vm0, %v3515_v22, 0.0  ;;  %v4605_v29 = vsel %vm4362_vm10, %v4604_v35, %v4600_v4  ;;  %v3982_v22 = vsel %vm282_vm0, %v3516_v47, 0.0  ;;  %v4546_v35 = vrot.slane %v12253_v10, %v12136_v62 }
 0x204   :  { %3980 = vadd.xlane.f32.xlu0 %v3979_v18  ;;  %v12331_v23 = vpop.f32.mrb[67].mxu1  ;;  %v4614_v52 = vrot.slane %v3732_v24, %v12114_v61  ;;  %v4639_v24 = vsel %vm4355_vm9, %v4638_v20, %v4634_v59  ;;  %v4610_v47 = vsel %vm4369_vm11, %v4609_v9, %v4605_v29  ;;  %v4619_v14 = vrot.slane %v3735_v2, %v12139_v31 }
 0x205   :  { %v3518_v34 = vmul.f32 %v8588_v50, %v8588_v50  ;;  %v3964_v63 = vsel %vm282_vm0, %v3510_v17, 0.0  ;;  %v4542_v20 = vsel %vm4383_vm13, %v4541_v13, %v4537_v15  ;;  %v4581_v2 = vsel %vm4383_vm13, %v4580_v19, %v4576_v12 }
 0x206   :  { %3959 = vadd.xlane.f32.xlu1 %v3958_v21  ;;  %v8591_v18 = vpop.f32.mrb[68].mxu1  ;;  %v12342_v39 = vpop.f32.mrb[70].mxu0  ;;  %v4644_v21 = vsel %vm4362_vm10, %v4643_v48, %v4639_v24  ;;  %v4615_v10 = vsel %vm4376_vm12, %v4614_v52, %v4610_v47  ;;  %v4547_v59 = vsel %vm4390_vm14, %v4546_v35, %v4542_v20  ;;  %v4586_v29 = vsel %vm4390_vm14, %v4585_v56, %v4581_v2 }
 0x207   :  { %v3756_v55 = vpop.xlane.xlu1 %3755  ;;  %v3759_v51 = vpop.xlane.xlu0 %3758  ;;  %v4649_v9 = vsel %vm4369_vm11, %v4648_v7, %v4644_v21  ;;  %v4620_v50 = vsel %vm4383_vm13, %v4619_v14, %v4615_v10  ;;  %v3512_v15 = vmul.f32 %v12307_v42, %v12307_v42  ;;  %v3988_v13 = vsel %vm282_vm0, %v3518_v34, 0.0 }
 0x208   :  { %v12353_v45 = vpop.f32.mrb[69].mxu1  ;;  %v12355_v53 = vpop.f32.mrb[71].mxu0  ;;  %v4653_v16 = vrot.slane %v3756_v55, %v12114_v61  ;;  %v4658_v48 = vrot.slane %v3759_v51, %v12139_v31  ;;  %v5296_v51 = vsel %vm5295_vm3, %v4547_v59, %v12216_v46  ;;  %v3509_v56 = vmul.f32 %v12295_v41, %v12295_v41 }
 0x209   :  { %v5298_v35 = vsel %vm5297_vm4, %v4586_v29, %v5296_v51  ;;  %v3520_v46 = vmul.f32 %v8591_v18, %v8591_v18  ;;  %v3970_v14 = vsel %vm282_vm0, %v3512_v15, 0.0  ;;  %v3517_v41 = vmul.f32 %v12331_v23, %v12331_v23 }
 0x20a   :  { %3983 = vadd.xlane.f32.xlu1 %v3982_v22  ;;  %v8594_v32 = vpop.f32.mrb[70].mxu1  ;;  %v4654_v52 = vsel %vm4376_vm12, %v4653_v16, %v4649_v9  ;;  %v3961_v34 = vsel %vm282_vm0, %v3509_v56, 0.0  ;;  %v3514_v18 = vmul.f32 %v12342_v39, %v12342_v39  ;;  %v3511_v23 = vmul.f32 %v12314_v1, %v12314_v1 }
 0x20b   :  { %v3738_v33 = vpop.xlane.xlu1 %3737  ;;  %v3765_v27 = vpop.xlane.xlu0 %3764  ;;  %v4659_v19 = vsel %vm4383_vm13, %v4658_v48, %v4654_v52  ;;  %v3985_v48 = vsel %vm282_vm0, %v3517_v41, 0.0 }
 0x20c   :  { %v4624_v36 = vrot.slane %v3738_v33, %v12136_v62  ;;  %v12372_v4 = vpop.f32.mrb[71].mxu1  ;;  %v4668_v16 = vrot.slane %v3765_v27, %v12055_v30  ;;  %v3994_v27 = vsel %vm282_vm0, %v3520_v46, 0.0 }
 0x20e   :  { %3965 = vadd.xlane.f32.xlu1 %v3964_v63  ;;  %v4625_v55 = vsel %vm4390_vm14, %v4624_v36, %v4620_v50 }
 0x20f   :  { %v3762_v17 = vpop.xlane.xlu1 %3761  ;;  %v3789_v22 = vpop.xlane.xlu0 %3788  ;;  %v5300_v42 = vsel %vm5299_vm5, %v4625_v55, %v5298_v35 }
 0x210   :  { %v4663_v12 = vrot.slane %v3762_v17, %v12136_v62  ;;  %v4707_v2 = vrot.slane %v3789_v22, %v12055_v30  ;;  %v3522_v17 = vmul.f32 %v8594_v32, %v8594_v32  ;;  %v3976_v22 = vsel %vm282_vm0, %v3514_v18, 0.0 }
 0x212   :  { %3989 = vadd.xlane.f32.xlu1 %v3988_v13  ;;  %v4664_v24 = vsel %vm4390_vm14, %v4663_v12, %v4659_v19  ;;  %v3519_v12 = vmul.f32 %v12353_v45, %v12353_v45  ;;  %v3967_v19 = vsel %vm282_vm0, %v3511_v23, 0.0 }
 0x213   :  { %v3768_v7 = vpop.xlane.xlu1 %3767  ;;  %v3771_v47 = vpop.xlane.xlu0 %3770  ;;  %v5302_v21 = vsel %vm5301_vm6, %v4664_v24, %v5300_v42 }
 0x214   :  { %v4672_v10 = vrot.slane %v3768_v7, %v12049_v5  ;;  %v5320_v33 = vsel %vm282_vm0, %v5302_v21, 0.0  ;;  %v4677_v63 = vrot.slane %v3771_v47, %v12088_v44  ;;  %v4000_v47 = vsel %vm282_vm0, %v3522_v17, 0.0 }
 0x215   :  { %5321 = vadd.xlane.f32.xlu0 %v5320_v33  ;;  %v3991_v33 = vsel %vm282_vm0, %v3519_v12, 0.0 }
 0x216   :  { %3971 = vadd.xlane.f32.xlu1 %v3970_v14  ;;  %v4673_v59 = vsel %vm4348_vm8, %v4672_v10, %v4668_v16  ;;  %v3513_v10 = vmul.f32 %v12355_v53, %v12355_v53 }
 0x217   :  { %v3792_v20 = vpop.xlane.xlu1 %3791  ;;  %v3795_v36 = vpop.xlane.xlu0 %3794  ;;  %v4678_v50 = vsel %vm4355_vm9, %v4677_v63, %v4673_v59 }
 0x218   :  { %v4711_v9 = vrot.slane %v3792_v20, %v12049_v5  ;;  %v4716_v39 = vrot.slane %v3795_v36, %v12088_v44 }
 0x219   :  { %3962 = vadd.xlane.f32.xlu0 %v3961_v34 }
 0x21a   :  { %3995 = vadd.xlane.f32.xlu1 %v3994_v27  ;;  %v8613_v29 = vpop.f32.mrb[72].mxu0  ;;  %v4712_v15 = vsel %vm4348_vm8, %v4711_v9, %v4707_v2 }
 0x21b   :  { %v3774_v52 = vpop.xlane.xlu1 %3773  ;;  %v3777_v55 = vpop.xlane.xlu0 %3776  ;;  %v4717_v32 = vsel %vm4355_vm9, %v4716_v39, %v4712_v15  ;;  %v3524_v7 = vmul.f32 %v8613_v29, %v8613_v29  ;;  %v3973_v29 = vsel %vm282_vm0, %v3513_v10, 0.0 }
 0x21c   :  { %v4682_v13 = vrot.slane %v3774_v52, %v12081_v6  ;;  %v2695_v51 = vpop.f32.mrb[73].mxu0  ;;  %v4687_v16 = vrot.slane %v3777_v55, %v12117_v60 }
 0x21d   :  { %3986 = vadd.xlane.f32.xlu0 %v3985_v48  ;;  %v4006_v18 = vsel %vm282_vm0, %v3524_v7, 0.0  ;;  %v3521_v48 = vmul.f32 %v12372_v4, %v12372_v4 }
 0x21e   :  { %v4683_v1 = vsel %vm4362_vm10, %v4682_v13, %v4678_v50  ;;  %3977 = vadd.xlane.f32.xlu1 %v3976_v22  ;;  %v8641_v35 = vpop.f32.mrb[72].mxu1  ;;  %v8616_v56 = vpop.f32.mrb[74].mxu0 }
 0x21f   :  { %v3798_v24 = vpop.xlane.xlu1 %3797  ;;  %v3801_v42 = vpop.xlane.xlu0 %3800  ;;  %v3532_v36 = vmul.f32 %v8641_v35, %v8641_v35  ;;  %v4688_v9 = vsel %vm4369_vm11, %v4687_v16, %v4683_v1  ;;  %v3526_v17 = vmul.f32 %v8616_v56, %v8616_v56  ;;  %v3523_v35 = vmul.f32 %v2695_v51, %v2695_v51 }
 0x220   :  { %v4721_v21 = vrot.slane %v3798_v24, %v12081_v6  ;;  %v2824_v46 = vpop.f32.mrb[73].mxu1  ;;  %v2705_v14 = vpop.f32.mrb[75].mxu0  ;;  %v4726_v23 = vrot.slane %v3801_v42, %v12117_v60 }
 0x221   :  { %3968 = vadd.xlane.f32.xlu0 %v3967_v19  ;;  %v4030_v22 = vsel %vm282_vm0, %v3532_v36, 0.0 }
 0x222   :  { %v4722_v45 = vsel %vm4362_vm10, %v4721_v21, %v4717_v32  ;;  %4001 = vadd.xlane.f32.xlu1 %v4000_v47  ;;  %v8644_v41 = vpop.f32.mrb[74].mxu1  ;;  %v8619_v34 = vpop.f32.mrb[76].mxu0  ;;  %v3997_v32 = vsel %vm282_vm0, %v3521_v48, 0.0  ;;  %v4012_v47 = vsel %vm282_vm0, %v3526_v17, 0.0 }
 0x223   :  { %v3780_v63 = vpop.xlane.xlu1 %3779  ;;  %v3783_v20 = vpop.xlane.xlu0 %3782  ;;  %v4727_v12 = vsel %vm4369_vm11, %v4726_v23, %v4722_v45  ;;  %v3534_v7 = vmul.f32 %v8644_v41, %v8644_v41  ;;  %v3528_v41 = vmul.f32 %v8619_v34, %v8619_v34 }
 0x224   :  { %v4692_v27 = vrot.slane %v3780_v63, %v12114_v61  ;;  %v2834_v2 = vpop.f32.mrb[75].mxu1  ;;  %v12431_v59 = vpop.f32.mrb[77].mxu0  ;;  %v4697_v4 = vrot.slane %v3783_v20, %v12139_v31  ;;  %v4003_v63 = vsel %vm282_vm0, %v3523_v35, 0.0 }
 0x225   :  { %3992 = vadd.xlane.f32.xlu0 %v3991_v33  ;;  %v3531_v33 = vmul.f32 %v2824_v46, %v2824_v46  ;;  %v4018_v34 = vsel %vm282_vm0, %v3528_v41, 0.0 }
 0x226   :  { %v4693_v53 = vsel %vm4376_vm12, %v4692_v27, %v4688_v9  ;;  %4007 = vadd.xlane.f32.xlu1 %v4006_v18  ;;  %v8647_v50 = vpop.f32.mrb[76].mxu1  ;;  %v8622_v39 = vpop.f32.mrb[78].mxu0  ;;  %v4036_v18 = vsel %vm282_vm0, %v3534_v7, 0.0 }
 0x227   :  { %v3804_v52 = vpop.xlane.xlu1 %3803  ;;  %v3807_v55 = vpop.xlane.xlu0 %3806  ;;  %v4698_v45 = vsel %vm4383_vm13, %v4697_v4, %v4693_v53  ;;  %v3525_v53 = vmul.f32 %v2705_v14, %v2705_v14  ;;  %v4027_v48 = vsel %vm282_vm0, %v3531_v33, 0.0  ;;  %v3530_v35 = vmul.f32 %v8622_v39, %v8622_v39 }
 0x228   :  { %v4731_v15 = vrot.slane %v3804_v52, %v12114_v61  ;;  %v12441_v13 = vpop.f32.mrb[77].mxu1  ;;  %v12443_v1 = vpop.f32.mrb[79].mxu0  ;;  %v4736_v10 = vrot.slane %v3807_v55, %v12139_v31  ;;  %v3536_v55 = vmul.f32 %v8647_v50, %v8647_v50 }
 0x229   :  { %3974 = vadd.xlane.f32.xlu0 %v3973_v29  ;;  %v4009_v14 = vsel %vm282_vm0, %v3525_v53, 0.0  ;;  %v4024_v33 = vsel %vm282_vm0, %v3530_v35, 0.0  ;;  %v3535_v41 = vmul.f32 %v12441_v13, %v12441_v13 }
 0x22a   :  { %v4732_v19 = vsel %vm4376_vm12, %v4731_v15, %v4727_v12  ;;  %4031 = vadd.xlane.f32.xlu1 %v4030_v22  ;;  %v8650_v56 = vpop.f32.mrb[78].mxu1  ;;  %v3533_v15 = vmul.f32 %v2834_v2, %v2834_v2  ;;  %v3527_v2 = vmul.f32 %v12431_v59, %v12431_v59 }
 0x22b   :  { %v3786_v24 = vpop.xlane.xlu1 %3785  ;;  %v3813_v42 = vpop.xlane.xlu0 %3812  ;;  %v4737_v9 = vsel %vm4383_vm13, %v4736_v10, %v4732_v19 }
 0x22c   :  { %v4702_v21 = vrot.slane %v3786_v24, %v12136_v62  ;;  %v12451_v16 = vpop.f32.mrb[79].mxu1  ;;  %v4746_v17 = vrot.slane %v3813_v42, %v12055_v30  ;;  %v4033_v7 = vsel %vm282_vm0, %v3533_v15, 0.0  ;;  %v3529_v15 = vmul.f32 %v12443_v1, %v12443_v1 }
 0x22d   :  { %3998 = vadd.xlane.f32.xlu0 %v3997_v32  ;;  %v4042_v32 = vsel %vm282_vm0, %v3536_v55, 0.0 }
 0x22e   :  { %v4703_v51 = vsel %vm4390_vm14, %v4702_v21, %v4698_v45  ;;  %4013 = vadd.xlane.f32.xlu1 %v4012_v47 }
 0x22f   :  { %v3810_v20 = vpop.xlane.xlu1 %3809  ;;  %v3837_v36 = vpop.xlane.xlu0 %3836 }
 0x230   :  { %v4741_v27 = vrot.slane %v3810_v20, %v12136_v62  ;;  %v4785_v50 = vrot.slane %v3837_v36, %v12055_v30 }
 0x231   :  { %4004 = vadd.xlane.f32.xlu0 %v4003_v63 }
 0x232   :  { %v4742_v23 = vsel %vm4390_vm14, %v4741_v27, %v4737_v9  ;;  %4037 = vadd.xlane.f32.xlu1 %v4036_v18  ;;  %v4015_v18 = vsel %vm282_vm0, %v3527_v2, 0.0 }
 0x233   :  { %v12463_v46 = vsel %vm5289_vm15, %v4742_v23, %v4703_v51  ;;  %v3816_v29 = vpop.xlane.xlu1 %3815  ;;  %v3819_v52 = vpop.xlane.xlu0 %3818  ;;  %v3538_v51 = vmul.f32 %v8650_v56, %v8650_v56 }
 0x234   :  { %v4750_v22 = vrot.slane %v3816_v29, %v12049_v5  ;;  %v4755_v12 = vrot.slane %v3819_v52, %v12088_v44 }
 0x235   :  { %4028 = vadd.xlane.f32.xlu0 %v4027_v48  ;;  %v4048_v29 = vsel %vm282_vm0, %v3538_v51, 0.0 }
 0x236   :  { %4019 = vadd.xlane.f32.xlu1 %v4018_v34  ;;  %v4751_v24 = vsel %vm4348_vm8, %v4750_v22, %v4746_v17 }
 0x237   :  { %v3840_v4 = vpop.xlane.xlu1 %3839  ;;  %v3843_v19 = vpop.xlane.xlu0 %3842  ;;  %v4756_v21 = vsel %vm4355_vm9, %v4755_v12, %v4751_v24 }
 0x238   :  { %v4789_v42 = vrot.slane %v3840_v4, %v12049_v5  ;;  %v4794_v39 = vrot.slane %v3843_v19, %v12088_v44 }
 0x239   :  { %4010 = vadd.xlane.f32.xlu0 %v4009_v14  ;;  %v4039_v14 = vsel %vm282_vm0, %v3535_v41, 0.0 }
 0x23a   :  { %4043 = vadd.xlane.f32.xlu1 %v4042_v32  ;;  %v8669_v47 = vpop.f32.mrb[80].mxu0  ;;  %v4790_v63 = vsel %vm4348_vm8, %v4789_v42, %v4785_v50 }
 0x23b   :  { %v3822_v45 = vpop.xlane.xlu1 %3821  ;;  %v3825_v10 = vpop.xlane.xlu0 %3824  ;;  %v4795_v56 = vsel %vm4355_vm9, %v4794_v39, %v4790_v63  ;;  %v3540_v48 = vmul.f32 %v8669_v47, %v8669_v47  ;;  %v4021_v39 = vsel %vm282_vm0, %v3529_v15, 0.0 }
 0x23c   :  { %v4760_v20 = vrot.slane %v3822_v45, %v12081_v6  ;;  %v2953_v36 = vpop.f32.mrb[81].mxu0  ;;  %v4765_v13 = vrot.slane %v3825_v10, %v12117_v60 }
 0x23d   :  { %4034 = vadd.xlane.f32.xlu0 %v4033_v7  ;;  %v4054_v24 = vsel %vm282_vm0, %v3540_v48, 0.0 }
 0x23e   :  { %v4761_v59 = vsel %vm4362_vm10, %v4760_v20, %v4756_v21  ;;  %4025 = vadd.xlane.f32.xlu1 %v4024_v33  ;;  %v8697_v27 = vpop.f32.mrb[80].mxu1  ;;  %v8672_v9 = vpop.f32.mrb[82].mxu0  ;;  %v3537_v21 = vmul.f32 %v12451_v16, %v12451_v16 }
 0x23f   :  { %v3846_v23 = vpop.xlane.xlu1 %3845  ;;  %v3849_v53 = vpop.xlane.xlu0 %3848  ;;  %v3548_v50 = vmul.f32 %v8697_v27, %v8697_v27  ;;  %v4766_v47 = vsel %vm4369_vm11, %v4765_v13, %v4761_v59  ;;  %v3542_v63 = vmul.f32 %v8672_v9, %v8672_v9 }
 0x240   :  { %v4799_v52 = vrot.slane %v3846_v23, %v12081_v6  ;;  %v4804_v55 = vrot.slane %v3849_v53, %v12117_v60  ;;  %v3082_v34 = vpop.f32.mrb[81].mxu1  ;;  %v2963_v17 = vpop.f32.mrb[83].mxu0  ;;  %v4045_v23 = vsel %vm282_vm0, %v3537_v21, 0.0 }
 0x241   :  { %4016 = vadd.xlane.f32.xlu0 %v4015_v18  ;;  %v4078_v20 = vsel %vm282_vm0, %v3548_v50, 0.0 }
 0x242   :  { %v4800_v22 = vsel %vm4362_vm10, %v4799_v52, %v4795_v56  ;;  %4049 = vadd.xlane.f32.xlu1 %v4048_v29  ;;  %v8700_v12 = vpop.f32.mrb[82].mxu1  ;;  %v8675_v4 = vpop.f32.mrb[84].mxu0  ;;  %v3539_v56 = vmul.f32 %v2953_v36, %v2953_v36  ;;  %v4060_v52 = vsel %vm282_vm0, %v3542_v63, 0.0 }
 0x243   :  { %v4805_v19 = vsel %vm4369_vm11, %v4804_v55, %v4800_v22  ;;  %v3828_v35 = vpop.xlane.xlu1 %3827  ;;  %v3831_v32 = vpop.xlane.xlu0 %3830  ;;  %v3550_v9 = vmul.f32 %v8700_v12, %v8700_v12  ;;  %v3544_v50 = vmul.f32 %v8675_v4, %v8675_v4 }
 0x244   :  { %v4770_v42 = vrot.slane %v3828_v35, %v12114_v61  ;;  %v3092_v2 = vpop.f32.mrb[83].mxu1  ;;  %v2973_v7 = vpop.f32.mrb[85].mxu0  ;;  %v4775_v27 = vrot.slane %v3831_v32, %v12139_v31 }
 0x245   :  { %4040 = vadd.xlane.f32.xlu0 %v4039_v14  ;;  %v3547_v14 = vmul.f32 %v3082_v34, %v3082_v34  ;;  %v3541_v34 = vmul.f32 %v2963_v17, %v2963_v17  ;;  %v3549_v63 = vmul.f32 %v3092_v2, %v3092_v2 }
 0x246   :  { %v4771_v1 = vsel %vm4376_vm12, %v4770_v42, %v4766_v47  ;;  %4055 = vadd.xlane.f32.xlu1 %v4054_v24  ;;  %v8703_v45 = vpop.f32.mrb[84].mxu1  ;;  %v8678_v10 = vpop.f32.mrb[86].mxu0  ;;  %v4084_v24 = vsel %vm282_vm0, %v3550_v9, 0.0 }
 0x247   :  { %v3852_v51 = vpop.xlane.xlu1 %3851  ;;  %v3855_v33 = vpop.xlane.xlu0 %3854  ;;  %v4776_v22 = vsel %vm4383_vm13, %v4775_v27, %v4771_v1  ;;  %v4075_v21 = vsel %vm282_vm0, %v3547_v14, 0.0  ;;  %v3552_v4 = vmul.f32 %v8703_v45, %v8703_v45  ;;  %v3546_v27 = vmul.f32 %v8678_v10, %v8678_v10 }
 0x248   :  { %v4809_v41 = vrot.slane %v3852_v51, %v12114_v61  ;;  %v3102_v18 = vpop.f32.mrb[85].mxu1  ;;  %v12505_v59 = vpop.f32.mrb[87].mxu0  ;;  %v4814_v15 = vrot.slane %v3855_v33, %v12139_v31  ;;  %v4066_v33 = vsel %vm282_vm0, %v3544_v50, 0.0 }
 0x249   :  { %4022 = vadd.xlane.f32.xlu0 %v4021_v39 }
 0x24a   :  { %v4810_v16 = vsel %vm4376_vm12, %v4809_v41, %v4805_v19  ;;  %4079 = vadd.xlane.f32.xlu1 %v4078_v20  ;;  %v8706_v53 = vpop.f32.mrb[86].mxu1  ;;  %v4051_v19 = vsel %vm282_vm0, %v3539_v56, 0.0  ;;  %v4057_v20 = vsel %vm282_vm0, %v3541_v34, 0.0  ;;  %v3543_v56 = vmul.f32 %v2973_v7, %v2973_v7 }
 0x24b   :  { %v3834_v48 = vpop.xlane.xlu1 %3833  ;;  %v12510_v29 = vpop.xlane.xlu0 %3860  ;;  %v4815_v47 = vsel %vm4383_vm13, %v4814_v15, %v4810_v16  ;;  %v4090_v16 = vsel %vm282_vm0, %v3552_v4, 0.0  ;;  %v3554_v2 = vmul.f32 %v8706_v53, %v8706_v53  ;;  %v3545_v53 = vmul.f32 %v12505_v59, %v12505_v59 }
 0x24c   :  { %v4780_v55 = vrot.slane %v3834_v48, %v12136_v62  ;;  %v12514_v13 = vpop.f32.mrb[87].mxu1  ;;  %v4063_v10 = vsel %vm282_vm0, %v3543_v56, 0.0 }
 0x24d   :  { %4046 = vadd.xlane.f32.xlu0 %v4045_v23  ;;  %v4081_v23 = vsel %vm282_vm0, %v3549_v63, 0.0  ;;  %v3553_v63 = vmul.f32 %v12514_v13, %v12514_v13  ;;  %v4069_v59 = vsel %vm282_vm0, %v3545_v53, 0.0 }
 0x24e   :  { %v4781_v36 = vsel %vm4390_vm14, %v4780_v55, %v4776_v22  ;;  %4061 = vadd.xlane.f32.xlu1 %v4060_v52  ;;  %v4072_v52 = vsel %vm282_vm0, %v3546_v27, 0.0  ;;  %v3551_v22 = vmul.f32 %v3102_v18, %v3102_v18 }
 0x24f   :  { %v5304_v12 = vsel %vm5291_vm1, %v4781_v36, %v12463_v46  ;;  %v3858_v35 = vpop.xlane.xlu1 %3857  ;;  %v12522_v32 = vpop.xlane.xlu0 %3884  ;;  %v4093_v13 = vsel %vm282_vm0, %v3553_v63, 0.0 }
 0x250   :  { %v4819_v42 = vrot.slane %v3858_v35, %v12136_v62  ;;  %v4087_v18 = vsel %vm282_vm0, %v3551_v22, 0.0 }
 0x251   :  { %4052 = vadd.xlane.f32.xlu0 %v4051_v19 }
 0x252   :  { %v4820_v1 = vsel %vm4390_vm14, %v4819_v42, %v4815_v47  ;;  %4085 = vadd.xlane.f32.xlu1 %v4084_v24 }
 0x253   :  { %v12530_v39 = vsel %vm5293_vm2, %v4820_v1, %v5304_v12  ;;  %v12532_v46 = vpop.xlane.xlu1 %3863  ;;  %v12534_v51 = vpop.xlane.xlu0 %3866  ;;  %v4096_v12 = vsel %vm282_vm0, %v3554_v2, 0.0 }
 0x255   :  { %4076 = vadd.xlane.f32.xlu0 %v4075_v21 }
 0x256   :  { %4067 = vadd.xlane.f32.xlu1 %v4066_v33 }
 0x257   :  { %v12538_v41 = vpop.xlane.xlu1 %3887  ;;  %v12540_v17 = vpop.xlane.xlu0 %3890 }
 0x259   :  { %4058 = vadd.xlane.f32.xlu0 %v4057_v20 }
 0x25a   :  { %4091 = vadd.xlane.f32.xlu1 %v4090_v16  ;;  %v8725_v45 = vpop.f32.mrb[88].mxu0 }
 0x25b   :  { %v12544_v48 = vpop.xlane.xlu1 %3869  ;;  %v12546_v9 = vpop.xlane.xlu0 %3872  ;;  %v3556_v19 = vmul.f32 %v8725_v45, %v8725_v45 }
 0x25c   :  { %v3211_v55 = vpop.f32.mrb[89].mxu0 }
 0x25d   :  { %4082 = vadd.xlane.f32.xlu0 %v4081_v23  ;;  %v4102_v21 = vsel %vm282_vm0, %v3556_v19, 0.0  ;;  %v3555_v22 = vmul.f32 %v3211_v55, %v3211_v55 }
 0x25e   :  { %4073 = vadd.xlane.f32.xlu1 %v4072_v52  ;;  %v8753_v15 = vpop.f32.mrb[88].mxu1  ;;  %v8728_v36 = vpop.f32.mrb[90].mxu0 }
 0x25f   :  { %v12550_v7 = vpop.xlane.xlu1 %3893  ;;  %v12552_v14 = vpop.xlane.xlu0 %3896  ;;  %v3564_v34 = vmul.f32 %v8753_v15, %v8753_v15  ;;  %v3558_v23 = vmul.f32 %v8728_v36, %v8728_v36 }
 0x260   :  { %v3340_v35 = vpop.f32.mrb[89].mxu1  ;;  %v3221_v50 = vpop.f32.mrb[91].mxu0 }
 0x261   :  { %4064 = vadd.xlane.f32.xlu0 %v4063_v10  ;;  %v4126_v45 = vsel %vm282_vm0, %v3564_v34, 0.0  ;;  %v4108_v53 = vsel %vm282_vm0, %v3558_v23, 0.0  ;;  %v3563_v36 = vmul.f32 %v3340_v35, %v3340_v35  ;;  %v4099_v34 = vsel %vm282_vm0, %v3555_v22, 0.0 }
 0x262   :  { %4097 = vadd.xlane.f32.xlu1 %v4096_v12  ;;  %v8756_v24 = vpop.f32.mrb[90].mxu1  ;;  %v8731_v42 = vpop.f32.mrb[92].mxu0 }
 0x263   :  { %v12558_v47 = vpop.xlane.xlu1 %3875  ;;  %v12560_v1 = vpop.xlane.xlu0 %3878  ;;  %v3566_v12 = vmul.f32 %v8756_v24, %v8756_v24  ;;  %v3560_v63 = vmul.f32 %v8731_v42, %v8731_v42  ;;  %v4123_v24 = vsel %vm282_vm0, %v3563_v36, 0.0 }
 0x264   :  { %v3350_v4 = vpop.f32.mrb[91].mxu1  ;;  %v3231_v33 = vpop.f32.mrb[93].mxu0 }
 0x265   :  { %4088 = vadd.xlane.f32.xlu0 %v4087_v18  ;;  %v4114_v35 = vsel %vm282_vm0, %v3560_v63, 0.0  ;;  %v3565_v22 = vmul.f32 %v3350_v4, %v3350_v4 }
 0x266   :  { %4103 = vadd.xlane.f32.xlu1 %v4102_v21  ;;  %v8759_v20 = vpop.f32.mrb[92].mxu1  ;;  %v8734_v27 = vpop.f32.mrb[94].mxu0 }
 0x267   :  { %v12566_v16 = vpop.xlane.xlu1 %3899  ;;  %v12568_v56 = vpop.xlane.xlu0 %3902  ;;  %v4129_v36 = vsel %vm282_vm0, %v3565_v22, 0.0  ;;  %v4867_v22 = vrot.slane %v12538_v41, %v12049_v5 }
 0x268   :  { %v3360_v2 = vpop.f32.mrb[93].mxu1  ;;  %v12571_v52 = vpop.f32.mrb[95].mxu0 }
 0x269   :  { %4070 = vadd.xlane.f32.xlu0 %v4069_v59  ;;  %v4132_v59 = vsel %vm282_vm0, %v3566_v12, 0.0  ;;  %v3562_v12 = vmul.f32 %v8734_v27, %v8734_v27 }
 0x26a   :  { %4127 = vadd.xlane.f32.xlu1 %v4126_v45  ;;  %v8762_v10 = vpop.f32.mrb[94].mxu1  ;;  %v3557_v45 = vmul.f32 %v3221_v50, %v3221_v50 }
 0x26b   :  { %v12574_v15 = vpop.xlane.xlu1 %3881  ;;  %v12576_v19 = vpop.xlane.xlu0 %3908  ;;  %v3570_v63 = vmul.f32 %v8762_v10, %v8762_v10  ;;  %v4120_v4 = vsel %vm282_vm0, %v3562_v12, 0.0  ;;  %v4863_v10 = vrot.slane %v12522_v32, %v12055_v30  ;;  %v9376_v32 = vld [vmem:[%s14000_s2 + $0x350] sm:$0xff] }
 0x26c   :  { %v12579_v18 = vpop.f32.mrb[95].mxu1  ;;  %v5435_v41 = vmul.f32 %v9376_v32, %v9376_v32 }
 0x26d   :  { %4094 = vadd.xlane.f32.xlu0 %v4093_v13  ;;  %v3568_v13 = vmul.f32 %v8759_v20, %v8759_v20 }
 0x26e   :  { %4109 = vadd.xlane.f32.xlu1 %v4108_v53  ;;  %v4105_v53 = vsel %vm282_vm0, %v3557_v45, 0.0  ;;  %v9374_v45 = vld [vmem:[%s14000_s2 + $0x270] sm:$0xff] }
 0x26f   :  { %v12582_v21 = vpop.xlane.xlu1 %3905  ;;  %v12584_v55 = vpop.xlane.xlu0 %3932  ;;  %v4138_v50 = vsel %vm282_vm0, %v3568_v13, 0.0  ;;  %v5407_v27 = vmul.f32 %v9374_v45, %v9374_v45  ;;  %v3567_v13 = vmul.f32 %v3360_v2, %v3360_v2  ;;  %v4902_v2 = vrot.slane %v12576_v19, %v12055_v30 }
 0x271   :  { %4100 = vadd.xlane.f32.xlu0 %v4099_v34  ;;  %v3559_v34 = vmul.f32 %v3231_v33, %v3231_v33  ;;  %v4828_v33 = vrot.slane %v12532_v46, %v12049_v5  ;;  %v5755_v45 = vsel %vm282_vm0, %v5407_v27, 0.0  ;;  %v4135_v32 = vsel %vm282_vm0, %v3567_v13, 0.0  ;;  %v9377_v27 = vld [vmem:[%s14000_s2 + $0x2a8] sm:$0xff] }
 0x272   :  { %4133 = vadd.xlane.f32.xlu1 %v4132_v59  ;;  %v5839_v13 = vsel %vm282_vm0, %v5435_v41, 0.0  ;;  %v4843_v41 = vrot.slane %v12546_v9, %v12117_v60 }
 0x273   :  { %v3912_v23 = vpop.xlane.xlu1 %3911  ;;  %v12588_v28 = vpop.xlane.xlu0 %3914 }
 0x275   :  { %4124 = vadd.xlane.f32.xlu0 %v4123_v24  ;;  %v4824_v24 = vrot.slane %v12510_v29, %v12055_v30  ;;  %v9375_v29 = vld [vmem:[%s14000_s2 + $0x2e0] sm:$0xff] }
 0x276   :  { %4115 = vadd.xlane.f32.xlu1 %v4114_v35  ;;  %v4111_v35 = vsel %vm282_vm0, %v3559_v34, 0.0  ;;  %v5421_v46 = vmul.f32 %v9375_v29, %v9375_v29  ;;  %v4906_v34 = vrot.slane %v3912_v23, %v12049_v5  ;;  %v4872_v23 = vrot.slane %v12540_v17, %v12088_v44 }
 0x277   :  { %v3936_v38 = vpop.xlane.xlu1 %3935  ;;  %v12592_v42 = vpop.xlane.xlu0 %3938  ;;  %v4829_v19 = vsel %vm4348_vm8, %v4828_v33, %v4824_v24  ;;  %v3561_v29 = vmul.f32 %v12571_v52, %v12571_v52  ;;  %v5414_v24 = vmul.f32 %v9377_v27, %v9377_v27  ;;  %v4838_v17 = vrot.slane %v12544_v48, %v12081_v6  ;;  %v9378_v48 = vld [vmem:[%s14000_s2 + $0x388] sm:$0xff] }
 0x278   :  { %v4907_v52 = vsel %vm4348_vm8, %v4906_v34, %v4902_v2  ;;  %v4950_v33 = vrot.slane %v12592_v42, %v12088_v44  ;;  %v3569_v34 = vmul.f32 %v12579_v18, %v12579_v18  ;;  %v4848_v18 = vrot.slane %v12558_v47, %v12114_v61 }
 0x279   :  { %4106 = vadd.xlane.f32.xlu0 %v4105_v53 }
 0x27a   :  { %4139 = vadd.xlane.f32.xlu1 %v4138_v50  ;;  %v4144_v50 = vsel %vm282_vm0, %v3570_v63, 0.0  ;;  %v4941_v63 = vrot.slane %v12584_v55, %v12055_v30  ;;  %v4911_v55 = vrot.slane %v12588_v28, %v12088_v44  ;;  %v4141_v27 = vsel %vm282_vm0, %v3569_v34, 0.0 }
 0x27b   :  { %v12596_v59 = vpop.xlane.xlu1 %3917  ;;  %v12598_v20 = vpop.xlane.xlu0 %3920 }
 0x27c   :  { %v4916_v42 = vrot.slane %v12596_v59, %v12081_v6  ;;  %v4882_v59 = vrot.slane %v12552_v14, %v12117_v60 }
 0x27d   :  { %4130 = vadd.xlane.f32.xlu0 %v4129_v36  ;;  %v4833_v36 = vrot.slane %v12534_v51, %v12088_v44  ;;  %v4868_v51 = vsel %vm4348_vm8, %v4867_v22, %v4863_v10  ;;  %v4877_v10 = vrot.slane %v12550_v7, %v12081_v6  ;;  %v4117_v7 = vsel %vm282_vm0, %v3561_v29, 0.0 }
 0x27e   :  { %4121 = vadd.xlane.f32.xlu1 %v4120_v4  ;;  %v4945_v4 = vrot.slane %v3936_v38, %v12049_v5  ;;  %v4873_v2 = vsel %vm4355_vm9, %v4872_v23, %v4868_v51  ;;  %v4887_v29 = vrot.slane %v12566_v16, %v12114_v61 }
 0x27f   :  { %v12613_v53 = vpop.xlane.xlu1 %3941  ;;  %v12615_v12 = vpop.xlane.xlu0 %3944  ;;  %v4834_v28 = vsel %vm4355_vm9, %v4833_v36, %v4829_v19  ;;  %v4912_v36 = vsel %vm4355_vm9, %v4911_v55, %v4907_v52  ;;  %v5776_v19 = vsel %vm282_vm0, %v5414_v24, 0.0  ;;  %v4878_v9 = vsel %vm4362_vm10, %v4877_v10, %v4873_v2 }
 0x280   :  { %v4946_v22 = vsel %vm4348_vm8, %v4945_v4, %v4941_v63  ;;  %v4955_v63 = vrot.slane %v12613_v53, %v12081_v6  ;;  %v4839_v23 = vsel %vm4362_vm10, %v4838_v17, %v4834_v28  ;;  %v4921_v53 = vrot.slane %v12598_v20, %v12117_v60 }
 0x281   :  { %4112 = vadd.xlane.f32.xlu0 %v4111_v35  ;;  %v5797_v35 = vsel %vm282_vm0, %v5421_v46, 0.0  ;;  %v5442_v46 = vmul.f32 %v9378_v48, %v9378_v48  ;;  %v4917_v14 = vsel %vm4362_vm10, %v4916_v42, %v4912_v36  ;;  %v4960_v47 = vrot.slane %v12615_v12, %v12117_v60 }
 0x282   :  { %4145 = vadd.xlane.f32.xlu1 %v4144_v50  ;;  %v4844_v16 = vsel %vm4369_vm11, %v4843_v41, %v4839_v23  ;;  %v4853_v20 = vrot.slane %v12560_v1, %v12139_v31  ;;  %v4883_v28 = vsel %vm4369_vm11, %v4882_v59, %v4878_v9  ;;  %v4897_v1 = vrot.slane %v12582_v21, %v12136_v62  ;;  %v9381_v9 = vld [vmem:[%s14000_s2 + $0x380] sm:$0xff] }
 0x283   :  { %v3924_v38 = vpop.xlane.xlu1 %3923  ;;  %v3927_v50 = vpop.xlane.xlu0 %3926  ;;  %v4849_v12 = vsel %vm4376_vm12, %v4848_v18, %v4844_v16  ;;  %v4888_v10 = vsel %vm4376_vm12, %v4887_v29, %v4883_v28  ;;  %v5860_v21 = vsel %vm282_vm0, %v5442_v46, 0.0  ;;  %v5441_v29 = vmul.f32 %v9381_v9, %v9381_v9 }
 0x284   :  { %v4926_v55 = vrot.slane %v3924_v38, %v12114_v61  ;;  %v4892_v38 = vrot.slane %v12568_v56, %v12139_v31  ;;  %v4931_v48 = vrot.slane %v3927_v50, %v12139_v31  ;;  %v9380_v50 = vld [vmem:[%s14000_s2 + $0x470] sm:$0xff] }
 0x285   :  { %4136 = vadd.xlane.f32.xlu0 %v4135_v32  ;;  %v9379_v32 = vld [vmem:[%s14000_s2 + $0x318] sm:$0xff]  ;;  %v5471_v36 = vmul.f32 %v9380_v50, %v9380_v50 }
 0x286   :  { %5756 = vadd.xlane.f32.xlu1 %v5755_v45  ;;  %v4951_v45 = vsel %vm4355_vm9, %v4950_v33, %v4946_v22  ;;  %v5428_v51 = vmul.f32 %v9379_v32, %v9379_v32  ;;  %v4922_v22 = vsel %vm4369_vm11, %v4921_v53, %v4917_v14 }
 0x287   :  { %v3948_v4 = vpop.xlane.xlu1 %3947  ;;  %v4956_v24 = vsel %vm4362_vm10, %v4955_v63, %v4951_v45  ;;  %v3951_v52 = vpop.xlane.xlu0 %3950  ;;  %v4927_v42 = vsel %vm4376_vm12, %v4926_v55, %v4922_v22  ;;  %v4893_v63 = vsel %vm4383_vm13, %v4892_v38, %v4888_v10  ;;  %v5947_v14 = vsel %vm282_vm0, %v5471_v36, 0.0  ;;  %v9388_v36 = vld [vmem:[%s14000_s2 + $0x580] sm:$0xff] }
 0x288   :  { %v4965_v17 = vrot.slane %v3948_v4, %v12114_v61  ;;  %v4961_v2 = vsel %vm4369_vm11, %v4960_v47, %v4956_v24  ;;  %v4970_v34 = vrot.slane %v3951_v52, %v12139_v31  ;;  %v4932_v59 = vsel %vm4383_vm13, %v4931_v48, %v4927_v42  ;;  %v9386_v42 = vld [vmem:[%s14000_s2 + $0x518] sm:$0xff] }
 0x289   :  { %4118 = vadd.xlane.f32.xlu0 %v4117_v7  ;;  %v5818_v45 = vsel %vm282_vm0, %v5428_v51, 0.0 }
 0x28a   :  { %5798 = vadd.xlane.f32.xlu1 %v5797_v35  ;;  %v4858_v35 = vrot.slane %v12574_v15, %v12136_v62  ;;  %v4854_v15 = vsel %vm4383_vm13, %v4853_v20, %v4849_v12  ;;  %v4966_v7 = vsel %vm4376_vm12, %v4965_v17, %v4961_v2  ;;  %v9383_v17 = vld [vmem:[%s14000_s2 + $0x4e0] sm:$0xff]  ;;  %v9384_v12 = vld [vmem:[%s14000_s2 + $0x4a8] sm:$0xff] }
 0x28b   :  { %v3930_v33 = vpop.xlane.xlu1 %3929  ;;  %v4971_v18 = vsel %vm4383_vm13, %v4970_v34, %v4966_v7  ;;  %v3957_v51 = vpop.xlane.xlu0 %3956  ;;  %v5485_v52 = vmul.f32 %v9383_v17, %v9383_v17  ;;  %v5478_v38 = vmul.f32 %v9384_v12, %v9384_v12  ;;  %v5492_v34 = vmul.f32 %v9386_v42, %v9386_v42  ;;  %v9387_v7 = vld [vmem:[%s14000_s2 + $0x588] sm:$0xff] }
 0x28c   :  { %v4936_v56 = vrot.slane %v3930_v33, %v12136_v62  ;;  %v4859_v4 = vsel %vm4390_vm14, %v4858_v35, %v4854_v15 }
 0x28d   :  { %4142 = vadd.xlane.f32.xlu0 %v4141_v27  ;;  %v5306_v53 = vsel %vm5295_vm3, %v4859_v4, %v12530_v39  ;;  %v5857_v27 = vsel %vm282_vm0, %v5441_v29, 0.0  ;;  %v9382_v39 = vld [vmem:[%s14000_s2 + $0x430] sm:$0xff]  ;;  %v5989_v10 = vsel %vm282_vm0, %v5485_v52, 0.0  ;;  %v5968_v2 = vsel %vm282_vm0, %v5478_v38, 0.0  ;;  %v9390_v29 = vld [vmem:[%s14000_s2 + $0x120] sm:$0xff] }
 0x28e   :  { %5840 = vadd.xlane.f32.xlu1 %v5839_v13  ;;  %v4898_v13 = vsel %vm4390_vm14, %v4897_v1, %v4893_v63  ;;  %v4937_v46 = vsel %vm4390_vm14, %v4936_v56, %v4932_v59  ;;  %v5463_v20 = vmul.f32 %v9382_v39, %v9382_v39  ;;  %v9385_v1 = vld [vmem:[%s14000_s2 + $0x550] sm:$0xff]  ;;  %v6010_v50 = vsel %vm282_vm0, %v5492_v34, 0.0 }
 0x28f   :  { %v3954_v41 = vpop.xlane.xlu1 %3953  ;;  %v5307_v47 = vsel %vm5297_vm4, %v4898_v13, %v5306_v53  ;;  %v5499_v22 = vmul.f32 %v9385_v1, %v9385_v1  ;;  %v5505_v63 = vmul.f32 %v9388_v36, %v9388_v36  ;;  %v9389_v13 = vld [vmem:[%s14000_s2 + $0x158] sm:$0xff]  ;;  %v5365_v53 = vmul.f32 %v9390_v29, %v9390_v29 }
 0x290   :  { %v4975_v23 = vrot.slane %v3954_v41, %v12136_v62  ;;  %v5308_v55 = vsel %vm5299_vm5, %v4937_v46, %v5307_v47  ;;  %v5923_v28 = vsel %vm282_vm0, %v5463_v20, 0.0  ;;  %v5506_v41 = vmul.f32 %v9387_v7, %v9387_v7  ;;  %v9394_v7 = vld [vmem:[%s14000_s2 + $0x1c8] sm:$0xff] }
 0x291   :  { %5777 = vadd.xlane.f32.xlu0 %v5776_v19  ;;  %v3981_v48 = vpop.xlane.xlu0 %3980  ;;  %v6031_v15 = vsel %vm282_vm0, %v5499_v22, 0.0  ;;  %v5372_v59 = vmul.f32 %v9389_v13, %v9389_v13  ;;  %v4980_v46 = vrot.slane %v3957_v51, %v12055_v30  ;;  %v6049_v9 = vsel %vm282_vm0, %v5505_v63, 0.0 }
 0x292   :  { %5861 = vadd.xlane.f32.xlu1 %v5860_v21  ;;  %v4976_v19 = vsel %vm4390_vm14, %v4975_v23, %v4971_v18  ;;  %v6052_v23 = vsel %vm282_vm0, %v5506_v41, 0.0  ;;  %v5019_v39 = vrot.slane %v3981_v48, %v12055_v30  ;;  %v5629_v52 = vsel %vm282_vm0, %v5365_v53, 0.0 }
 0x293   :  { %v3960_v32 = vpop.xlane.xlu1 %3959  ;;  %v5309_v16 = vsel %vm5301_vm6, %v4976_v19, %v5308_v55  ;;  %v5650_v47 = vsel %vm282_vm0, %v5372_v59, 0.0  ;;  %v5386_v41 = vmul.f32 %v9394_v7, %v9394_v7 }
 0x294   :  { %v5323_v33 = vsel %vm282_vm0, %v5309_v16, 0.0  ;;  %v4984_v18 = vrot.slane %v3960_v32, %v12049_v5  ;;  %v9391_v32 = vld [vmem:[%s14000_s2 + $0x1c0] sm:$0xff] }
 0x295   :  { %5819 = vadd.xlane.f32.xlu0 %v5818_v45  ;;  %v5385_v55 = vmul.f32 %v9391_v32, %v9391_v32 }
 0x296   :  { %5948 = vadd.xlane.f32.xlu1 %v5947_v14 }
 0x297   :  { %v12738_v24 = vpop.xlane.xlu1 %3983 }
 0x298   :  { %v5023_v51 = vrot.slane %v12738_v24, %v12049_v5 }
 0x299   :  { %5858 = vadd.xlane.f32.xlu0 %v5857_v27  ;;  %v4985_v27 = vsel %vm4348_vm8, %v4984_v18, %v4980_v46  ;;  %v5692_v46 = vsel %vm282_vm0, %v5386_v41, 0.0 }
 0x29a   :  { %5324 = vadd.xlane.f32.xlu1 %v5323_v33  ;;  %v5024_v22 = vsel %vm4348_vm8, %v5023_v51, %v5019_v39 }
 0x29b   :  { %v3966_v35 = vpop.xlane.xlu1 %3965 }
 0x29c   :  { %v4994_v16 = vrot.slane %v3966_v35, %v12081_v6  ;;  %v5689_v35 = vsel %vm282_vm0, %v5385_v55, 0.0 }
 0x29d   :  { %5924 = vadd.xlane.f32.xlu0 %v5923_v28  ;;  %v9392_v28 = vld [vmem:[%s14000_s2 + $0x190] sm:$0xff] }
 0x29e   :  { %5990 = vadd.xlane.f32.xlu1 %v5989_v10  ;;  %v5379_v24 = vmul.f32 %v9392_v28, %v9392_v28  ;;  %v9393_v10 = vld [vmem:[%s14000_s2 + $0x238] sm:$0xff] }
 0x29f   :  { %v3990_v56 = vpop.xlane.xlu1 %3989  ;;  %v5400_v1 = vmul.f32 %v9393_v10, %v9393_v10 }
 0x2a0   :  { %v5033_v48 = vrot.slane %v3990_v56, %v12081_v6  ;;  %v5671_v34 = vsel %vm282_vm0, %v5379_v24, 0.0  ;;  %v9395_v56 = vld [vmem:[%s14000_s2 + $0x2b0] sm:$0xff] }
 0x2a1   :  { %5969 = vadd.xlane.f32.xlu0 %v5968_v2  ;;  %v5734_v63 = vsel %vm282_vm0, %v5400_v1, 0.0 }
 0x2a2   :  { %v12760_v21 = vpop.xlane.xlu0 %5321  ;;  %6032 = vadd.xlane.f32.xlu1 %v6031_v15 }
 0x2a3   :  { %14099 = vst [vmem:[#allocation87_spill] sm:$0xff] %v12760_v21  ;;  %v3972_v4 = vpop.xlane.xlu1 %3971 }
 0x2a4   :  { %v5004_v13 = vrot.slane %v3972_v4, %v12114_v61  ;;  %v9397_v4 = vld [vmem:[%s14000_s2 + $0x320] sm:$0xff] }
 0x2a5   :  { %6011 = vadd.xlane.f32.xlu0 %v6010_v50  ;;  %v5429_v32 = vmul.f32 %v9397_v4, %v9397_v4 }
 0x2a6   :  { %v3963_v45 = vpop.xlane.xlu0 %3962  ;;  %6053 = vadd.xlane.f32.xlu1 %v6052_v23  ;;  %v5415_v23 = vmul.f32 %v9395_v56, %v9395_v56 }
 0x2a7   :  { %v4989_v14 = vrot.slane %v3963_v45, %v12088_v44  ;;  %v3996_v19 = vpop.xlane.xlu1 %3995  ;;  %v5821_v28 = vsel %vm282_vm0, %v5429_v32, 0.0 }
 0x2a8   :  { %v5043_v55 = vrot.slane %v3996_v19, %v12114_v61  ;;  %v9399_v19 = vld [vmem:[%s14000_s2 + $0x390] sm:$0xff] }
 0x2a9   :  { %v4990_v20 = vsel %vm4355_vm9, %v4989_v14, %v4985_v27  ;;  %6050 = vadd.xlane.f32.xlu0 %v6049_v9  ;;  %v9396_v9 = vld [vmem:[%s14000_s2 + $0x278] sm:$0xff]  ;;  %v5443_v24 = vmul.f32 %v9399_v19, %v9399_v19  ;;  %v9406_v19 = vld [vmem:[%s14000_s2 + $0x4b0] sm:$0xff] }
 0x2aa   :  { %v3987_v17 = vpop.xlane.xlu0 %3986  ;;  %5651 = vadd.xlane.f32.xlu1 %v5650_v47  ;;  %v4995_v33 = vsel %vm4362_vm10, %v4994_v16, %v4990_v20  ;;  %v5408_v29 = vmul.f32 %v9396_v9, %v9396_v9  ;;  %v5779_v47 = vsel %vm282_vm0, %v5415_v23, 0.0  ;;  %v9398_v20 = vld [vmem:[%s14000_s2 + $0x2e8] sm:$0xff] }
 0x2ab   :  { %v5028_v12 = vrot.slane %v3987_v17, %v12088_v44  ;;  %v3978_v38 = vpop.xlane.xlu1 %3977  ;;  %v5422_v17 = vmul.f32 %v9398_v20, %v9398_v20  ;;  %v9405_v20 = vld [vmem:[%s14000_s2 + $0x4e8] sm:$0xff] }
 0x2ac   :  { %v5758_v16 = vsel %vm282_vm0, %v5408_v29, 0.0  ;;  %v9403_v29 = vld [vmem:[%s14000_s2 + $0x478] sm:$0xff] }
 0x2ad   :  { %v5029_v2 = vsel %vm4355_vm9, %v5028_v12, %v5024_v22  ;;  %5630 = vadd.xlane.f32.xlu0 %v5629_v52  ;;  %v5014_v12 = vrot.slane %v3978_v38, %v12136_v62  ;;  %v5800_v22 = vsel %vm282_vm0, %v5422_v17, 0.0  ;;  %v9401_v38 = vld [vmem:[%s14000_s2 + $0x3c8] sm:$0xff]  ;;  %v5486_v17 = vmul.f32 %v9405_v20, %v9405_v20 }
 0x2ae   :  { %v3969_v42 = vpop.xlane.xlu0 %3968  ;;  %5690 = vadd.xlane.f32.xlu1 %v5689_v35  ;;  %v5034_v15 = vsel %vm4362_vm10, %v5033_v48, %v5029_v2  ;;  %v9400_v48 = vld [vmem:[%s14000_s2 + $0x358] sm:$0xff]  ;;  %v5450_v7 = vmul.f32 %v9401_v38, %v9401_v38 }
 0x2af   :  { %v4999_v50 = vrot.slane %v3969_v42, %v12117_v60  ;;  %v4002_v36 = vpop.xlane.xlu1 %4001  ;;  %v5436_v2 = vmul.f32 %v9400_v48, %v9400_v48 }
 0x2b0   :  { %v5053_v41 = vrot.slane %v4002_v36, %v12136_v62  ;;  %v5884_v9 = vsel %vm282_vm0, %v5450_v7, 0.0  ;;  %v9408_v7 = vld [vmem:[%s14000_s2 + $0x520] sm:$0xff] }
 0x2b1   :  { %v5000_v59 = vsel %vm4369_vm11, %v4999_v50, %v4995_v33  ;;  %5672 = vadd.xlane.f32.xlu0 %v5671_v34 }
 0x2b2   :  { %v3993_v18 = vpop.xlane.xlu0 %3992  ;;  %5735 = vadd.xlane.f32.xlu1 %v5734_v63  ;;  %v5005_v45 = vsel %vm4376_vm12, %v5004_v13, %v5000_v59  ;;  %v5842_v13 = vsel %vm282_vm0, %v5436_v2, 0.0  ;;  %v9402_v59 = vld [vmem:[%s14000_s2 + $0x3c0] sm:$0xff] }
 0x2b3   :  { %v5038_v53 = vrot.slane %v3993_v18, %v12117_v60  ;;  %v4008_v14 = vpop.xlane.xlu1 %4007  ;;  %v5449_v18 = vmul.f32 %v9402_v59, %v9402_v59 }
 0x2b4   :  { %v5062_v50 = vrot.slane %v4008_v14, %v12049_v5 }
 0x2b5   :  { %v5039_v51 = vsel %vm4369_vm11, %v5038_v53, %v5034_v15  ;;  %5693 = vadd.xlane.f32.xlu0 %v5692_v46  ;;  %v5863_v15 = vsel %vm282_vm0, %v5443_v24, 0.0  ;;  %v5472_v53 = vmul.f32 %v9403_v29, %v9403_v29  ;;  %v5881_v32 = vsel %vm282_vm0, %v5449_v18, 0.0  ;;  %v9410_v29 = vld [vmem:[%s14000_s2 + $0x590] sm:$0xff] }
 0x2b6   :  { %v3975_v27 = vpop.xlane.xlu0 %3974  ;;  %5780 = vadd.xlane.f32.xlu1 %v5779_v47  ;;  %v5044_v39 = vsel %vm4376_vm12, %v5043_v55, %v5039_v51  ;;  %v9404_v55 = vld [vmem:[%s14000_s2 + $0x438] sm:$0xff]  ;;  %v5479_v24 = vmul.f32 %v9406_v19, %v9406_v19 }
 0x2b7   :  { %v5009_v52 = vrot.slane %v3975_v27, %v12139_v31  ;;  %v4032_v33 = vpop.xlane.xlu1 %4031  ;;  %v5464_v51 = vmul.f32 %v9404_v55, %v9404_v55  ;;  %v9413_v19 = vld [vmem:[%s14000_s2 + $0x198] sm:$0xff] }
 0x2b8   :  { %v5101_v14 = vrot.slane %v4032_v33, %v12049_v5 }
 0x2b9   :  { %v5010_v35 = vsel %vm4383_vm13, %v5009_v52, %v5005_v45  ;;  %5759 = vadd.xlane.f32.xlu0 %v5758_v16 }
 0x2ba   :  { %v5015_v10 = vsel %vm4390_vm14, %v5014_v12, %v5010_v35  ;;  %v3999_v1 = vpop.xlane.xlu0 %3998  ;;  %5822 = vadd.xlane.f32.xlu1 %v5821_v28  ;;  %v5926_v28 = vsel %vm282_vm0, %v5464_v51, 0.0 }
 0x2bb   :  { %v5048_v42 = vrot.slane %v3999_v1, %v12139_v31  ;;  %v4014_v34 = vpop.xlane.xlu1 %4013  ;;  %v9407_v1 = vld [vmem:[%s14000_s2 + $0x558] sm:$0xff] }
 0x2bc   :  { %v5072_v48 = vrot.slane %v4014_v34, %v12081_v6  ;;  %v9409_v34 = vld [vmem:[%s14000_s2 + $0x5c0] sm:$0xff] }
 0x2bd   :  { %v5049_v63 = vsel %vm4383_vm13, %v5048_v42, %v5044_v39  ;;  %5801 = vadd.xlane.f32.xlu0 %v5800_v22  ;;  %v5950_v39 = vsel %vm282_vm0, %v5472_v53, 0.0  ;;  %v5500_v22 = vmul.f32 %v9407_v1, %v9407_v1  ;;  %v5507_v53 = vmul.f32 %v9410_v29, %v9410_v29 }
 0x2be   :  { %v5054_v56 = vsel %vm4390_vm14, %v5053_v41, %v5049_v63  ;;  %v4005_v23 = vpop.xlane.xlu0 %4004  ;;  %5864 = vadd.xlane.f32.xlu1 %v5863_v15  ;;  %v5971_v15 = vsel %vm282_vm0, %v5479_v24, 0.0  ;;  %v5493_v41 = vmul.f32 %v9408_v7, %v9408_v7  ;;  %v5380_v24 = vmul.f32 %v9413_v19, %v9413_v19  ;;  %v9415_v7 = vld [vmem:[%s14000_s2 + $0x2b8] sm:$0xff]  ;;  %v9420_v19 = vld [vmem:[%s14000_s2 + $0x360] sm:$0xff] }
 0x2bf   :  { %v12855_v46 = vsel %vm5289_vm15, %v5054_v56, %v5015_v10  ;;  %v5058_v36 = vrot.slane %v4005_v23, %v12055_v30  ;;  %v4038_v45 = vpop.xlane.xlu1 %4037  ;;  %v5992_v10 = vsel %vm282_vm0, %v5486_v17, 0.0  ;;  %v6034_v56 = vsel %vm282_vm0, %v5500_v22, 0.0  ;;  %v9412_v17 = vld [vmem:[%s14000_s2 + $0x5c8] sm:$0xff] }
 0x2c0   :  { %v5513_v23 = vmul.f32 %v9409_v34, %v9409_v34 }
 0x2c1   :  { %v5063_v47 = vsel %vm4348_vm8, %v5062_v50, %v5058_v36  ;;  %5843 = vadd.xlane.f32.xlu0 %v5842_v13  ;;  %v5111_v13 = vrot.slane %v4038_v45, %v12081_v6  ;;  %v6013_v36 = vsel %vm282_vm0, %v5493_v41, 0.0  ;;  %v9411_v45 = vld [vmem:[%s14000_s2 + $0x128] sm:$0xff]  ;;  %v5416_v41 = vmul.f32 %v9415_v7, %v9415_v7 }
 0x2c2   :  { %v4029_v4 = vpop.xlane.xlu0 %4028  ;;  %5885 = vadd.xlane.f32.xlu1 %v5884_v9 }
 0x2c3   :  { %v5097_v27 = vrot.slane %v4029_v4, %v12055_v30  ;;  %v4020_v16 = vpop.xlane.xlu1 %4019  ;;  %v6073_v4 = vsel %vm282_vm0, %v5513_v23, 0.0  ;;  %v5782_v29 = vsel %vm282_vm0, %v5416_v41, 0.0  ;;  %v9423_v41 = vld [vmem:[%s14000_s2 + $0x528] sm:$0xff] }
 0x2c4   :  { %v5082_v55 = vrot.slane %v4020_v16, %v12114_v61 }
 0x2c5   :  { %v5102_v52 = vsel %vm4348_vm8, %v5101_v14, %v5097_v27  ;;  %5882 = vadd.xlane.f32.xlu0 %v5881_v32  ;;  %v5366_v32 = vmul.f32 %v9411_v45, %v9411_v45 }
 0x2c6   :  { %v4011_v33 = vpop.xlane.xlu0 %4010  ;;  %5951 = vadd.xlane.f32.xlu1 %v5950_v39  ;;  %v6055_v39 = vsel %vm282_vm0, %v5507_v53, 0.0  ;;  %v9417_v53 = vld [vmem:[%s14000_s2 + $0x328] sm:$0xff] }
 0x2c7   :  { %v5067_v12 = vrot.slane %v4011_v33, %v12088_v44  ;;  %v4044_v35 = vpop.xlane.xlu1 %4043  ;;  %v5632_v16 = vsel %vm282_vm0, %v5366_v32, 0.0 }
 0x2c9   :  { %v5068_v2 = vsel %vm4355_vm9, %v5067_v12, %v5063_v47  ;;  %5927 = vadd.xlane.f32.xlu0 %v5926_v28  ;;  %v5121_v12 = vrot.slane %v4044_v35, %v12114_v61  ;;  %v5674_v35 = vsel %vm282_vm0, %v5380_v24, 0.0  ;;  %v5437_v24 = vmul.f32 %v9420_v19, %v9420_v19 }
 0x2ca   :  { %v4035_v42 = vpop.xlane.xlu0 %4034  ;;  %5993 = vadd.xlane.f32.xlu1 %v5992_v10  ;;  %v5073_v38 = vsel %vm4362_vm10, %v5072_v48, %v5068_v2  ;;  %v9414_v2 = vld [vmem:[%s14000_s2 + $0x160] sm:$0xff] }
 0x2cb   :  { %v5106_v50 = vrot.slane %v4035_v42, %v12088_v44  ;;  %v4026_v63 = vpop.xlane.xlu1 %4025  ;;  %v5373_v42 = vmul.f32 %v9414_v2, %v9414_v2  ;;  %v5845_v2 = vsel %vm282_vm0, %v5437_v24, 0.0  ;;  %v9429_v24 = vld [vmem:[%s14000_s2 + $0x1a0] sm:$0xff] }
 0x2cd   :  { %v5107_v59 = vsel %vm4355_vm9, %v5106_v50, %v5102_v52  ;;  %5972 = vadd.xlane.f32.xlu0 %v5971_v15  ;;  %v5514_v52 = vmul.f32 %v9412_v17, %v9412_v17  ;;  %v5092_v50 = vrot.slane %v4026_v63, %v12136_v62  ;;  %v9419_v17 = vld [vmem:[%s14000_s2 + $0x398] sm:$0xff] }
 0x2ce   :  { %v4017_v18 = vpop.xlane.xlu0 %4016  ;;  %6035 = vadd.xlane.f32.xlu1 %v6034_v56  ;;  %v5112_v9 = vsel %vm4362_vm10, %v5111_v13, %v5107_v59  ;;  %v5653_v13 = vsel %vm282_vm0, %v5373_v42, 0.0  ;;  %v9416_v59 = vld [vmem:[%s14000_s2 + $0x1d0] sm:$0xff] }
 0x2cf   :  { %v5077_v14 = vrot.slane %v4017_v18, %v12117_v60  ;;  %v4050_v47 = vpop.xlane.xlu1 %4049  ;;  %v6076_v22 = vsel %vm282_vm0, %v5514_v52, 0.0  ;;  %v5387_v18 = vmul.f32 %v9416_v59, %v9416_v59  ;;  %v5444_v52 = vmul.f32 %v9419_v17, %v9419_v17  ;;  %v9422_v42 = vld [vmem:[%s14000_s2 + $0x3d0] sm:$0xff] }
 0x2d0   :  { %v9428_v17 = vld [vmem:[%s14000_s2 + $0x5d0] sm:$0xff] }
 0x2d1   :  { %v5078_v51 = vsel %vm4369_vm11, %v5077_v14, %v5073_v38  ;;  %6014 = vadd.xlane.f32.xlu0 %v6013_v36  ;;  %v5430_v14 = vmul.f32 %v9417_v53, %v9417_v53 }
 0x2d2   :  { %v4041_v27 = vpop.xlane.xlu0 %4040  ;;  %6074 = vadd.xlane.f32.xlu1 %v6073_v4  ;;  %v5083_v20 = vsel %vm4376_vm12, %v5082_v55, %v5078_v51  ;;  %v5131_v4 = vrot.slane %v4050_v47, %v12136_v62  ;;  %v9418_v51 = vld [vmem:[%s14000_s2 + $0x2f0] sm:$0xff] }
 0x2d3   :  { %v5116_v33 = vrot.slane %v4041_v27, %v12117_v60  ;;  %v12915_v28 = vpop.xlane.xlu1 %4055  ;;  %v5423_v27 = vmul.f32 %v9418_v51, %v9418_v51  ;;  %v5824_v47 = vsel %vm282_vm0, %v5430_v14, 0.0  ;;  %v9426_v14 = vld [vmem:[%s14000_s2 + $0x560] sm:$0xff] }
 0x2d5   :  { %v5117_v10 = vsel %vm4369_vm11, %v5116_v33, %v5112_v9  ;;  %6056 = vadd.xlane.f32.xlu0 %v6055_v39 }
 0x2d6   :  { %v4023_v1 = vpop.xlane.xlu0 %4022  ;;  %5633 = vadd.xlane.f32.xlu1 %v5632_v16  ;;  %v5122_v48 = vsel %vm4376_vm12, %v5121_v12, %v5117_v10  ;;  %v5803_v16 = vsel %vm282_vm0, %v5423_v27, 0.0  ;;  %v5866_v10 = vsel %vm282_vm0, %v5444_v52, 0.0  ;;  %v5515_v52 = vmul.f32 %v9428_v17, %v9428_v17 }
 0x2d7   :  { %v5087_v15 = vrot.slane %v4023_v1, %v12139_v31  ;;  %v12929_v38 = vpop.xlane.xlu1 %4079  ;;  %v9421_v1 = vld [vmem:[%s14000_s2 + $0x4b8] sm:$0xff] }
 0x2d9   :  { %v5088_v56 = vsel %vm4383_vm13, %v5087_v15, %v5083_v20  ;;  %6077 = vadd.xlane.f32.xlu0 %v6076_v22  ;;  %v5480_v22 = vmul.f32 %v9421_v1, %v9421_v1  ;;  %v5451_v15 = vmul.f32 %v9422_v42, %v9422_v42 }
 0x2da   :  { %v5093_v34 = vsel %vm4390_vm14, %v5092_v50, %v5088_v56  ;;  %v4047_v23 = vpop.xlane.xlu0 %4046  ;;  %5675 = vadd.xlane.f32.xlu1 %v5674_v35  ;;  %v5494_v50 = vmul.f32 %v9423_v41, %v9423_v41  ;;  %v9431_v41 = vld [vmem:[%s14000_s2 + $0x2f8] sm:$0xff] }
 0x2db   :  { %v5311_v36 = vsel %vm5291_vm1, %v5093_v34, %v12855_v46  ;;  %v5126_v9 = vrot.slane %v4047_v23, %v12139_v31  ;;  %v12945_v63 = vpop.xlane.xlu1 %4061  ;;  %v5695_v46 = vsel %vm282_vm0, %v5387_v18, 0.0  ;;  %v5974_v7 = vsel %vm282_vm0, %v5480_v22, 0.0  ;;  %v9424_v23 = vld [vmem:[%s14000_s2 + $0x4f0] sm:$0xff] }
 0x2dc   :  { %v5887_v34 = vsel %vm282_vm0, %v5451_v15, 0.0  ;;  %v6016_v18 = vsel %vm282_vm0, %v5494_v50, 0.0  ;;  %v6079_v22 = vsel %vm282_vm0, %v5515_v52, 0.0  ;;  %v5424_v50 = vmul.f32 %v9431_v41, %v9431_v41  ;;  %v9435_v52 = vld [vmem:[%s14000_s2 + $0x3d8] sm:$0xff]  ;;  %v9437_v41 = vld [vmem:[%s14000_s2 + $0x530] sm:$0xff] }
 0x2dd   :  { %v5127_v45 = vsel %vm4383_vm13, %v5126_v9, %v5122_v48  ;;  %5654 = vadd.xlane.f32.xlu0 %v5653_v13  ;;  %v5487_v13 = vmul.f32 %v9424_v23, %v9424_v23 }
 0x2de   :  { %v5132_v32 = vsel %vm4390_vm14, %v5131_v4, %v5127_v45  ;;  %v12954_v55 = vpop.xlane.xlu0 %4052  ;;  %5783 = vadd.xlane.f32.xlu1 %v5782_v29  ;;  %v5501_v4 = vmul.f32 %v9426_v14, %v9426_v14 }
 0x2df   :  { %v12961_v39 = vsel %vm5293_vm2, %v5132_v32, %v5311_v36  ;;  %v12963_v20 = vpop.xlane.xlu1 %4085  ;;  %v9425_v36 = vld [vmem:[%s14000_s2 + $0x598] sm:$0xff]  ;;  %v5995_v53 = vsel %vm282_vm0, %v5487_v13, 0.0 }
 0x2e0   :  { %v5508_v9 = vmul.f32 %v9425_v36, %v9425_v36  ;;  %v9432_v13 = vld [vmem:[%s14000_s2 + $0x1d8] sm:$0xff] }
 0x2e1   :  { %5696 = vadd.xlane.f32.xlu0 %v5695_v46  ;;  %v9427_v46 = vld [vmem:[%s14000_s2 + $0x130] sm:$0xff] }
 0x2e2   :  { %v12969_v33 = vpop.xlane.xlu0 %4076  ;;  %5825 = vadd.xlane.f32.xlu1 %v5824_v47  ;;  %v6058_v32 = vsel %vm282_vm0, %v5508_v9, 0.0  ;;  %v5367_v51 = vmul.f32 %v9427_v46, %v9427_v46  ;;  %v6037_v47 = vsel %vm282_vm0, %v5501_v4, 0.0  ;;  %v5806_v9 = vsel %vm282_vm0, %v5424_v50, 0.0  ;;  %v9434_v46 = vld [vmem:[%s14000_s2 + $0x330] sm:$0xff] }
 0x2e3   :  { %v12975_v12 = vpop.xlane.xlu1 %4067  ;;  %v5495_v50 = vmul.f32 %v9437_v41, %v9437_v41  ;;  %v9443_v41 = vld [vmem:[%s14000_s2 + $0x1a8] sm:$0xff] }
 0x2e4   :  { %v5635_v19 = vsel %vm282_vm0, %v5367_v51, 0.0  ;;  %v5431_v51 = vmul.f32 %v9434_v46, %v9434_v46 }
 0x2e5   :  { %5804 = vadd.xlane.f32.xlu0 %v5803_v16 }
 0x2e6   :  { %v12981_v48 = vpop.xlane.xlu0 %4058  ;;  %5867 = vadd.xlane.f32.xlu1 %v5866_v10  ;;  %v5381_v10 = vmul.f32 %v9429_v24, %v9429_v24 }
 0x2e7   :  { %v12987_v35 = vpop.xlane.xlu1 %4091 }
 0x2e9   :  { %5846 = vadd.xlane.f32.xlu0 %v5845_v2  ;;  %v9430_v2 = vld [vmem:[%s14000_s2 + $0x168] sm:$0xff] }
 0x2ea   :  { %v12993_v56 = vpop.xlane.xlu0 %4082  ;;  %5975 = vadd.xlane.f32.xlu1 %v5974_v7  ;;  %v5374_v42 = vmul.f32 %v9430_v2, %v9430_v2  ;;  %v5677_v7 = vsel %vm282_vm0, %v5381_v10, 0.0  ;;  %v5827_v10 = vsel %vm282_vm0, %v5431_v51, 0.0  ;;  %v9440_v51 = vld [vmem:[%s14000_s2 + $0x568] sm:$0xff] }
 0x2eb   :  { %v12999_v59 = vpop.xlane.xlu1 %4073 }
 0x2ec   :  { %v5656_v23 = vsel %vm282_vm0, %v5374_v42, 0.0 }
 0x2ed   :  { %5888 = vadd.xlane.f32.xlu0 %v5887_v34 }
 0x2ee   :  { %v13005_v29 = vpop.xlane.xlu0 %4064  ;;  %6017 = vadd.xlane.f32.xlu1 %v6016_v18  ;;  %v5388_v18 = vmul.f32 %v9432_v13, %v9432_v13 }
 0x2ef   :  { %v13011_v45 = vpop.xlane.xlu1 %4097 }
 0x2f1   :  { %5996 = vadd.xlane.f32.xlu0 %v5995_v53  ;;  %v9433_v53 = vld [vmem:[%s14000_s2 + $0x368] sm:$0xff] }
 0x2f2   :  { %v13017_v27 = vpop.xlane.xlu0 %4088  ;;  %6059 = vadd.xlane.f32.xlu1 %v6058_v32  ;;  %v5438_v14 = vmul.f32 %v9433_v53, %v9433_v53  ;;  %v5698_v32 = vsel %vm282_vm0, %v5388_v18, 0.0  ;;  %v9438_v18 = vld [vmem:[%s14000_s2 + $0x4f8] sm:$0xff] }
 0x2f3   :  { %v13023_v16 = vpop.xlane.xlu1 %4103 }
 0x2f4   :  { %v5848_v17 = vsel %vm282_vm0, %v5438_v14, 0.0  ;;  %v6019_v14 = vsel %vm282_vm0, %v5495_v50, 0.0  ;;  %v5382_v50 = vmul.f32 %v9443_v41, %v9443_v41 }
 0x2f5   :  { %6038 = vadd.xlane.f32.xlu0 %v6037_v47 }
 0x2f6   :  { %v13029_v1 = vpop.xlane.xlu0 %4070  ;;  %5636 = vadd.xlane.f32.xlu1 %v5635_v19  ;;  %v5452_v19 = vmul.f32 %v9435_v52, %v9435_v52  ;;  %v9441_v52 = vld [vmem:[%s14000_s2 + $0x138] sm:$0xff]  ;;  %v5680_v43 = vsel %vm282_vm0, %v5382_v50, 0.0 }
 0x2f7   :  { %v13035_v15 = vpop.xlane.xlu1 %4127 }
 0x2f9   :  { %6080 = vadd.xlane.f32.xlu0 %v6079_v22  ;;  %v9436_v22 = vld [vmem:[%s14000_s2 + $0x3a0] sm:$0xff] }
 0x2fa   :  { %v13041_v34 = vpop.xlane.xlu0 %4094  ;;  %5678 = vadd.xlane.f32.xlu1 %v5677_v7  ;;  %v5445_v2 = vmul.f32 %v9436_v22, %v9436_v22  ;;  %v5890_v7 = vsel %vm282_vm0, %v5452_v19, 0.0  ;;  %v5368_v19 = vmul.f32 %v9441_v52, %v9441_v52  ;;  %v5136_v22 = vrot.slane %v12954_v55, %v12055_v30 }
 0x2fb   :  { %v13047_v36 = vpop.xlane.xlu1 %4109  ;;  %v5145_v55 = vrot.slane %v12981_v48, %v12088_v44 }
 0x2fc   :  { %v5869_v13 = vsel %vm282_vm0, %v5445_v2, 0.0  ;;  %v9442_v2 = vld [vmem:[%s14000_s2 + $0x5d8] sm:$0xff] }
 0x2fd   :  { %5657 = vadd.xlane.f32.xlu0 %v5656_v23 }
 0x2fe   :  { %v13053_v4 = vpop.xlane.xlu0 %4100  ;;  %5807 = vadd.xlane.f32.xlu1 %v5806_v9  ;;  %v5488_v9 = vmul.f32 %v9438_v18, %v9438_v18  ;;  %v5179_v18 = vrot.slane %v12929_v38, %v12049_v5  ;;  %v9444_v38 = vld [vmem:[%s14000_s2 + $0x170] sm:$0xff] }
 0x2ff   :  { %v13059_v47 = vpop.xlane.xlu1 %4133  ;;  %v5375_v41 = vmul.f32 %v9444_v38, %v9444_v38  ;;  %v5214_v48 = vrot.slane %v13053_v4, %v12055_v30  ;;  %v5155_v4 = vrot.slane %v13005_v29, %v12117_v60  ;;  %v5189_v29 = vrot.slane %v12963_v20, %v12081_v6 }
 0x301   :  { %5699 = vadd.xlane.f32.xlu0 %v5698_v32  ;;  %v9439_v32 = vld [vmem:[%s14000_s2 + $0x5a0] sm:$0xff]  ;;  %v5659_v50 = vsel %vm282_vm0, %v5375_v41, 0.0  ;;  %v5228_v41 = vrot.slane %v13047_v36, %v12081_v6 }
 0x302   :  { %v13065_v24 = vpop.xlane.xlu0 %4124  ;;  %5849 = vadd.xlane.f32.xlu1 %v5848_v17  ;;  %v5509_v46 = vmul.f32 %v9439_v32, %v9439_v32  ;;  %v5502_v17 = vmul.f32 %v9440_v51, %v9440_v51  ;;  %v5998_v32 = vsel %vm282_vm0, %v5488_v9, 0.0  ;;  %v5184_v51 = vrot.slane %v12993_v56, %v12088_v44 }
 0x303   :  { %v13071_v42 = vpop.xlane.xlu1 %4115 }
 0x304   :  { %v6040_v9 = vsel %vm282_vm0, %v5502_v17, 0.0  ;;  %v9445_v17 = vld [vmem:[%s14000_s2 + $0x338] sm:$0xff] }
 0x305   :  { %5828 = vadd.xlane.f32.xlu0 %v5827_v10  ;;  %v5140_v10 = vrot.slane %v12915_v28, %v12049_v5  ;;  %v5175_v28 = vrot.slane %v12969_v33, %v12055_v30  ;;  %v5218_v33 = vrot.slane %v13023_v16, %v12049_v5 }
 0x306   :  { %v4107_v23 = vpop.xlane.xlu0 %4106  ;;  %5891 = vadd.xlane.f32.xlu1 %v5890_v7  ;;  %v5516_v7 = vmul.f32 %v9442_v2, %v9442_v2  ;;  %v6061_v2 = vsel %vm282_vm0, %v5509_v46, 0.0 }
 0x307   :  { %v13081_v53 = vpop.xlane.xlu1 %4139  ;;  %v5141_v56 = vsel %vm4348_vm8, %v5140_v10, %v5136_v22  ;;  %v5223_v21 = vrot.slane %v4107_v23, %v12088_v44  ;;  %v5180_v38 = vsel %vm4348_vm8, %v5179_v18, %v5175_v28  ;;  %v5150_v23 = vrot.slane %v12945_v63, %v12081_v6 }
 0x308   :  { %v6082_v46 = vsel %vm282_vm0, %v5516_v7, 0.0  ;;  %v5146_v16 = vsel %vm4355_vm9, %v5145_v55, %v5141_v56  ;;  %v5185_v10 = vsel %vm4355_vm9, %v5184_v51, %v5180_v38  ;;  %v5194_v22 = vrot.slane %v13017_v27, %v12117_v60 }
 0x309   :  { %5870 = vadd.xlane.f32.xlu0 %v5869_v13  ;;  %v5257_v18 = vrot.slane %v13035_v15, %v12049_v5  ;;  %v5219_v28 = vsel %vm4348_vm8, %v5218_v33, %v5214_v48  ;;  %v5253_v63 = vrot.slane %v13065_v24, %v12055_v30  ;;  %v5151_v55 = vsel %vm4362_vm10, %v5150_v23, %v5146_v16 }
 0x30a   :  { %v4131_v13 = vpop.xlane.xlu0 %4130  ;;  %6020 = vadd.xlane.f32.xlu1 %v6019_v14  ;;  %v5638_v14 = vsel %vm282_vm0, %v5368_v19, 0.0  ;;  %v5432_v19 = vmul.f32 %v9445_v17, %v9445_v17  ;;  %v5190_v20 = vsel %vm4362_vm10, %v5189_v29, %v5185_v10  ;;  %v5165_v15 = vrot.slane %v13029_v1, %v12139_v31 }
 0x30b   :  { %v13112_v52 = vpop.xlane.xlu1 %4121  ;;  %v5262_v27 = vrot.slane %v4131_v13, %v12088_v44  ;;  %v5195_v13 = vsel %vm4369_vm11, %v5194_v22, %v5190_v20  ;;  %v5199_v1 = vrot.slane %v12987_v35, %v12114_v61  ;;  %v5267_v17 = vrot.slane %v13059_v47, %v12081_v6 }
 0x30c   :  { %v5830_v48 = vsel %vm282_vm0, %v5432_v19, 0.0  ;;  %v5238_v19 = vrot.slane %v13071_v42, %v12114_v61  ;;  %v5170_v10 = vrot.slane %v12999_v59, %v12136_v62  ;;  %v5209_v47 = vrot.slane %v13011_v45, %v12136_v62 }
 0x30d   :  { %5999 = vadd.xlane.f32.xlu0 %v5998_v32  ;;  %v5224_v32 = vsel %vm4355_vm9, %v5223_v21, %v5219_v28  ;;  %v5160_v21 = vrot.slane %v12975_v12, %v12114_v61  ;;  %v9446_v12 = vld [vmem:[%s14000_s2 + $0x1e0] sm:$0xff] }
 0x30e   :  { %v4113_v57 = vpop.xlane.xlu0 %4112  ;;  %6062 = vadd.xlane.f32.xlu1 %v6061_v2  ;;  %v5156_v2 = vsel %vm4369_vm11, %v5155_v4, %v5151_v55  ;;  %v5229_v36 = vsel %vm4362_vm10, %v5228_v41, %v5224_v32  ;;  %v5200_v4 = vsel %vm4376_vm12, %v5199_v1, %v5195_v13 }
 0x30f   :  { %v13140_v7 = vpop.xlane.xlu1 %4145  ;;  %v5233_v51 = vrot.slane %v4113_v57, %v12117_v60  ;;  %v5204_v57 = vrot.slane %v13041_v34, %v12139_v31  ;;  %v5161_v56 = vsel %vm4376_vm12, %v5160_v21, %v5156_v2 }
 0x310   :  { %v5166_v35 = vsel %vm4383_vm13, %v5165_v15, %v5161_v56 }
 0x311   :  { %6041 = vadd.xlane.f32.xlu0 %v6040_v9  ;;  %v5258_v9 = vsel %vm4348_vm8, %v5257_v18, %v5253_v63  ;;  %v5234_v38 = vsel %vm4369_vm11, %v5233_v51, %v5229_v36  ;;  %v5205_v22 = vsel %vm4383_vm13, %v5204_v57, %v5200_v4  ;;  %v9447_v18 = vld [vmem:[%s14000_s2 + $0x3a8] sm:$0xff]  ;;  %v5171_v59 = vsel %vm4390_vm14, %v5170_v10, %v5166_v35 }
 0x312   :  { %v4137_v24 = vpop.xlane.xlu0 %4136  ;;  %5639 = vadd.xlane.f32.xlu1 %v5638_v14  ;;  %v5389_v14 = vmul.f32 %v9446_v12, %v9446_v12  ;;  %v5263_v34 = vsel %vm4355_vm9, %v5262_v27, %v5258_v9  ;;  %v5446_v28 = vmul.f32 %v9447_v18, %v9447_v18  ;;  %v5248_v63 = vrot.slane %v13112_v52, %v12136_v62 }
 0x313   :  { %v13165_v33 = vpop.xlane.xlu1 %5756  ;;  %v5272_v16 = vrot.slane %v4137_v24, %v12117_v60  ;;  %v5268_v42 = vsel %vm4362_vm10, %v5267_v17, %v5263_v34  ;;  %v5210_v27 = vsel %vm4390_vm14, %v5209_v47, %v5205_v22  ;;  %v5277_v51 = vrot.slane %v13081_v53, %v12114_v61  ;;  %v9450_v34 = vld [vmem:[%s14000_s2 + $0x5a8] sm:$0xff]  ;;  %v9451_v17 = vld [vmem:[%s14000_s2 + $0x3e0] sm:$0xff]  ;;  %v9452_v22 = vld [vmem:[%s14000_s2 + $0x178] sm:$0xff] }
 0x314   :  { %v5701_v2 = vsel %vm282_vm0, %v5389_v14, 0.0  ;;  %v5872_v52 = vsel %vm282_vm0, %v5446_v28, 0.0  ;;  %v5287_v53 = vrot.slane %v13140_v7, %v12136_v62  ;;  %v5313_v13 = vsel %vm5295_vm3, %v5171_v59, %v12961_v39  ;;  %v9449_v7 = vld [vmem:[%s14000_s2 + $0x370] sm:$0xff] }
 0x315   :  { %6083 = vadd.xlane.f32.xlu0 %v6082_v46  ;;  %v5273_v55 = vsel %vm4369_vm11, %v5272_v16, %v5268_v42  ;;  %v5439_v12 = vmul.f32 %v9449_v7, %v9449_v7  ;;  %v9453_v47 = vld [vmem:[%s14000_s2 + $0x570] sm:$0xff] }
 0x316   :  { %v4119_v23 = vpop.xlane.xlu0 %4118  ;;  %5681 = vadd.xlane.f32.xlu1 %v5680_v43  ;;  %v5239_v43 = vsel %vm4376_vm12, %v5238_v19, %v5234_v38  ;;  %v5278_v21 = vsel %vm4376_vm12, %v5277_v51, %v5273_v55  ;;  %v5510_v38 = vmul.f32 %v9450_v34, %v9450_v34  ;;  %v5453_v19 = vmul.f32 %v9451_v17, %v9451_v17  ;;  %v9455_v51 = vld [vmem:[%s14000_s2 + $0x5e0] sm:$0xff] }
 0x317   :  { %v5243_v29 = vrot.slane %v4119_v23, %v12139_v31  ;;  %v13189_v46 = vpop.xlane.xlu1 %5798  ;;  %v5851_v4 = vsel %vm282_vm0, %v5439_v12, 0.0  ;;  %v5503_v42 = vmul.f32 %v9453_v47, %v9453_v47  ;;  %v9459_v12 = vld [vmem:[%s14000_s2 + $0x378] sm:$0xff] }
 0x318   :  { %v6064_v10 = vsel %vm282_vm0, %v5510_v38, 0.0  ;;  %v5893_v28 = vsel %vm282_vm0, %v5453_v19, 0.0  ;;  %v9460_v38 = vld [vmem:[%s14000_s2 + $0x5e8] sm:$0xff] }
 0x319   :  { %v5244_v32 = vsel %vm4383_vm13, %v5243_v29, %v5239_v43  ;;  %5660 = vadd.xlane.f32.xlu0 %v5659_v50  ;;  %v9448_v50 = vld [vmem:[%s14000_s2 + $0x538] sm:$0xff]  ;;  %v5376_v29 = vmul.f32 %v9452_v22, %v9452_v22 }
 0x31a   :  { %v4143_v45 = vpop.xlane.xlu0 %4142  ;;  %5831 = vadd.xlane.f32.xlu1 %v5830_v48  ;;  %v5249_v41 = vsel %vm4390_vm14, %v5248_v63, %v5244_v32  ;;  %v5496_v24 = vmul.f32 %v9448_v50, %v9448_v50  ;;  %v5314_v48 = vsel %vm5297_vm4, %v5210_v27, %v5313_v13  ;;  %v9454_v63 = vld [vmem:[%s14000_s2 + $0x1e8] sm:$0xff]  ;;  %v6043_v27 = vsel %vm282_vm0, %v5503_v42, 0.0  ;;  %v9462_v42 = vld [vmem:[%s14000_s2 + $0x1f0] sm:$0xff] }
 0x31b   :  { %v5282_v20 = vrot.slane %v4143_v45, %v12139_v31  ;;  %v13208_v15 = vpop.xlane.xlu1 %5840  ;;  %v5315_v36 = vsel %vm5299_vm5, %v5249_v41, %v5314_v48  ;;  %v5662_v59 = vsel %vm282_vm0, %v5376_v29, 0.0  ;;  %v5390_v55 = vmul.f32 %v9454_v63, %v9454_v63  ;;  %v9458_v48 = vld [vmem:[%s14000_s2 + $0x578] sm:$0xff] }
 0x31c   :  { %v6022_v56 = vsel %vm282_vm0, %v5496_v24, 0.0  ;;  %v5517_v45 = vmul.f32 %v9455_v51, %v9455_v51  ;;  %v6604_v63 = vrot.slane %v11180_v25, %v12055_v30  ;;  %v6647_v51 = vrot.slane %v11234_v40, %v12049_v5 }
 0x31d   :  { %v5283_v57 = vsel %vm4383_vm13, %v5282_v20, %v5278_v21  ;;  %5702 = vadd.xlane.f32.xlu0 %v5701_v2  ;;  %v5704_v20 = vsel %vm282_vm0, %v5390_v55, 0.0  ;;  %v6643_v55 = vrot.slane %v11206_v26, %v12055_v30 }
 0x31e   :  { %v13222_v1 = vpop.xlane.xlu0 %5777  ;;  %5873 = vadd.xlane.f32.xlu1 %v5872_v52  ;;  %v5288_v9 = vsel %vm4390_vm14, %v5287_v53, %v5283_v57  ;;  %v9456_v52 = vld [vmem:[%s14000_s2 + $0x3b0] sm:$0xff]  ;;  %v6085_v24 = vsel %vm282_vm0, %v5517_v45, 0.0 }
 0x31f   :  { %v13229_v14 = vpop.xlane.xlu1 %5861  ;;  %v5316_v39 = vsel %vm5301_vm6, %v5288_v9, %v5315_v36  ;;  %v5447_v41 = vmul.f32 %v9456_v52, %v9456_v52  ;;  %v9457_v53 = vld [vmem:[%s14000_s2 + $0x1b0] sm:$0xff]  ;;  %v5504_v9 = vmul.f32 %v9458_v48, %v9458_v48  ;;  %v6682_v52 = vrot.slane %v11286_v58, %v12055_v30 }
 0x320   :  { %v5326_v16 = vsel %vm282_vm0, %v5316_v39, 0.0  ;;  %v5383_v21 = vmul.f32 %v9457_v53, %v9457_v53  ;;  %v5440_v39 = vmul.f32 %v9459_v12, %v9459_v12  ;;  %v9464_v58 = vld [vmem:[%s14000_s2 + $0x3f0] sm:$0xff]  ;;  %v6618_v48 = vrot.slane %v11415_v8, %v12081_v6 }
 0x321   :  { %5327 = vadd.xlane.f32.xlu0 %v5326_v16  ;;  %v5875_v57 = vsel %vm282_vm0, %v5447_v41, 0.0  ;;  %v6046_v34 = vsel %vm282_vm0, %v5504_v9, 0.0  ;;  %v5518_v16 = vmul.f32 %v9460_v38, %v9460_v38  ;;  %v6652_v41 = vrot.slane %v11282_v54, %v12088_v44 }
 0x322   :  { %v13237_v35 = vpop.xlane.xlu0 %5819  ;;  %6023 = vadd.xlane.f32.xlu1 %v6022_v56  ;;  %v5683_v7 = vsel %vm282_vm0, %v5383_v21, 0.0  ;;  %v5854_v19 = vsel %vm282_vm0, %v5440_v39, 0.0  ;;  %v5455_v21 = vmul.f32 %v9464_v58, %v9464_v58  ;;  %v6691_v54 = vrot.slane %v11433_v0, %v12088_v44  ;;  %v14101_v39 = vld [vmem:[#allocation54_spill] sm:$0xff] }
 0x323   :  { %v13243_v23 = vpop.xlane.xlu1 %5948  ;;  %v6088_v47 = vsel %vm282_vm0, %v5518_v16, 0.0  ;;  %v6648_v12 = vsel %vm4348_vm8, %v6647_v51, %v6643_v55  ;;  %v9465_v16 = vld [vmem:[%s14000_s2 + $0x1b8] sm:$0xff]  ;;  %v14103_v55 = vld [vmem:[#allocation71_spill] sm:$0xff]  ;;  %v14104_v51 = vld [vmem:[#allocation52_spill] sm:$0xff] }
 0x325   :  { %5852 = vadd.xlane.f32.xlu0 %v5851_v4 }
 0x326   :  { %v13249_v18 = vpop.xlane.xlu0 %5858  ;;  %6065 = vadd.xlane.f32.xlu1 %v6064_v10  ;;  %v9461_v10 = vld [vmem:[%s14000_s2 + $0x3e8] sm:$0xff] }
 0x327   :  { %v13255_v43 = vpop.xlane.xlu1 %5324  ;;  %v5454_v22 = vmul.f32 %v9461_v10, %v9461_v10 }
 0x329   :  { %5894 = vadd.xlane.f32.xlu0 %v5893_v28  ;;  %v5896_v26 = vsel %vm282_vm0, %v5454_v22, 0.0  ;;  %v5899_v22 = vsel %vm282_vm0, %v5455_v21, 0.0 }
 0x32a   :  { %v13261_v32 = vpop.xlane.xlu0 %5924  ;;  %5663 = vadd.xlane.f32.xlu1 %v5662_v59  ;;  %v5391_v59 = vmul.f32 %v9462_v42, %v9462_v42 }
 0x32b   :  { %v13267_v2 = vpop.xlane.xlu1 %5990 }
 0x32c   :  { %v5707_v53 = vsel %vm282_vm0, %v5391_v59, 0.0 }
 0x32d   :  { %6044 = vadd.xlane.f32.xlu0 %v6043_v27  ;;  %v6608_v27 = vrot.slane %v11212_v49, %v12049_v5  ;;  %v9463_v49 = vld [vmem:[%s14000_s2 + $0x5b0] sm:$0xff] }
 0x32e   :  { %v13273_v50 = vpop.xlane.xlu0 %5969  ;;  %5705 = vadd.xlane.f32.xlu1 %v5704_v20  ;;  %v6613_v20 = vrot.slane %v11263_v11, %v12088_v44  ;;  %v5511_v40 = vmul.f32 %v9463_v49, %v9463_v49 }
 0x32f   :  { %v13279_v13 = vpop.xlane.xlu1 %6032  ;;  %v6609_v9 = vsel %vm4348_vm8, %v6608_v27, %v6604_v63  ;;  %v6701_v27 = vrot.slane %v14103_v55, %v12117_v60 }
 0x330   :  { %v6614_v38 = vsel %vm4355_vm9, %v6613_v20, %v6609_v9  ;;  %v6067_v0 = vsel %vm282_vm0, %v5511_v40, 0.0  ;;  %v6623_v20 = vrot.slane %v14104_v51, %v12117_v60  ;;  %v14105_v40 = vld [vmem:[#allocation55_spill] sm:$0xff] }
 0x331   :  { %6086 = vadd.xlane.f32.xlu0 %v6085_v24  ;;  %v6686_v24 = vrot.slane %v11300_v37, %v12049_v5  ;;  %v14100_v37 = vld [vmem:[#allocation35_spill] sm:$0xff]  ;;  %v6619_v59 = vsel %vm4362_vm10, %v6618_v48, %v6614_v38 }
 0x332   :  { %v13285_v36 = vpop.xlane.xlu0 %6011  ;;  %5876 = vadd.xlane.f32.xlu1 %v5875_v57  ;;  %v6657_v57 = vrot.slane %v11402_v3, %v12081_v6 }
 0x333   :  { %v6054_v56 = vpop.xlane.xlu1 %6053 }
 0x334   :  { %v7154_v4 = vrot.slane %v6054_v56, %v12049_v5  ;;  %v6696_v56 = vrot.slane %v14101_v39, %v12081_v6  ;;  %v9468_v39 = vld [vmem:[%s14000_s2 + $0x3f8] sm:$0xff] }
 0x335   :  { %5684 = vadd.xlane.f32.xlu0 %v5683_v7  ;;  %v6916_v7 = vrot.slane %v14100_v37, %v12055_v30  ;;  %v14115_v37 = vld [vmem:[#allocation46_spill] sm:$0xff] }
 0x336   :  { %v6051_v17 = vpop.xlane.xlu0 %6050  ;;  %6047 = vadd.xlane.f32.xlu1 %v6046_v34  ;;  %v14102_v34 = vld [vmem:[#allocation36_spill] sm:$0xff] }
 0x337   :  { %v7150_v29 = vrot.slane %v6051_v17, %v12055_v30  ;;  %v13301_v28 = vpop.xlane.xlu1 %5651  ;;  %v6955_v3 = vrot.slane %v14102_v34, %v12055_v30  ;;  %v6653_v17 = vsel %vm4355_vm9, %v6652_v41, %v6648_v12  ;;  %v6662_v41 = vrot.slane %v14105_v40, %v12117_v60 }
 0x338   :  { %v6658_v42 = vsel %vm4362_vm10, %v6657_v57, %v6653_v17  ;;  %v9467_v57 = vld [vmem:[%s14000_s2 + $0x3b8] sm:$0xff] }
 0x339   :  { %v13316_v45 = vsel %vm4348_vm8, %v7154_v4, %v7150_v29  ;;  %5855 = vadd.xlane.f32.xlu0 %v5854_v19  ;;  %v5384_v4 = vmul.f32 %v9465_v16, %v9465_v16  ;;  %v6687_v19 = vsel %vm4348_vm8, %v6686_v24, %v6682_v52  ;;  %v9466_v29 = vld [vmem:[%s14000_s2 + $0x5f0] sm:$0xff]  ;;  %v5448_v48 = vmul.f32 %v9467_v57, %v9467_v57 }
 0x33a   :  { %v13322_v25 = vpop.xlane.xlu0 %5630  ;;  %6089 = vadd.xlane.f32.xlu1 %v6088_v47  ;;  %v5519_v47 = vmul.f32 %v9466_v29, %v9466_v29  ;;  %v6692_v63 = vsel %vm4355_vm9, %v6691_v54, %v6687_v19  ;;  %v14106_v24 = vld [vmem:[#allocation68_spill] sm:$0xff]  ;;  %v6624_v19 = vsel %vm4369_vm11, %v6623_v20, %v6619_v59  ;;  %v9469_v59 = vld [vmem:[%s14000_s2 + $0x5b8] sm:$0xff]  ;;  %v6838_v57 = vrot.slane %v13249_v18, %v12055_v30  ;;  %v14111_v18 = vld [vmem:[#allocation39_spill] sm:$0xff] }
 0x33b   :  { %v5691_v11 = vpop.xlane.xlu1 %5690  ;;  %v6697_v52 = vsel %vm4362_vm10, %v6696_v56, %v6692_v63  ;;  %v5686_v21 = vsel %vm282_vm0, %v5384_v4, 0.0  ;;  %v5456_v56 = vmul.f32 %v9468_v39, %v9468_v39  ;;  %v6672_v4 = vrot.slane %v13165_v33, %v12139_v31 }
 0x33c   :  { %v6565_v49 = vrot.slane %v5691_v11, %v12055_v30  ;;  %v6091_v12 = vsel %vm282_vm0, %v5519_v47, 0.0  ;;  %v6702_v38 = vsel %vm4369_vm11, %v6701_v27, %v6697_v52  ;;  %v6663_v63 = vsel %vm4369_vm11, %v6662_v41, %v6658_v42  ;;  %v14110_v41 = vld [vmem:[#allocation38_spill] sm:$0xff] }
 0x33d   :  { %5897 = vadd.xlane.f32.xlu0 %v5896_v26  ;;  %v6706_v26 = vrot.slane %v13222_v1, %v12114_v61  ;;  %v14107_v1 = vld [vmem:[#allocation69_spill] sm:$0xff]  ;;  %v5878_v33 = vsel %vm282_vm0, %v5448_v48, 0.0  ;;  %v5512_v51 = vmul.f32 %v9469_v59, %v9469_v59  ;;  %v5902_v42 = vsel %vm282_vm0, %v5456_v56, 0.0 }
 0x33e   :  { %v13351_v8 = vpop.xlane.xlu0 %5672  ;;  %5708 = vadd.xlane.f32.xlu1 %v5707_v53  ;;  %v6667_v53 = vrot.slane %v14106_v24, %v12114_v61  ;;  %v6628_v54 = vrot.slane %v14107_v1, %v12114_v61  ;;  %v6959_v24 = vrot.slane %v14110_v41, %v12049_v5  ;;  %v6925_v39 = vrot.slane %v14111_v18, %v12088_v44  ;;  %v14122_v18 = vld [vmem:[#allocation48_spill] sm:$0xff] }
 0x33f   :  { %v5736_v10 = vpop.xlane.xlu1 %5735 }
 0x340   :  { %v6638_v29 = vrot.slane %v5736_v10, %v12136_v62  ;;  %v6668_v10 = vsel %vm4376_vm12, %v6667_v53, %v6663_v63  ;;  %v6629_v20 = vsel %vm4376_vm12, %v6628_v54, %v6624_v19  ;;  %v6842_v53 = vrot.slane %v13229_v14, %v12049_v5  ;;  %v9470_v14 = vld [vmem:[%s14000_s2 + $0x1f8] sm:$0xff] }
 0x341   :  { %6068 = vadd.xlane.f32.xlu0 %v6067_v0  ;;  %v14108_v0 = vld [vmem:[#allocation86_spill] sm:$0xff] }
 0x342   :  { %v5694_v58 = vpop.xlane.xlu0 %5693  ;;  %5900 = vadd.xlane.f32.xlu1 %v5899_v22  ;;  %v6633_v16 = vrot.slane %v14108_v0, %v12139_v31  ;;  %v6707_v22 = vsel %vm4376_vm12, %v6706_v26, %v6702_v38  ;;  %v14112_v0 = vld [vmem:[#allocation40_spill] sm:$0xff] }
 0x343   :  { %v6569_v11 = vrot.slane %v5694_v58, %v12049_v5  ;;  %v5781_v9 = vpop.xlane.xlu1 %5780 }
 0x344   :  { %v6711_v17 = vrot.slane %v5781_v9, %v12139_v31  ;;  %v6634_v58 = vsel %vm4383_vm13, %v6633_v16, %v6629_v20  ;;  %v6070_v9 = vsel %vm282_vm0, %v5512_v51, 0.0  ;;  %v6964_v16 = vrot.slane %v14112_v0, %v12088_v44 }
 0x345   :  { %v13399_v47 = vsel %vm4348_vm8, %v6569_v11, %v6565_v49  ;;  %5687 = vadd.xlane.f32.xlu0 %v5686_v21  ;;  %v14109_v49 = vld [vmem:[#allocation37_spill] sm:$0xff]  ;;  %v6673_v21 = vsel %vm4383_vm13, %v6672_v4, %v6668_v10  ;;  %v6639_v48 = vsel %vm4390_vm14, %v6638_v29, %v6634_v58  ;;  %v14113_v4 = vld [vmem:[#allocation43_spill] sm:$0xff]  ;;  %v14114_v29 = vld [vmem:[#allocation42_spill] sm:$0xff] }
 0x346   :  { %v13403_v55 = vsel %vm4383_vm13, %v6711_v17, %v6707_v22  ;;  %v5760_v27 = vpop.xlane.xlu0 %5759  ;;  %6092 = vadd.xlane.f32.xlu1 %v6091_v12  ;;  %v6920_v40 = vrot.slane %v14109_v49, %v12049_v5  ;;  %v5392_v12 = vmul.f32 %v9470_v14, %v9470_v14  ;;  %v6998_v17 = vrot.slane %v14113_v4, %v12049_v5 }
 0x347   :  { %v6677_v52 = vrot.slane %v5760_v27, %v12136_v62  ;;  %v13412_v26 = vpop.xlane.xlu1 %5822  ;;  %v6960_v22 = vsel %vm4348_vm8, %v6959_v24, %v6955_v3  ;;  %v6994_v63 = vrot.slane %v14114_v29, %v12055_v30  ;;  %v6930_v27 = vrot.slane %v14115_v37, %v12081_v6  ;;  %v9471_v3 = vld [vmem:[%s14000_s2 + $0x5f8] sm:$0xff]  ;;  %s9340_s2 = spop %9339 }
 0x348   :  { %v6921_v38 = vsel %vm4348_vm8, %v6920_v40, %v6916_v7  ;;  %v6843_v7 = vsel %vm4348_vm8, %v6842_v53, %v6838_v57  ;;  %v5710_v34 = vsel %vm282_vm0, %v5392_v12, 0.0  ;;  %v5520_v20 = vmul.f32 %v9471_v3, %v9471_v3  ;;  %v14118_v40 = vld [vmem:[#allocation51_spill] sm:$0xff]  ;;  %v14119_v24 = vld [vmem:[#allocation61_spill] sm:$0xff]  ;;  %s281_s14 = ssub.f32 0.0, %s9340_s2 }
 0x349   :  { %v6678_v1 = vsel %vm4390_vm14, %v6677_v52, %v6673_v21  ;;  %5879 = vadd.xlane.f32.xlu0 %v5878_v33  ;;  %v14116_v33 = vld [vmem:[#allocation49_spill] sm:$0xff]  ;;  %v6926_v52 = vsel %vm4355_vm9, %v6925_v39, %v6921_v38  ;;  %v7033_v41 = vrot.slane %v14118_v40, %v12055_v30  ;;  %v6974_v58 = vrot.slane %v14119_v24, %v12117_v60 }
 0x34a   :  { %v13428_v54 = vsel %vm5289_vm15, %v6678_v1, %v6639_v48  ;;  %v13430_v11 = vpop.xlane.xlu0 %5801  ;;  %5903 = vadd.xlane.f32.xlu1 %v5902_v42  ;;  %v6969_v59 = vrot.slane %v14116_v33, %v12081_v6  ;;  %v14117_v42 = vld [vmem:[#allocation50_spill] sm:$0xff]  ;;  %v6965_v53 = vsel %vm4355_vm9, %v6964_v16, %v6960_v22  ;;  %v6999_v57 = vsel %vm4348_vm8, %v6998_v17, %v6994_v63  ;;  %v14123_v16 = vld [vmem:[#allocation63_spill] sm:$0xff] }
 0x34b   :  { %v5865_v56 = vpop.xlane.xlu1 %5864  ;;  %v7037_v49 = vrot.slane %v14117_v42, %v12049_v5  ;;  %v14120_v48 = vld [vmem:[#allocation58_spill] sm:$0xff]  ;;  %v6931_v12 = vsel %vm4362_vm10, %v6930_v27, %v6926_v52  ;;  %v7003_v39 = vrot.slane %v14122_v18, %v12088_v44  ;;  %v7042_v4 = vrot.slane %v14123_v16, %v12088_v44  ;;  %v14124_v17 = vld [vmem:[#allocation75_spill] sm:$0xff] }
 0x34c   :  { %v6847_v19 = vrot.slane %v5865_v56, %v12088_v44  ;;  %v6935_v1 = vrot.slane %v14120_v48, %v12117_v60  ;;  %v6984_v56 = vrot.slane %v13243_v23, %v12139_v31  ;;  %v6970_v0 = vsel %vm4362_vm10, %v6969_v59, %v6965_v53  ;;  %v14125_v23 = vld [vmem:[#allocation78_spill] sm:$0xff]  ;;  %v14127_v48 = vld [vmem:[#allocation77_spill] sm:$0xff] }
 0x34d   :  { %6071 = vadd.xlane.f32.xlu0 %v6070_v9  ;;  %v14121_v9 = vld [vmem:[#allocation76_spill] sm:$0xff]  ;;  %v6094_v29 = vsel %vm282_vm0, %v5520_v20, 0.0  ;;  %v7038_v63 = vsel %vm4348_vm8, %v7037_v49, %v7033_v41  ;;  %v6975_v37 = vsel %vm4369_vm11, %v6974_v58, %v6970_v0  ;;  %v7047_v27 = vrot.slane %v14125_v23, %v12081_v6 }
 0x34e   :  { %v13459_v51 = vsel %vm4355_vm9, %v6847_v19, %v6843_v7  ;;  %v13461_v10 = vpop.xlane.xlu0 %5843  ;;  %v6979_v14 = vrot.slane %v14121_v9, %v12114_v61  ;;  %v6940_v19 = vrot.slane %v14124_v17, %v12114_v61  ;;  %v6936_v59 = vsel %vm4369_vm11, %v6935_v1, %v6931_v12  ;;  %v14126_v20 = vld [vmem:[#allocation60_spill] sm:$0xff] }
 0x34f   :  { %v5886_v21 = vpop.xlane.xlu1 %5885  ;;  %v6945_v3 = vrot.slane %v13261_v32, %v12139_v31  ;;  %v7008_v42 = vrot.slane %v14126_v20, %v12081_v6  ;;  %v7052_v40 = vrot.slane %v13267_v2, %v12117_v60  ;;  %v7004_v24 = vsel %vm4355_vm9, %v7003_v39, %v6999_v57  ;;  %v14128_v2 = vld [vmem:[#allocation81_spill] sm:$0xff]  ;;  %v14129_v57 = vld [vmem:[#allocation80_spill] sm:$0xff] }
 0x350   :  { %v6881_v38 = vrot.slane %v5886_v21, %v12049_v5  ;;  %v7043_v58 = vsel %vm4355_vm9, %v7042_v4, %v7038_v63  ;;  %v6941_v32 = vsel %vm4376_vm12, %v6940_v19, %v6936_v59  ;;  %v7013_v1 = vrot.slane %v14127_v48, %v12117_v60  ;;  %v14131_v63 = vld [vmem:[#allocation65_spill] sm:$0xff]  ;;  %v14134_v48 = vld [vmem:[#allocation64_spill] sm:$0xff] }
 0x351   :  { %5711 = vadd.xlane.f32.xlu0 %v5710_v34  ;;  %v6980_v34 = vsel %vm4376_vm12, %v6979_v14, %v6975_v37  ;;  %v7048_v9 = vsel %vm4362_vm10, %v7047_v27, %v7043_v58  ;;  %v7115_v14 = vrot.slane %v14128_v2, %v12049_v5  ;;  %v7111_v39 = vrot.slane %v14129_v57, %v12055_v30 }
 0x352   :  { %v5883_v22 = vpop.xlane.xlu0 %5882  ;;  %v6985_v49 = vsel %vm4383_vm13, %v6984_v56, %v6980_v34  ;;  %v6946_v56 = vsel %vm4383_vm13, %v6945_v3, %v6941_v32  ;;  %v7009_v16 = vsel %vm4362_vm10, %v7008_v42, %v7004_v24  ;;  %v7053_v4 = vsel %vm4369_vm11, %v7052_v40, %v7048_v9  ;;  %v14133_v24 = vld [vmem:[#allocation53_spill] sm:$0xff] }
 0x353   :  { %v6877_v7 = vrot.slane %v5883_v22, %v12055_v30  ;;  %v5952_v33 = vpop.xlane.xlu1 %5951  ;;  %v7120_v17 = vrot.slane %v13279_v13, %v12088_v44  ;;  %v14130_v22 = vld [vmem:[#allocation62_spill] sm:$0xff]  ;;  %v7076_v37 = vrot.slane %v14131_v63, %v12049_v5  ;;  %v7116_v3 = vsel %vm4348_vm8, %v7115_v14, %v7111_v39 }
 0x354   :  { %v6989_v52 = vrot.slane %v5952_v33, %v12136_v62  ;;  %v14132_v33 = vld [vmem:[#allocation79_spill] sm:$0xff]  ;;  %v7086_v20 = vrot.slane %v13285_v36, %v12081_v6  ;;  %v6452_v58 = vrot.slane %v14133_v24, %v12049_v5  ;;  %v14135_v14 = vld [vmem:[#allocation34_spill] sm:$0xff] }
 0x355   :  { %v13508_v41 = vsel %vm4348_vm8, %v6881_v38, %v6877_v7  ;;  %6095 = vadd.xlane.f32.xlu0 %v6094_v29  ;;  %v7018_v38 = vrot.slane %v13273_v50, %v12114_v61  ;;  %v7072_v29 = vrot.slane %v14130_v22, %v12055_v30  ;;  %v7014_v7 = vsel %vm4369_vm11, %v7013_v1, %v7009_v16  ;;  %v14141_v24 = vld [vmem:[#allocation83_spill] sm:$0xff] }
 0x356   :  { %v6990_v21 = vsel %vm4390_vm14, %v6989_v52, %v6985_v49  ;;  %v5928_v53 = vpop.xlane.xlu0 %5927  ;;  %v7081_v13 = vrot.slane %v14132_v33, %v12088_v44  ;;  %v7121_v49 = vsel %vm4355_vm9, %v7120_v17, %v7116_v3  ;;  %v6457_v1 = vrot.slane %v14134_v48, %v12088_v44 }
 0x357   :  { %v6950_v12 = vrot.slane %v5928_v53, %v12136_v62  ;;  %v5994_v18 = vpop.xlane.xlu1 %5993  ;;  %v7019_v52 = vsel %vm4376_vm12, %v7018_v38, %v7014_v7  ;;  %v7077_v32 = vsel %vm4348_vm8, %v7076_v37, %v7072_v29  ;;  %v14137_v29 = vld [vmem:[#allocation84_spill] sm:$0xff]  ;;  %v14138_v37 = vld [vmem:[#allocation85_spill] sm:$0xff]  ;;  %v6535_v33 = vrot.slane %v13351_v8, %v12088_v44 }
 0x358   :  { %v7057_v0 = vrot.slane %v5994_v18, %v12114_v61  ;;  %v7082_v36 = vsel %vm4355_vm9, %v7081_v13, %v7077_v32  ;;  %v14136_v18 = vld [vmem:[#allocation82_spill] sm:$0xff]  ;;  %v6526_v63 = vrot.slane %v14137_v29, %v12055_v30 }
 0x359   :  { %v6951_v19 = vsel %vm4390_vm14, %v6950_v12, %v6946_v56  ;;  %v6448_v12 = vrot.slane %v14135_v14, %v12055_v30  ;;  %v6462_v57 = vrot.slane %v14136_v18, %v12081_v6  ;;  %v7087_v39 = vsel %vm4362_vm10, %v7086_v20, %v7082_v36  ;;  %v14144_v18 = vld [vmem:[#allocation56_spill] sm:$0xff] }
 0x35a   :  { %v13536_v23 = vsel %vm5289_vm15, %v6990_v21, %v6951_v19  ;;  %v13539_v50 = vsel %vm4376_vm12, %v7057_v0, %v7053_v4  ;;  %v5973_v27 = vpop.xlane.xlu0 %5972  ;;  %v6467_v56 = vrot.slane %v13322_v25, %v12117_v60 }
 0x35b   :  { %v7023_v59 = vrot.slane %v5973_v27, %v12139_v31  ;;  %v6036_v34 = vpop.xlane.xlu1 %6035  ;;  %v6453_v0 = vsel %vm4348_vm8, %v6452_v58, %v6448_v12  ;;  %v6530_v27 = vrot.slane %v14138_v37, %v12049_v5  ;;  %v6496_v58 = vrot.slane %v14141_v24, %v12088_v44 }
 0x35c   :  { %v7125_v42 = vrot.slane %v6036_v34, %v12081_v6  ;;  %v6458_v4 = vsel %vm4355_vm9, %v6457_v1, %v6453_v0  ;;  %v14139_v34 = vld [vmem:[#allocation66_spill] sm:$0xff]  ;;  %v14142_v1 = vld [vmem:[#allocation45_spill] sm:$0xff] }
 0x35d   :  { %v13552_v40 = vsel %vm4383_vm13, %v7023_v59, %v7019_v52  ;;  %v6463_v22 = vsel %vm4362_vm10, %v6462_v57, %v6458_v4  ;;  %v6491_v3 = vrot.slane %v14139_v34, %v12049_v5  ;;  %v14140_v52 = vld [vmem:[#allocation67_spill] sm:$0xff]  ;;  %v6721_v36 = vrot.slane %v14142_v1, %v12055_v30  ;;  %v14146_v4 = vld [vmem:[#allocation72_spill] sm:$0xff] }
 0x35e   :  { %v13558_v21 = vsel %vm4362_vm10, %v7125_v42, %v7121_v49  ;;  %v6015_v53 = vpop.xlane.xlu0 %6014  ;;  %v6468_v7 = vsel %vm4369_vm11, %v6467_v56, %v6463_v22  ;;  %v6487_v20 = vrot.slane %v14140_v52, %v12055_v30  ;;  %v6760_v57 = vrot.slane %v14144_v18, %v12055_v30  ;;  %v14148_v52 = vld [vmem:[#allocation70_spill] sm:$0xff] }
 0x35f   :  { %v7091_v9 = vrot.slane %v6015_v53, %v12117_v60  ;;  %v6075_v2 = vpop.xlane.xlu1 %6074  ;;  %v6531_v53 = vsel %vm4348_vm8, %v6530_v27, %v6526_v63  ;;  %v6774_v63 = vrot.slane %v13237_v35, %v12081_v6  ;;  %v6735_v35 = vrot.slane %v14148_v52, %v12081_v6 }
 0x360   :  { %v7189_v13 = vrot.slane %v6075_v2, %v12055_v30  ;;  %v6536_v14 = vsel %vm4355_vm9, %v6535_v33, %v6531_v53  ;;  %v6779_v33 = vrot.slane %v13412_v26, %v12117_v60 }
 0x361   :  { %v13572_v38 = vsel %vm4369_vm11, %v7091_v9, %v7087_v39  ;;  %v14143_v9 = vld [vmem:[#allocation47_spill] sm:$0xff] }
 0x362   :  { %v6057_v16 = vpop.xlane.xlu0 %6056  ;;  %v6725_v2 = vrot.slane %v14143_v9, %v12049_v5  ;;  %v14145_v39 = vld [vmem:[#allocation59_spill] sm:$0xff] }
 0x363   :  { %v7159_v17 = vrot.slane %v6057_v16, %v12088_v44  ;;  %v5634_v19 = vpop.xlane.xlu1 %5633  ;;  %v6764_v56 = vrot.slane %v14145_v39, %v12049_v5  ;;  %v6808_v39 = vrot.slane %v13208_v15, %v12088_v44 }
 0x364   :  { %v6472_v25 = vrot.slane %v5634_v19, %v12114_v61  ;;  %v6726_v34 = vsel %vm4348_vm8, %v6725_v2, %v6721_v36  ;;  %v14149_v36 = vld [vmem:[#allocation73_spill] sm:$0xff]  ;;  %v14150_v2 = vld [vmem:[#allocation74_spill] sm:$0xff] }
 0x365   :  { %v13589_v59 = vsel %vm4355_vm9, %v7159_v17, %v13316_v45  ;;  %v6501_v45 = vrot.slane %v13301_v28, %v12081_v6  ;;  %v6492_v28 = vsel %vm4348_vm8, %v6491_v3, %v6487_v20  ;;  %v6769_v17 = vrot.slane %v14146_v4, %v12088_v44 }
 0x366   :  { %v13596_v42 = vsel %vm4376_vm12, %v6472_v25, %v6468_v7  ;;  %v6078_v49 = vpop.xlane.xlu0 %6077  ;;  %v6497_v19 = vsel %vm4355_vm9, %v6496_v58, %v6492_v28  ;;  %v14147_v25 = vld [vmem:[#allocation57_spill] sm:$0xff]  ;;  %v6765_v3 = vsel %vm4348_vm8, %v6764_v56, %v6760_v57  ;;  %v6740_v58 = vrot.slane %v13189_v46, %v12117_v60 }
 0x367   :  { %v7193_v8 = vrot.slane %v6078_v49, %v12049_v5  ;;  %v5676_v32 = vpop.xlane.xlu1 %5675  ;;  %v6502_v37 = vsel %vm4362_vm10, %v6501_v45, %v6497_v19  ;;  %v6730_v7 = vrot.slane %v14147_v25, %v12088_v44  ;;  %v6770_v24 = vsel %vm4355_vm9, %v6769_v17, %v6765_v3 }
 0x368   :  { %v6540_v48 = vrot.slane %v5676_v32, %v12081_v6  ;;  %v6775_v53 = vsel %vm4362_vm10, %v6774_v63, %v6770_v24  ;;  %v6745_v45 = vrot.slane %v13430_v11, %v12114_v61  ;;  %v6799_v9 = vrot.slane %v14149_v36, %v12055_v30 }
 0x369   :  { %v13611_v12 = vsel %vm4348_vm8, %v7193_v8, %v7189_v13  ;;  %v6780_v1 = vsel %vm4369_vm11, %v6779_v33, %v6775_v53 }
 0x36a   :  { %v13619_v0 = vsel %vm4362_vm10, %v6540_v48, %v6536_v14  ;;  %v5655_v16 = vpop.xlane.xlu0 %5654  ;;  %v6731_v48 = vsel %vm4355_vm9, %v6730_v7, %v6726_v34  ;;  %v6803_v14 = vrot.slane %v14150_v2, %v12049_v5 }
 0x36b   :  { %v6506_v22 = vrot.slane %v5655_v16, %v12117_v60  ;;  %v5784_v29 = vpop.xlane.xlu1 %5783  ;;  %v6813_v16 = vrot.slane %v13461_v10, %v12081_v6 }
 0x36c   :  { %v6716_v27 = vrot.slane %v5784_v29, %v12136_v62  ;;  %v6804_v19 = vsel %vm4348_vm8, %v6803_v14, %v6799_v9 }
 0x36d   :  { %v13634_v13 = vsel %vm4369_vm11, %v6506_v22, %v6502_v37  ;;  %v6809_v15 = vsel %vm4355_vm9, %v6808_v39, %v6804_v19 }
 0x36e   :  { %v6717_v20 = vsel %vm4390_vm14, %v6716_v27, %v13403_v55  ;;  %v5697_v49 = vpop.xlane.xlu0 %5696  ;;  %v6814_v27 = vsel %vm4362_vm10, %v6813_v16, %v6809_v15 }
 0x36f   :  { %v13647_v26 = vsel %vm5291_vm1, %v6717_v20, %v13428_v54  ;;  %v6574_v8 = vrot.slane %v5697_v49, %v12088_v44  ;;  %v5826_v32 = vpop.xlane.xlu1 %5825  ;;  %v6736_v54 = vsel %vm4362_vm10, %v6735_v35, %v6731_v48 }
 0x370   :  { %v6784_v55 = vrot.slane %v5826_v32, %v12114_v61  ;;  %v6741_v57 = vsel %vm4369_vm11, %v6740_v58, %v6736_v54 }
 0x371   :  { %v6575_v46 = vsel %vm4355_vm9, %v6574_v8, %v13399_v47  ;;  %v6746_v28 = vsel %vm4376_vm12, %v6745_v45, %v6741_v57 }
 0x372   :  { %v13664_v18 = vsel %vm4376_vm12, %v6784_v55, %v6780_v1  ;;  %v5805_v11 = vpop.xlane.xlu0 %5804 }
 0x373   :  { %v6750_v56 = vrot.slane %v5805_v11, %v12139_v31  ;;  %v5868_v47 = vpop.xlane.xlu1 %5867 }
 0x374   :  { %v6852_v4 = vrot.slane %v5868_v47, %v12081_v6 }
 0x375   :  { %v6751_v17 = vsel %vm4383_vm13, %v6750_v56, %v6746_v28 }
 0x376   :  { %v13678_v22 = vsel %vm4362_vm10, %v6852_v4, %v13459_v51  ;;  %v5847_v29 = vpop.xlane.xlu0 %5846 }
 0x377   :  { %v6818_v63 = vrot.slane %v5847_v29, %v12117_v60  ;;  %v5976_v37 = vpop.xlane.xlu1 %5975 }
 0x378   :  { %v7028_v10 = vrot.slane %v5976_v37, %v12136_v62 }
 0x379   :  { %v6819_v25 = vsel %vm4369_vm11, %v6818_v63, %v6814_v27 }
 0x37a   :  { %v7029_v7 = vsel %vm4390_vm14, %v7028_v10, %v13552_v40  ;;  %v5889_v33 = vpop.xlane.xlu0 %5888 }
 0x37b   :  { %v7240_v51 = vsel %vm5291_vm1, %v7029_v7, %v13536_v23  ;;  %v6886_v34 = vrot.slane %v5889_v33, %v12088_v44  ;;  %v6018_v3 = vpop.xlane.xlu1 %6017 }
 0x37c   :  { %v7096_v52 = vrot.slane %v6018_v3, %v12114_v61 }
 0x37d   :  { %v6887_v35 = vsel %vm4355_vm9, %v6886_v34, %v13508_v41 }
 0x37e   :  { %v7097_v20 = vsel %vm4376_vm12, %v7096_v52, %v13572_v38  ;;  %v5997_v49 = vpop.xlane.xlu0 %5996 }
 0x37f   :  { %v7062_v24 = vrot.slane %v5997_v49, %v12139_v31  ;;  %v6060_v58 = vpop.xlane.xlu1 %6059  ;;  %v14152_v49 = vld [vmem:[#allocation10_spill] sm:$0xff] }
 0x380   :  { %v7164_v40 = vrot.slane %v6060_v58, %v12081_v6  ;;  %v14153_v58 = vld [vmem:[#allocation11_spill] sm:$0xff] }
 0x381   :  { %v7063_v23 = vsel %vm4383_vm13, %v7062_v24, %v13539_v50  ;;  %v6335_v24 = vrot.slane %v14152_v49, %v12049_v5  ;;  %v14167_v49 = vld [vmem:[#allocation15_spill] sm:$0xff] }
 0x382   :  { %v7165_v8 = vsel %vm4362_vm10, %v7164_v40, %v13589_v59  ;;  %v6039_v32 = vpop.xlane.xlu0 %6038  ;;  %v6331_v40 = vrot.slane %v14153_v58, %v12055_v30 }
 0x383   :  { %v7130_v53 = vrot.slane %v6039_v32, %v12117_v60  ;;  %v5637_v45 = vpop.xlane.xlu1 %5636 }
 0x384   :  { %v6477_v41 = vrot.slane %v5637_v45, %v12139_v31 }
 0x385   :  { %v7131_v38 = vsel %vm4369_vm11, %v7130_v53, %v13558_v21  ;;  %v14156_v53 = vld [vmem:[#allocation19_spill] sm:$0xff] }
 0x386   :  { %v13707_v55 = vsel %vm4383_vm13, %v6477_v41, %v13596_v42  ;;  %v6081_v48 = vpop.xlane.xlu0 %6080  ;;  %v6370_v45 = vrot.slane %v14156_v53, %v12055_v30 }
 0x387   :  { %v7198_v1 = vrot.slane %v6081_v48, %v12088_v44  ;;  %v5679_v50 = vpop.xlane.xlu1 %5678  ;;  %v14157_v48 = vld [vmem:[#allocation26_spill] sm:$0xff] }
 0x388   :  { %v6545_v54 = vrot.slane %v5679_v50, %v12117_v60  ;;  %v14158_v50 = vld [vmem:[#allocation27_spill] sm:$0xff] }
 0x389   :  { %v13713_v59 = vsel %vm4355_vm9, %v7198_v1, %v13611_v12  ;;  %v6413_v1 = vrot.slane %v14157_v48, %v12049_v5 }
 0x38a   :  { %v13717_v36 = vsel %vm4369_vm11, %v6545_v54, %v13619_v0  ;;  %v5658_v9 = vpop.xlane.xlu0 %5657  ;;  %v6409_v54 = vrot.slane %v14158_v50, %v12055_v30  ;;  %v14170_v50 = vld [vmem:[#allocation31_spill] sm:$0xff] }
 0x38b   :  { %v6511_v21 = vrot.slane %v5658_v9, %v12114_v61  ;;  %v5808_v2 = vpop.xlane.xlu1 %5807 }
 0x38c   :  { %v6755_v42 = vrot.slane %v5808_v2, %v12136_v62 }
 0x38d   :  { %v13723_v14 = vsel %vm4376_vm12, %v6511_v21, %v13634_v13  ;;  %v14159_v21 = vld [vmem:[#allocation13_spill] sm:$0xff] }
 0x38e   :  { %v6756_v11 = vsel %vm4390_vm14, %v6755_v42, %v6751_v17  ;;  %v5700_v57 = vpop.xlane.xlu0 %5699  ;;  %v6340_v2 = vrot.slane %v14159_v21, %v12088_v44 }
 0x38f   :  { %v13728_v12 = vsel %vm5293_vm2, %v6756_v11, %v13647_v26  ;;  %v6579_v0 = vrot.slane %v5700_v57, %v12081_v6  ;;  %v5850_v39 = vpop.xlane.xlu1 %5849  ;;  %v14160_v11 = vld [vmem:[#allocation5_spill] sm:$0xff] }
 0x390   :  { %v6823_v56 = vrot.slane %v5850_v39, %v12114_v61  ;;  %v6301_v57 = vrot.slane %v14160_v11, %v12088_v44  ;;  %v14171_v11 = vld [vmem:[#allocation14_spill] sm:$0xff] }
 0x391   :  { %v13733_v47 = vsel %vm4362_vm10, %v6579_v0, %v6575_v46  ;;  %v6336_v0 = vsel %vm4348_vm8, %v6335_v24, %v6331_v40  ;;  %v6350_v24 = vrot.slane %v14167_v49, %v12117_v60  ;;  %v14168_v40 = vld [vmem:[#allocation7_spill] sm:$0xff]  ;;  %v14180_v49 = vld [vmem:[#allocation16_spill] sm:$0xff] }
 0x392   :  { %v13736_v28 = vsel %vm4376_vm12, %v6823_v56, %v6819_v25  ;;  %v5829_v13 = vpop.xlane.xlu0 %5828 }
 0x393   :  { %v6789_v16 = vrot.slane %v5829_v13, %v12139_v31  ;;  %v5892_v4 = vpop.xlane.xlu1 %5891 }
 0x394   :  { %v6891_v17 = vrot.slane %v5892_v4, %v12081_v6 }
 0x395   :  { %v6790_v26 = vsel %vm4383_vm13, %v6789_v16, %v13664_v18  ;;  %v14163_v16 = vld [vmem:[#allocation12_spill] sm:$0xff] }
 0x396   :  { %v13743_v19 = vsel %vm4362_vm10, %v6891_v17, %v6887_v35  ;;  %v13745_v29 = vpop.xlane.xlu0 %5870  ;;  %v14151_v35 = vld [vmem:[#allocation2_spill] sm:$0xff]  ;;  %v6345_v4 = vrot.slane %v14163_v16, %v12081_v6  ;;  %v6414_v17 = vsel %vm4348_vm8, %v6413_v1, %v6409_v54  ;;  %v6428_v54 = vrot.slane %v14170_v50, %v12117_v60 }
 0x397   :  { %v6021_v15 = vpop.xlane.xlu1 %6020 }
 0x398   :  { %v7101_v46 = vrot.slane %v6021_v15, %v12139_v31 }
 0x39a   :  { %v13749_v63 = vsel %vm4383_vm13, %v7101_v46, %v7097_v20  ;;  %v6000_v37 = vpop.xlane.xlu0 %5999  ;;  %v6296_v20 = vrot.slane %v14151_v35, %v12049_v5  ;;  %v14164_v46 = vld [vmem:[#allocation4_spill] sm:$0xff] }
 0x39b   :  { %v7067_v27 = vrot.slane %v6000_v37, %v12136_v62  ;;  %v6063_v10 = vpop.xlane.xlu1 %6062  ;;  %v6306_v37 = vrot.slane %v14164_v46, %v12081_v6  ;;  %v14176_v46 = vld [vmem:[#allocation30_spill] sm:$0xff] }
 0x39c   :  { %v7169_v25 = vrot.slane %v6063_v10, %v12117_v60  ;;  %v14165_v10 = vld [vmem:[#allocation20_spill] sm:$0xff] }
 0x39d   :  { %v7068_v7 = vsel %vm4390_vm14, %v7067_v27, %v7063_v23  ;;  %v6341_v27 = vsel %vm4355_vm9, %v6340_v2, %v6336_v0  ;;  %v14172_v0 = vld [vmem:[#allocation6_spill] sm:$0xff] }
 0x39e   :  { %v13755_v18 = vsel %vm5293_vm2, %v7068_v7, %v7240_v51  ;;  %v13758_v33 = vsel %vm4369_vm11, %v7169_v25, %v7165_v8  ;;  %v6042_v34 = vpop.xlane.xlu0 %6041  ;;  %v14154_v51 = vld [vmem:[#allocation3_spill] sm:$0xff]  ;;  %v14155_v8 = vld [vmem:[#allocation18_spill] sm:$0xff]  ;;  %v6384_v25 = vrot.slane %v14165_v10, %v12081_v6  ;;  %v14177_v10 = vld [vmem:[#allocation9_spill] sm:$0xff] }
 0x39f   :  { %v7135_v3 = vrot.slane %v6042_v34, %v12114_v61  ;;  %v13761_v52 = vpop.xlane.xlu1 %5639  ;;  %v6292_v23 = vrot.slane %v14154_v51, %v12055_v30  ;;  %v6374_v32 = vrot.slane %v14155_v8, %v12049_v5  ;;  %v14162_v30 = vld [vmem:[#allocation29_spill] sm:$0xff]  ;;  %v6311_v51 = vrot.slane %v14168_v40, %v12117_v60  ;;  %v14169_v8 = vld [vmem:[#allocation23_spill] sm:$0xff] }
 0x3a0   :  { %v6418_v13 = vrot.slane %v14162_v30, %v12088_v44  ;;  %v14174_v30 = vld [vmem:[#allocation22_spill] sm:$0xff] }
 0x3a1   :  { %v13776_v41 = vsel %vm4376_vm12, %v7135_v3, %v7131_v38  ;;  %v14161_v38 = vld [vmem:[#allocation21_spill] sm:$0xff]  ;;  %v6297_v5 = vsel %vm4348_vm8, %v6296_v20, %v6292_v23  ;;  %v6375_v56 = vsel %vm4348_vm8, %v6374_v32, %v6370_v45  ;;  %v14166_v3 = vld [vmem:[#allocation28_spill] sm:$0xff]  ;;  %v6346_v23 = vsel %vm4362_vm10, %v6345_v4, %v6341_v27 }
 0x3a2   :  { %v13782_v9 = vpop.xlane.xlu0 %6083  ;;  %v6379_v39 = vrot.slane %v14161_v38, %v12088_v44  ;;  %v6302_v34 = vsel %vm4355_vm9, %v6301_v57, %v6297_v5  ;;  %v6423_v35 = vrot.slane %v14166_v3, %v12081_v6  ;;  %v6419_v58 = vsel %vm4355_vm9, %v6418_v13, %v6414_v17  ;;  %v14173_v5 = vld [vmem:[#allocation17_spill] sm:$0xff] }
 0x3a3   :  { %v13786_v42 = vpop.xlane.xlu1 %5681  ;;  %v6389_v32 = vrot.slane %v14169_v8, %v12117_v60  ;;  %v6307_v48 = vsel %vm4362_vm10, %v6306_v37, %v6302_v34  ;;  %v6355_v57 = vrot.slane %v14171_v11, %v12114_v61  ;;  %v6316_v38 = vrot.slane %v14172_v0, %v12114_v61  ;;  %v14175_v4 = vld [vmem:[#allocation25_spill] sm:$0xff]  ;;  %v14181_v8 = vld [vmem:[#allocation24_spill] sm:$0xff] }
 0x3a4   :  { %v6380_v44 = vsel %vm4355_vm9, %v6379_v39, %v6375_v56  ;;  %v6351_v39 = vsel %vm4369_vm11, %v6350_v24, %v6346_v23  ;;  %v6360_v56 = vrot.slane %v14173_v5, %v12139_v31  ;;  %v6394_v13 = vrot.slane %v14174_v30, %v12114_v61  ;;  %v14178_v34 = vld [vmem:[#allocation33_spill] sm:$0xff] }
 0x3a5   :  { %v6385_v1 = vsel %vm4362_vm10, %v6384_v25, %v6380_v44  ;;  %v6399_v17 = vrot.slane %v14175_v4, %v12139_v31  ;;  %v6433_v37 = vrot.slane %v14176_v46, %v12114_v61  ;;  %v6321_v25 = vrot.slane %v14177_v10, %v12139_v31 }
 0x3a6   :  { %v13800_v15 = vpop.xlane.xlu0 %5660  ;;  %v6390_v16 = vsel %vm4369_vm11, %v6389_v32, %v6385_v1  ;;  %v6438_v44 = vrot.slane %v14178_v34, %v12139_v31  ;;  %v6365_v24 = vrot.slane %v14180_v49, %v12136_v62  ;;  %v6404_v32 = vrot.slane %v14181_v8, %v12136_v62  ;;  %v14182_v1 = vld [vmem:[#allocation32_spill] sm:$0xff] }
 0x3a7   :  { %v5832_v7 = vpop.xlane.xlu1 %5831  ;;  %v6443_v50 = vrot.slane %v14182_v1, %v12136_v62 }
 0x3a8   :  { %v6794_v20 = vrot.slane %v5832_v7, %v12136_v62 }
 0x3aa   :  { %v6795_v53 = vsel %vm4390_vm14, %v6794_v20, %v6790_v26  ;;  %v13821_v45 = vpop.xlane.xlu0 %5702  ;;  %v6424_v26 = vsel %vm4362_vm10, %v6423_v35, %v6419_v58  ;;  %v14179_v35 = vld [vmem:[#allocation8_spill] sm:$0xff]  ;;  %v6356_v58 = vsel %vm4376_vm12, %v6355_v57, %v6351_v39 }
 0x3ab   :  { %v13829_v21 = vsel %vm5295_vm3, %v6795_v53, %v13728_v12  ;;  %v13831_v2 = vpop.xlane.xlu1 %5873  ;;  %v6312_v12 = vsel %vm4369_vm11, %v6311_v51, %v6307_v48  ;;  %v6429_v7 = vsel %vm4369_vm11, %v6428_v54, %v6424_v26  ;;  %v6326_v20 = vrot.slane %v14179_v35, %v12136_v62 }
 0x3ac   :  { %v6317_v51 = vsel %vm4376_vm12, %v6316_v38, %v6312_v12  ;;  %v6361_v23 = vsel %vm4383_vm13, %v6360_v56, %v6356_v58  ;;  %v6395_v53 = vsel %vm4376_vm12, %v6394_v13, %v6390_v16  ;;  %v6434_v54 = vsel %vm4376_vm12, %v6433_v37, %v6429_v7 }
 0x3ad   :  { %v6400_v48 = vsel %vm4383_vm13, %v6399_v17, %v6395_v53  ;;  %v6322_v26 = vsel %vm4383_vm13, %v6321_v25, %v6317_v51  ;;  %v6439_v0 = vsel %vm4383_vm13, %v6438_v44, %v6434_v54  ;;  %v6482_v38 = vrot.slane %v13761_v52, %v12136_v62 }
 0x3ae   :  { %v13849_v27 = vpop.xlane.xlu0 %5327  ;;  %v6366_v56 = vsel %vm4390_vm14, %v6365_v24, %v6361_v23  ;;  %v6405_v30 = vsel %vm4390_vm14, %v6404_v32, %v6400_v48  ;;  %v6327_v13 = vsel %vm4390_vm14, %v6326_v20, %v6322_v26  ;;  %v6444_v12 = vsel %vm4390_vm14, %v6443_v50, %v6439_v0 }
 0x3af   :  { %v6024_v3 = vpop.xlane.xlu1 %6023  ;;  %v7225_v4 = vsel %vm5289_vm15, %v6366_v56, %v6327_v13  ;;  %v6483_v52 = vsel %vm4390_vm14, %v6482_v38, %v13707_v55  ;;  %v6857_v0 = vrot.slane %v13745_v29, %v12117_v60 }
 0x3b0   :  { %v7106_v40 = vrot.slane %v6024_v3, %v12136_v62  ;;  %v7226_v17 = vsel %vm5291_vm1, %v6405_v30, %v7225_v4 }
 0x3b1   :  { %v7227_v37 = vsel %vm5293_vm2, %v6444_v12, %v7226_v17 }
 0x3b2   :  { %v7107_v11 = vsel %vm4390_vm14, %v7106_v40, %v13749_v63  ;;  %v5853_v57 = vpop.xlane.xlu0 %5852  ;;  %v6516_v63 = vrot.slane %v13800_v15, %v12139_v31  ;;  %v7228_v10 = vsel %vm5295_vm3, %v6483_v52, %v7227_v37 }
 0x3b3   :  { %v7242_v39 = vsel %vm5295_vm3, %v7107_v11, %v13755_v18  ;;  %v13879_v5 = vpop.xlane.xlu1 %6065  ;;  %v6828_v24 = vrot.slane %v5853_v57, %v12139_v31  ;;  %v6550_v11 = vrot.slane %v13786_v42, %v12114_v61 }
 0x3b4   :  { %v6517_v15 = vsel %vm4383_vm13, %v6516_v63, %v13723_v14  ;;  %v7174_v52 = vrot.slane %v13879_v5, %v12114_v61  ;;  %v6584_v5 = vrot.slane %v13821_v45, %v12117_v60 }
 0x3b5   :  { %v6829_v53 = vsel %vm4383_vm13, %v6828_v24, %v13736_v28  ;;  %v6551_v28 = vsel %vm4376_vm12, %v6550_v11, %v13717_v36  ;;  %v6858_v36 = vsel %vm4369_vm11, %v6857_v0, %v13678_v22 }
 0x3b6   :  { %v5895_v16 = vpop.xlane.xlu0 %5894 }
 0x3b7   :  { %v5664_v18 = vpop.xlane.xlu1 %5663 }
 0x3b8   :  { %v6521_v46 = vrot.slane %v5664_v18, %v12136_v62 }
 0x3ba   :  { %v6522_v25 = vsel %vm4390_vm14, %v6521_v46, %v6517_v15  ;;  %v6045_v7 = vpop.xlane.xlu0 %6044 }
 0x3bb   :  { %v13897_v34 = vpop.xlane.xlu1 %5705  ;;  %v7229_v44 = vsel %vm5297_vm4, %v6522_v25, %v7228_v10  ;;  %v7140_v35 = vrot.slane %v6045_v7, %v12139_v31 }
 0x3bd   :  { %v7141_v58 = vsel %vm4383_vm13, %v7140_v35, %v13776_v41  ;;  %v7175_v35 = vsel %vm4376_vm12, %v7174_v52, %v13758_v33  ;;  %v6585_v33 = vsel %vm4369_vm11, %v6584_v5, %v13733_v47 }
 0x3be   :  { %v13900_v55 = vpop.xlane.xlu0 %6086 }
 0x3bf   :  { %v5877_v3 = vpop.xlane.xlu1 %5876 }
 0x3c0   :  { %v6867_v42 = vrot.slane %v5877_v3, %v12139_v31 }
 0x3c2   :  { %v5685_v20 = vpop.xlane.xlu0 %5684 }
 0x3c3   :  { %v6048_v49 = vpop.xlane.xlu1 %6047  ;;  %v6555_v26 = vrot.slane %v5685_v20, %v12139_v31  ;;  %v6589_v20 = vrot.slane %v13897_v34, %v12114_v61  ;;  %v7208_v34 = vrot.slane %v13900_v55, %v12117_v60 }
 0x3c4   :  { %v7145_v14 = vrot.slane %v6048_v49, %v12136_v62 }
 0x3c5   :  { %v6556_v63 = vsel %vm4383_vm13, %v6555_v26, %v6551_v28 }
 0x3c6   :  { %v7146_v40 = vsel %vm4390_vm14, %v7145_v14, %v7141_v58  ;;  %v5856_v51 = vpop.xlane.xlu0 %5855 }
 0x3c7   :  { %v6833_v23 = vrot.slane %v5856_v51, %v12136_v62  ;;  %v13909_v8 = vpop.xlane.xlu1 %6089  ;;  %v7243_v32 = vsel %vm5297_vm4, %v7146_v40, %v7242_v39  ;;  %v6862_v39 = vrot.slane %v13831_v2, %v12114_v61  ;;  %v7203_v40 = vrot.slane %v13782_v9, %v12081_v6 }
 0x3c9   :  { %v6834_v48 = vsel %vm4390_vm14, %v6833_v23, %v6829_v53  ;;  %v7204_v47 = vsel %vm4362_vm10, %v7203_v40, %v13713_v59 }
 0x3ca   :  { %v5898_v1 = vpop.xlane.xlu0 %5897  ;;  %v7236_v50 = vsel %vm5297_vm4, %v6834_v48, %v13829_v21  ;;  %v6896_v21 = vrot.slane %v5895_v16, %v12117_v60  ;;  %v6863_v16 = vsel %vm4376_vm12, %v6862_v39, %v6858_v36  ;;  %v6590_v48 = vsel %vm4376_vm12, %v6589_v20, %v6585_v33 }
 0x3cb   :  { %v5709_v54 = vpop.xlane.xlu1 %5708  ;;  %v6901_v13 = vrot.slane %v5898_v1, %v12114_v61  ;;  %v6868_v37 = vsel %vm4383_vm13, %v6867_v42, %v6863_v16  ;;  %v7213_v1 = vrot.slane %v13909_v8, %v12114_v61  ;;  %v7209_v60 = vsel %vm4369_vm11, %v7208_v34, %v7204_v47 }
 0x3cc   :  { %v6897_v18 = vsel %vm4369_vm11, %v6896_v21, %v13743_v19  ;;  %v6594_v14 = vrot.slane %v5709_v54, %v12139_v31 }
 0x3cd   :  { %v6902_v15 = vsel %vm4376_vm12, %v6901_v13, %v6897_v18 }
 0x3ce   :  { %v6069_v41 = vpop.xlane.xlu0 %6068  ;;  %v6595_v6 = vsel %vm4383_vm13, %v6594_v14, %v6590_v48  ;;  %v7312_v48 = vstv %s281_s14 }
 0x3cf   :  { %v5901_v57 = vpop.xlane.xlu1 %5900  ;;  %v7179_v22 = vrot.slane %v6069_v41, %v12139_v31  ;;  %v7214_v41 = vsel %vm4376_vm12, %v7213_v1, %v7209_v60 }
 0x3d0   :  { %v6906_v29 = vrot.slane %v5901_v57, %v12139_v31 }
 0x3d1   :  { %v7180_v58 = vsel %vm4383_vm13, %v7179_v22, %v7175_v35 }
 0x3d2   :  { %v5688_v38 = vpop.xlane.xlu0 %5687  ;;  %v6907_v25 = vsel %vm4383_vm13, %v6906_v29, %v6902_v15 }
 0x3d3   :  { %v6560_v56 = vrot.slane %v5688_v38, %v12136_v62  ;;  %v6093_v30 = vpop.xlane.xlu1 %6092 }
 0x3d4   :  { %v7218_v9 = vrot.slane %v6093_v30, %v12139_v31 }
 0x3d5   :  { %v6561_v12 = vsel %vm4390_vm14, %v6560_v56, %v6556_v63  ;;  %v14183_v56 = vld [vmem:[#allocation87_spill] sm:$0xff] }
 0x3d6   :  { %v5880_v4 = vpop.xlane.xlu0 %5879  ;;  %v7230_v2 = vsel %vm5299_vm5, %v6561_v12, %v7229_v44  ;;  %v7219_v11 = vsel %vm4383_vm13, %v7218_v9, %v7214_v41 }
 0x3d7   :  { %v6872_v17 = vrot.slane %v5880_v4, %v12136_v62  ;;  %v5904_v46 = vpop.xlane.xlu1 %5903 }
 0x3d8   :  { %v6911_v10 = vrot.slane %v5904_v46, %v12136_v62 }
 0x3d9   :  { %v6873_v7 = vsel %vm4390_vm14, %v6872_v17, %v6868_v37 }
 0x3da   :  { %v6072_v44 = vpop.xlane.xlu0 %6071  ;;  %v6912_v19 = vsel %vm4390_vm14, %v6911_v10, %v6907_v25  ;;  %v7237_v3 = vsel %vm5299_vm5, %v6873_v7, %v7236_v50 }
 0x3db   :  { %v7184_v49 = vrot.slane %v6072_v44, %v12136_v62  ;;  %v7238_v24 = vsel %vm5301_vm6, %v6912_v19, %v7237_v3  ;;  %v14184_v19 = vld [vmem:[#allocation44_spill] sm:$0xff] }
 0x3dc   :  { %v7252_v45 = vsel %vm282_vm0, %v7238_v24, 0.0 }
 0x3dd   :  { %v7185_v51 = vsel %vm4390_vm14, %v7184_v49, %v7180_v58  ;;  %7253 = vadd.xlane.f32.xlu0 %v7252_v45 }
 0x3de   :  { %v5712_v23 = vpop.xlane.xlu0 %5711  ;;  %v7244_v53 = vsel %vm5299_vm5, %v7185_v51, %v7243_v32 }
 0x3df   :  { %v6599_v50 = vrot.slane %v5712_v23, %v12136_v62  ;;  %v14185_v23 = vld [vmem:[#allocation41_spill] sm:$0xff] }
 0x3e0   :  { %vm7309_vm13 = vcmp.eq.s32.totalorder %v14185_v23, 1 }
 0x3e1   :  { %v6600_v54 = vsel %vm4390_vm14, %v6599_v50, %v6595_v6 }
 0x3e2   :  { %v6096_v55 = vpop.xlane.xlu0 %6095  ;;  %v7231_v32 = vsel %vm5301_vm6, %v6600_v54, %v7230_v2 }
 0x3e3   :  { %v7223_v61 = vrot.slane %v6096_v55, %v12136_v62  ;;  %v7249_v8 = vsel %vm282_vm0, %v7231_v32, 0.0 }
 0x3e4   :  { %7250 = vadd.xlane.f32.xlu1 %v7249_v8 }
 0x3e5   :  { %v7224_v31 = vsel %vm4390_vm14, %v7223_v61, %v7219_v11  ;;  %vm7308_vm14 = vcmp.eq.s32.totalorder %v14185_v23, 0 }
 0x3e6   :  { %v7245_v59 = vsel %vm5301_vm6, %v7224_v31, %v7244_v53 }
 0x3e7   :  { %v7255_v57 = vsel %vm282_vm0, %v7245_v59, 0.0 }
 0x3e8   :  { %7256 = vadd.xlane.f32.xlu1 %v7255_v57 }
 0x46a   :  { %v7254_v26 = vpop.xlane.xlu0 %7253 }
 0x46b   :  { %v7259_v0 = vmul.f32 2.0, %v7254_v26 }
 0x46d   :  { %v7262_v38 = vsub.f32 %v13255_v43, %v7259_v0 }
 0x46f   :  { %v7265_v28 = vadd.f32 64.0, %v7262_v38 }
 0x471   :  { %v7251_v39 = vpop.xlane.xlu1 %7250  ;;  %v7268_v21 = vmax.f32 %v7265_v28, 0.0 }
 0x472   :  { %v7258_v62 = vmul.f32 2.0, %v7251_v39 }
 0x473   :  { %9347 = vrsqrt.f32 %v7268_v21  ;;  %vm7279_vm8 = vcmp.eq.f32.partialorder %v7268_v21, inf  ;;  %v7282_v22 = vand.u32 2147483648, %v7268_v21  ;;  %vm7281_vm10 = vcmp.eq.f32.partialorder %v7268_v21, 0.0 }
 0x474   :  { %v7261_v30 = vsub.f32 %v14183_v56, %v7258_v62 }
 0x475   :  { %v7257_v42 = vpop.xlane.xlu1 %7256 }
 0x476   :  { %v7264_v63 = vadd.f32 64.0, %v7261_v30  ;;  %v7260_v13 = vmul.f32 2.0, %v7257_v42 }
 0x478   :  { %v7267_v29 = vmax.f32 %v7264_v63, 0.0  ;;  %v7263_v12 = vsub.f32 %v13849_v27, %v7260_v13 }
 0x47a   :  { %9349 = vrsqrt.f32 %v7267_v29  ;;  %v7266_v36 = vadd.f32 64.0, %v7263_v12  ;;  %vm7272_vm0 = vcmp.eq.f32.partialorder %v7267_v29, inf  ;;  %v7275_v18 = vand.u32 2147483648, %v7267_v29 }
 0x47b   :  { %vm7274_vm9 = vcmp.eq.f32.partialorder %v7267_v29, 0.0 }
 0x47c   :  { %v7269_v4 = vmax.f32 %v7266_v36, 0.0 }
 0x47d   :  { %v9348_v2 = vpop.eup %9347 }
 0x47e   :  { %9351 = vrsqrt.f32 %v7269_v4  ;;  %v7278_v16 = vmul.f32 %v9348_v2, %v7268_v21  ;;  %vm7286_vm11 = vcmp.eq.f32.partialorder %v7269_v4, inf  ;;  %v7289_v25 = vand.u32 2147483648, %v7269_v4 }
 0x47f   :  { %vm7288_vm12 = vcmp.eq.f32.partialorder %v7269_v4, 0.0 }
 0x480   :  { %v7280_v46 = vsel %vm7279_vm8, %v7268_v21, %v7278_v16 }
 0x481   :  { %v7283_v27 = vsel %vm7281_vm10, %v7282_v22, %v7280_v46 }
 0x482   :  { %v7295_v35 = vsel %vm266_vm7, %v7283_v27, 0.0 }
 0x484   :  { %v9350_v43 = vpop.eup %9349 }
 0x485   :  { %v7271_v52 = vmul.f32 %v9350_v43, %v7267_v29 }
 0x487   :  { %v7273_v17 = vsel %vm7272_vm0, %v7267_v29, %v7271_v52 }
 0x488   :  { %v9352_v37 = vpop.eup %9351  ;;  %v7276_v15 = vsel %vm7274_vm9, %v7275_v18, %v7273_v17 }
 0x489   :  { %v7285_v10 = vmul.f32 %v9352_v37, %v7269_v4  ;;  %v7294_v5 = vsel %vm266_vm7, %v7276_v15, 0.0 }
 0x48a   :  { %v7296_v20 = vadd.f32 %v7295_v35, %v7294_v5 }
 0x48b   :  { %v7287_v7 = vsel %vm7286_vm11, %v7269_v4, %v7285_v10 }
 0x48c   :  { %v7290_v44 = vsel %vm7288_vm12, %v7289_v25, %v7287_v7 }
 0x48d   :  { %v7293_v3 = vmul.f32 %v14184_v19, %v7290_v44 }
 0x48f   :  { %v7297_v49 = vsel %vm266_vm7, %v7293_v3, 0.0 }
 0x490   :  { %v7298_v24 = vadd.f32 %v7297_v49, %v7296_v20 }
 0x492   :  { %7299 = vadd.xlane.f32.xlu0 %v7298_v24 }
 0x51f   :  { %v7300_v14 = vpop.xlane.xlu0 %7299 }
 0x520   :  { %v7301_v58 = vrot.slane %v7300_v14, 4 }
 0x522   :  { %v7302_v45 = vadd.f32 %v7301_v58, %v7300_v14 }
 0x524   :  { %v7303_v40 = vrot.slane %v7302_v45, 2 }
 0x526   :  { %v7304_v51 = vadd.f32 %v7303_v40, %v7302_v45 }
 0x528   :  { %v7305_v33 = vrot.slane %v7304_v51, 1 }
 0x52a   :  { %v7306_v34 = vadd.f32 %v7305_v33, %v7304_v51 }
 0x52c   :  { %9341 = vpush %v7306_v34 }
 0x55d   :  { %s9342_s15 = spop %9341 }
 0x55e   :  { %v7310_v53 = vstv %s9342_s15 }
 0x55f   :  { %v7311_v1 = vsel %vm7309_vm13, %v7310_v53, 0.0 }
 0x560   :  { %v7313_v50 = vsel %vm7308_vm14, %v7312_v48, %v7311_v1 }
 0x561   :  { %7314 = vst [vmem:[%s14002_s3] sm:$0xff] %v7313_v50 }

</bundles_post_ra>
